<compile_context>
chip_gen: v5e
topology: v5e:2x2
jax: 0.10.0
libtpu: 0.0.40
codegen_flags: <defaults>
</compile_context>

<pallas_src>
import functools

import jax
import jax.numpy as jnp
from jax.experimental import pallas as pl
from jax.experimental.pallas import tpu as pltpu


# MXU operand dtype; accumulation is always f32 (preferred_element_type).
_MATMUL_DTYPE = jnp.bfloat16


# ----------------------------------------------------------------------------
# helpers
# ----------------------------------------------------------------------------
def _full_spec(shape):
    """Whole-array block (grid=(1,)); full-array blocks satisfy tiling rules."""
    nd = len(shape)
    return pl.BlockSpec(shape, lambda *_, _nd=nd: (0,) * _nd)


def _leaky_relu(x):
    return jnp.where(x > 0, x, 0.01 * x)


def _dot(a, w):
    """bf16 MXU operands (weights already bf16), f32 accumulation."""
    return jnp.dot(a.astype(_MATMUL_DTYPE), w, preferred_element_type=jnp.float32)


# ----------------------------------------------------------------------------
# The single fused kernel
# ----------------------------------------------------------------------------
def _rvae_kernel(*refs, n_enc, n_dec, T, B, H, d_tot):
    # ---- unpack refs (inputs, outputs, scratch) ----
    i = 0
    x_ref = refs[i]; i += 1            # [N, F1+F2+F3], time-major rows
    eps_ref = refs[i]; i += 1          # [N, Dtot]  ([eps1|eps2|eps3])
    enc = [(refs[i + 2 * l], refs[i + 2 * l + 1]) for l in range(n_enc)]
    i += 2 * n_enc
    head_w_ref, head_b_ref = refs[i], refs[i + 1]; i += 2
    wx0_ref, b0_ref, wh0_ref = refs[i], refs[i + 1], refs[i + 2]; i += 3
    w1_ref, b1_ref = refs[i], refs[i + 1]; i += 2
    wproj_ref, bproj_ref = refs[i], refs[i + 1]; i += 2
    dec = [(refs[i + 2 * l], refs[i + 2 * l + 1]) for l in range(n_dec)]
    i += 2 * n_dec
    muvar_ref = refs[i]                # [N, 2*Dtot] = [mu1|mu2|mu3|lv1|lv2|lv3]
    recon_ref = refs[i + 1]            # [N, F1+F2+F3]
    h_scr = refs[i + 2]                # VMEM scratch [N, H] (hidden sequence)

    # ---- encoder: 3 views fused via block-diagonal weights (1 dot / layer) --
    h = x_ref[...]
    for w_ref, b_ref in enc:
        h = _leaky_relu(_dot(h, w_ref[...]) + b_ref[...])
    mv = _dot(h, head_w_ref[...]) + head_b_ref[...]      # [N, 2*Dtot]
    muvar_ref[...] = mv                                   # single slab store
    mu = mv[:, 0:d_tot]                                   # lane-contiguous block
    lv = mv[:, d_tot:2 * d_tot]
    # reparameterize on contiguous blocks; z_cat never leaves the kernel
    z = eps_ref[...] * jnp.exp(0.5 * lv) + mu             # [N, Dtot]

    # ---- 2-layer LSTM, gate-fused weights, fully unrolled over T -----------
    # Hoisted layer-0 input projection: one [N, Dcat] @ [Dcat, 4H] matmul.
    gx = _dot(z, wx0_ref[...]) + b0_ref[...]              # [N, 4H], kept in vregs
    # Hoisted recurrent weight loads / bias broadcast (outside the T loop).
    wh0 = wh0_ref[...]                                    # [H, 4H] bf16
    w1 = w1_ref[...]                                      # [2H, 4H] bf16
    b1 = jnp.broadcast_to(b1_ref[...], (B, 4 * H))        # [B, 4H] f32

    zero = jnp.zeros((B, H), jnp.float32)
    h0, c0, h1, c1 = zero, zero, zero, zero
    for t in range(T):
        r0 = t * B
        gx_t = gx[r0:r0 + B, :]                           # value slice (no scratch)
        # layer 0: only the recurrent dot is on the serial path
        pre0 = gx_t + jnp.dot(h0.astype(_MATMUL_DTYPE), wh0,
                              preferred_element_type=jnp.float32)
        i0 = jax.nn.sigmoid(pre0[:, 0:H])
        f0 = jax.nn.sigmoid(pre0[:, H:2 * H])
        g0 = jnp.tanh(pre0[:, 2 * H:3 * H])
        o0 = jax.nn.sigmoid(pre0[:, 3 * H:4 * H])
        c0 = f0 * c0 + i0 * g0
        h0 = o0 * jnp.tanh(c0)
        # layer 1: fused [input | recurrent] weight -> one dot per step
        cat = jnp.concatenate([h0, h1], axis=-1)          # [B, 2H]
        pre1 = jnp.dot(cat.astype(_MATMUL_DTYPE), w1,
                       preferred_element_type=jnp.float32) + b1
        i1 = jax.nn.sigmoid(pre1[:, 0:H])
        f1 = jax.nn.sigmoid(pre1[:, H:2 * H])
        g1 = jnp.tanh(pre1[:, 2 * H:3 * H])
        o1 = jax.nn.sigmoid(pre1[:, 3 * H:4 * H])
        c1 = f1 * c1 + i1 * g1
        h1 = o1 * jnp.tanh(c1)
        h_scr[r0:r0 + B, :] = h1                          # VMEM accumulation

    # Fused proj1|proj2|proj3: one [H, Dtot] matmul over the whole sequence.
    znew = _dot(h_scr[...], wproj_ref[...]) + bproj_ref[...]   # [N, Dtot]

    # ---- decoder: 3 views fused via block-diagonal weights -----------------
    h = znew
    for l, (w_ref, b_ref) in enumerate(dec):
        h = _dot(h, w_ref[...]) + b_ref[...]
        if l < n_dec - 1:
            h = _leaky_relu(h)
        # TODO(synk): final activation of VanillaVAEDecoder unknown; plain Linear.
    recon_ref[...] = h                                    # single slab store


def _rvae_fused_call(params, x_cat, eps_cat, T, B, H, d_tot, f_tot):
    N = T * B
    n_enc = len(params["enc_w"])
    n_dec = len(params["dec_w"])

    inputs = [x_cat, eps_cat]
    for w, b in zip(params["enc_w"], params["enc_b"]):
        inputs += [w, b]
    inputs += [params["head_w"], params["head_b"],
               params["wx0"], params["b0"], params["wh0"],
               params["w1"], params["b1"],
               params["wproj"], params["bproj"]]
    for w, b in zip(params["dec_w"], params["dec_b"]):
        inputs += [w, b]

    out_shape = (jax.ShapeDtypeStruct((N, 2 * d_tot), jnp.float32),   # [mu|lv] slab
                 jax.ShapeDtypeStruct((N, f_tot), jnp.float32))       # recon slab

    return pl.pallas_call(
        functools.partial(_rvae_kernel, n_enc=n_enc, n_dec=n_dec,
                          T=T, B=B, H=H, d_tot=d_tot),
        out_shape=out_shape,
        grid=(1,),
        in_specs=[_full_spec(a.shape) for a in inputs],
        out_specs=tuple(_full_spec(s.shape) for s in out_shape),
        scratch_shapes=[pltpu.VMEM((N, H), jnp.float32)],
        compiler_params=pltpu.CompilerParams(dimension_semantics=("arbitrary",)),
    )(*inputs)


# ----------------------------------------------------------------------------
# Deterministic parameter init (synthetic, not a checkpoint) + packing
# ----------------------------------------------------------------------------
def _rand_w(key, fan_in, fan_out):
    return jax.random.normal(key, (fan_in, fan_out), jnp.float32) * (fan_in ** -0.5)


def _block_diag(mats):
    rows = sum(m.shape[0] for m in mats)
    cols = sum(m.shape[1] for m in mats)
    out = jnp.zeros((rows, cols), jnp.float32)
    r = c = 0
    for m in mats:
        out = out.at[r:r + m.shape[0], c:c + m.shape[1]].set(m)
        r += m.shape[0]
        c += m.shape[1]
    return out


def init_rvae_params(key, n_feats, n_lats, n_hidden, hidden_dims,
                     w_dtype=_MATMUL_DTYPE):
    n_views = 3
    d_tot = sum(n_lats)
    f_tot = sum(n_feats)
    H = n_hidden
    keys = iter(jax.random.split(key, 64))

    # encoder: per-view Linear+LeakyReLU stack, packed block-diagonally per layer
    enc_w, enc_b = [], []
    in_dims = list(n_feats)
    for hdim in hidden_dims:
        mats = [_rand_w(next(keys), in_dims[v], hdim) for v in range(n_views)]
        enc_w.append(_block_diag(mats).astype(w_dtype))
        enc_b.append(jnp.zeros((1, n_views * hdim), jnp.float32))
        in_dims = [hdim] * n_views

    # fused mu/logvar head, columns ordered [mu1|mu2|mu3 | lv1|lv2|lv3]
    h_last = hidden_dims[-1]
    head_w = jnp.zeros((n_views * h_last, 2 * d_tot), jnp.float32)
    off = 0
    for v in range(n_views):
        d = n_lats[v]
        w_mu = _rand_w(next(keys), h_last, d)
        w_lv = _rand_w(next(keys), h_last, d)
        head_w = head_w.at[v * h_last:(v + 1) * h_last, off:off + d].set(w_mu)
        head_w = head_w.at[v * h_last:(v + 1) * h_last,
                           d_tot + off:d_tot + off + d].set(w_lv)
        off += d
    head_b = jnp.zeros((1, 2 * d_tot), jnp.float32)

    # 2-layer LSTM, gate-fused weights (gate order i|f|g|o along the 4H axis)
    wx0 = _rand_w(next(keys), d_tot, 4 * H).astype(w_dtype)
    wh0 = _rand_w(next(keys), H, 4 * H).astype(w_dtype)
    w1 = _rand_w(next(keys), 2 * H, 4 * H).astype(w_dtype)   # [input | recurrent]
    b0 = jnp.zeros((1, 4 * H), jnp.float32)
    b1 = jnp.zeros((1, 4 * H), jnp.float32)
    # fused per-view output projections proj1|proj2|proj3
    wproj = _rand_w(next(keys), H, d_tot).astype(w_dtype)
    bproj = jnp.zeros((1, d_tot), jnp.float32)

    # decoder: per-view reversed MLP + final Linear, packed block-diagonally
    dec_w, dec_b = [], []
    in_dims = list(n_lats)
    for hdim in reversed(hidden_dims):
        mats = [_rand_w(next(keys), in_dims[v], hdim) for v in range(n_views)]
        dec_w.append(_block_diag(mats).astype(w_dtype))
        dec_b.append(jnp.zeros((1, n_views * hdim), jnp.float32))
        in_dims = [hdim] * n_views
    mats = [_rand_w(next(keys), in_dims[v], n_feats[v]) for v in range(n_views)]
    dec_w.append(_block_diag(mats).astype(w_dtype))
    dec_b.append(jnp.zeros((1, f_tot), jnp.float32))

    return {
        "enc_w": enc_w, "enc_b": enc_b,
        "head_w": head_w.astype(w_dtype), "head_b": head_b,
        "wx0": wx0, "b0": b0, "wh0": wh0, "w1": w1, "b1": b1,
        "wproj": wproj, "bproj": bproj,
        "dec_w": dec_w, "dec_b": dec_b,
    }


# ----------------------------------------------------------------------------
# Forward pass: exactly ONE pallas_call
# ----------------------------------------------------------------------------
def rvae_forward(params, x1, x2, x3, eps1, eps2, eps3):
    B, T, _ = x1.shape
    feat_dims = (x1.shape[-1], x2.shape[-1], x3.shape[-1])
    lat_dims = (eps1.shape[-1], eps2.shape[-1], eps3.shape[-1])
    d_tot = sum(lat_dims)
    f_tot = sum(feat_dims)
    H = params["wh0"].shape[0]

    def to_tm(x):    # [B, T, F] -> time-major rows [T*B, F]
        return jnp.transpose(x, (1, 0, 2)).reshape(T * B, x.shape[-1])

    def from_tm(a):  # [T*B, D] -> [B, T, D]
        return jnp.transpose(a.reshape(T, B, -1), (1, 0, 2))

    x_cat = jnp.concatenate([to_tm(x1), to_tm(x2), to_tm(x3)], axis=-1)
    eps_cat = jnp.concatenate([eps1, eps2, eps3], axis=-1)

    muvar, recon = _rvae_fused_call(params, x_cat, eps_cat, T, B, H, d_tot, f_tot)

    xs = (x1, x2, x3)
    outs = []
    doff = foff = 0
    for v in range(3):
        d, f = lat_dims[v], feat_dims[v]
        mu_v = muvar[:, doff:doff + d]
        lv_v = muvar[:, d_tot + doff:d_tot + doff + d]
        rec_v = recon[:, foff:foff + f]
        outs.append([from_tm(rec_v), xs[v], from_tm(mu_v), from_tm(lv_v)])
        doff += d
        foff += f
    return outs


# ----------------------------------------------------------------------------
if __name__ == "__main__":
    B, T = 2, 8                      # batch, seq_length
    n_feats = (6, 5, 7)              # n_features1/2/3
    n_lats = (4, 3, 5)               # n_latent_features1/2/3
    n_hidden = 20
    hidden_dims = [16, 32, 64]

    params = init_rvae_params(jax.random.PRNGKey(42), n_feats, n_lats,
                              n_hidden, hidden_dims)

    key = jax.random.PRNGKey(0)
    k1, k2, k3, ke1, ke2, ke3 = jax.random.split(key, 6)
    x1 = jax.random.normal(k1, (B, T, n_feats[0]), jnp.float32)
    x2 = jax.random.normal(k2, (B, T, n_feats[1]), jnp.float32)
    x3 = jax.random.normal(k3, (B, T, n_feats[2]), jnp.float32)
    # TODO(synk): torch.randn_like replaced with deterministic external noise
    # (time-major rows to match the kernel layout).
    eps1 = jax.random.normal(ke1, (T * B, n_lats[0]), jnp.float32)
    eps2 = jax.random.normal(ke2, (T * B, n_lats[1]), jnp.float32)
    eps3 = jax.random.normal(ke3, (T * B, n_lats[2]), jnp.float32)

    fwd = jax.jit(rvae_forward)
    out = fwd(params, x1, x2, x3, eps1, eps2, eps3)
    jax.block_until_ready(out)

    # basic shape sanity
    assert out[0][0].shape == (B, T, n_feats[0])
    assert out[1][0].shape == (B, T, n_feats[1])
    assert out[2][0].shape == (B, T, n_feats[2])
    assert out[0][2].shape == (B, T, n_lats[0])
    assert out[1][3].shape == (B, T, n_lats[1])
    assert out[2][2].shape == (B, T, n_lats[2])

    print("KERNEL_OK")
</pallas_src>

<mosaic_0001>
module attributes {stable_mosaic.version = 11 : i64} {
  func.func @_rvae_kernel(%arg0: i32, %arg1: memref<16x18xf32, #tpu.memory_space<vmem>>, %arg2: memref<16x12xf32, #tpu.memory_space<vmem>>, %arg3: memref<18x48xbf16, #tpu.memory_space<vmem>>, %arg4: memref<1x48xf32, #tpu.memory_space<vmem>>, %arg5: memref<48x96xbf16, #tpu.memory_space<vmem>>, %arg6: memref<1x96xf32, #tpu.memory_space<vmem>>, %arg7: memref<96x192xbf16, #tpu.memory_space<vmem>>, %arg8: memref<1x192xf32, #tpu.memory_space<vmem>>, %arg9: memref<192x24xbf16, #tpu.memory_space<vmem>>, %arg10: memref<1x24xf32, #tpu.memory_space<vmem>>, %arg11: memref<12x80xbf16, #tpu.memory_space<vmem>>, %arg12: memref<1x80xf32, #tpu.memory_space<vmem>>, %arg13: memref<20x80xbf16, #tpu.memory_space<vmem>>, %arg14: memref<40x80xbf16, #tpu.memory_space<vmem>>, %arg15: memref<1x80xf32, #tpu.memory_space<vmem>>, %arg16: memref<20x12xbf16, #tpu.memory_space<vmem>>, %arg17: memref<1x12xf32, #tpu.memory_space<vmem>>, %arg18: memref<12x192xbf16, #tpu.memory_space<vmem>>, %arg19: memref<1x192xf32, #tpu.memory_space<vmem>>, %arg20: memref<192x96xbf16, #tpu.memory_space<vmem>>, %arg21: memref<1x96xf32, #tpu.memory_space<vmem>>, %arg22: memref<96x48xbf16, #tpu.memory_space<vmem>>, %arg23: memref<1x48xf32, #tpu.memory_space<vmem>>, %arg24: memref<48x18xbf16, #tpu.memory_space<vmem>>, %arg25: memref<1x18xf32, #tpu.memory_space<vmem>>, %arg26: memref<16x24xf32, #tpu.memory_space<vmem>>, %arg27: memref<16x18xf32, #tpu.memory_space<vmem>>, %arg28: memref<16x20xf32, #tpu.memory_space<vmem>>) attributes {dimension_semantics = [#tpu.dimension_semantics<arbitrary>], iteration_bounds = array<i64: 1>, scalar_prefetch = 0 : i64, scratch_operands = 1 : i64, tpu.core_type = #tpu.core_type<tc>, window_params = [{pipeline_mode = #tpu.pipeline_mode<synchronous>, transform_indices = @transform_0, window_bounds = array<i64: 16, 18>}, {pipeline_mode = #tpu.pipeline_mode<synchronous>, transform_indices = @transform_1, window_bounds = array<i64: 16, 12>}, {pipeline_mode = #tpu.pipeline_mode<synchronous>, transform_indices = @transform_2, window_bounds = array<i64: 18, 48>}, {pipeline_mode = #tpu.pipeline_mode<synchronous>, transform_indices = @transform_3, window_bounds = array<i64: 1, 48>}, {pipeline_mode = #tpu.pipeline_mode<synchronous>, transform_indices = @transform_4, window_bounds = array<i64: 48, 96>}, {pipeline_mode = #tpu.pipeline_mode<synchronous>, transform_indices = @transform_5, window_bounds = array<i64: 1, 96>}, {pipeline_mode = #tpu.pipeline_mode<synchronous>, transform_indices = @transform_6, window_bounds = array<i64: 96, 192>}, {pipeline_mode = #tpu.pipeline_mode<synchronous>, transform_indices = @transform_7, window_bounds = array<i64: 1, 192>}, {pipeline_mode = #tpu.pipeline_mode<synchronous>, transform_indices = @transform_8, window_bounds = array<i64: 192, 24>}, {pipeline_mode = #tpu.pipeline_mode<synchronous>, transform_indices = @transform_9, window_bounds = array<i64: 1, 24>}, {pipeline_mode = #tpu.pipeline_mode<synchronous>, transform_indices = @transform_10, window_bounds = array<i64: 12, 80>}, {pipeline_mode = #tpu.pipeline_mode<synchronous>, transform_indices = @transform_11, window_bounds = array<i64: 1, 80>}, {pipeline_mode = #tpu.pipeline_mode<synchronous>, transform_indices = @transform_12, window_bounds = array<i64: 20, 80>}, {pipeline_mode = #tpu.pipeline_mode<synchronous>, transform_indices = @transform_13, window_bounds = array<i64: 40, 80>}, {pipeline_mode = #tpu.pipeline_mode<synchronous>, transform_indices = @transform_14, window_bounds = array<i64: 1, 80>}, {pipeline_mode = #tpu.pipeline_mode<synchronous>, transform_indices = @transform_15, window_bounds = array<i64: 20, 12>}, {pipeline_mode = #tpu.pipeline_mode<synchronous>, transform_indices = @transform_16, window_bounds = array<i64: 1, 12>}, {pipeline_mode = #tpu.pipeline_mode<synchronous>, transform_indices = @transform_17, window_bounds = array<i64: 12, 192>}, {pipeline_mode = #tpu.pipeline_mode<synchronous>, transform_indices = @transform_18, window_bounds = array<i64: 1, 192>}, {pipeline_mode = #tpu.pipeline_mode<synchronous>, transform_indices = @transform_19, window_bounds = array<i64: 192, 96>}, {pipeline_mode = #tpu.pipeline_mode<synchronous>, transform_indices = @transform_20, window_bounds = array<i64: 1, 96>}, {pipeline_mode = #tpu.pipeline_mode<synchronous>, transform_indices = @transform_21, window_bounds = array<i64: 96, 48>}, {pipeline_mode = #tpu.pipeline_mode<synchronous>, transform_indices = @transform_22, window_bounds = array<i64: 1, 48>}, {pipeline_mode = #tpu.pipeline_mode<synchronous>, transform_indices = @transform_23, window_bounds = array<i64: 48, 18>}, {pipeline_mode = #tpu.pipeline_mode<synchronous>, transform_indices = @transform_24, window_bounds = array<i64: 1, 18>}, {pipeline_mode = #tpu.pipeline_mode<synchronous>, transform_indices = @transform_25, window_bounds = array<i64: 16, 24>}, {pipeline_mode = #tpu.pipeline_mode<synchronous>, transform_indices = @transform_26, window_bounds = array<i64: 16, 18>}]} {
    %c0 = arith.constant 0 : index
    %c0_0 = arith.constant 0 : index
    %0 = vector.load %arg1[%c0, %c0_0] : memref<16x18xf32, #tpu.memory_space<vmem>>, vector<16x18xf32>
    %c0_1 = arith.constant 0 : index
    %c0_2 = arith.constant 0 : index
    %1 = vector.load %arg3[%c0_1, %c0_2] : memref<18x48xbf16, #tpu.memory_space<vmem>>, vector<18x48xbf16>
    %2 = arith.truncf %0 : vector<16x18xf32> to vector<16x18xbf16>
    %cst = arith.constant dense<0.000000e+00> : vector<16x48xf32>
    %3 = tpu.matmul %2, %1, %cst {dimension_numbers = #tpu.dot_dimension_numbers<[1], [0], [0], [1], [0, 0, 1, 1], [], []>} : vector<16x18xbf16>, vector<18x48xbf16>, vector<16x48xf32> -> vector<16x48xf32>
    %c0_3 = arith.constant 0 : index
    %c0_4 = arith.constant 0 : index
    %4 = vector.load %arg4[%c0_3, %c0_4] : memref<1x48xf32, #tpu.memory_space<vmem>>, vector<1x48xf32>
    %5 = vector.broadcast %4 : vector<1x48xf32> to vector<16x48xf32>
    %6 = arith.addf %3, %5 : vector<16x48xf32>
    %cst_5 = arith.constant 0.000000e+00 : f32
    %7 = vector.broadcast %cst_5 : f32 to vector<16x48xf32>
    %8 = arith.cmpf ogt, %6, %7 : vector<16x48xf32>
    %cst_6 = arith.constant 0.00999999977 : f32
    %9 = vector.broadcast %cst_6 : f32 to vector<16x48xf32>
    %10 = arith.mulf %9, %6 : vector<16x48xf32>
    %11 = arith.select %8, %6, %10 : vector<16x48xi1>, vector<16x48xf32>
    %c0_7 = arith.constant 0 : index
    %c0_8 = arith.constant 0 : index
    %12 = vector.load %arg5[%c0_7, %c0_8] : memref<48x96xbf16, #tpu.memory_space<vmem>>, vector<48x96xbf16>
    %13 = arith.truncf %11 : vector<16x48xf32> to vector<16x48xbf16>
    %cst_9 = arith.constant dense<0.000000e+00> : vector<16x96xf32>
    %14 = tpu.matmul %13, %12, %cst_9 {dimension_numbers = #tpu.dot_dimension_numbers<[1], [0], [0], [1], [0, 0, 1, 1], [], []>} : vector<16x48xbf16>, vector<48x96xbf16>, vector<16x96xf32> -> vector<16x96xf32>
    %c0_10 = arith.constant 0 : index
    %c0_11 = arith.constant 0 : index
    %15 = vector.load %arg6[%c0_10, %c0_11] : memref<1x96xf32, #tpu.memory_space<vmem>>, vector<1x96xf32>
    %16 = vector.broadcast %15 : vector<1x96xf32> to vector<16x96xf32>
    %17 = arith.addf %14, %16 : vector<16x96xf32>
    %cst_12 = arith.constant 0.000000e+00 : f32
    %18 = vector.broadcast %cst_12 : f32 to vector<16x96xf32>
    %19 = arith.cmpf ogt, %17, %18 : vector<16x96xf32>
    %cst_13 = arith.constant 0.00999999977 : f32
    %20 = vector.broadcast %cst_13 : f32 to vector<16x96xf32>
    %21 = arith.mulf %20, %17 : vector<16x96xf32>
    %22 = arith.select %19, %17, %21 : vector<16x96xi1>, vector<16x96xf32>
    %c0_14 = arith.constant 0 : index
    %c0_15 = arith.constant 0 : index
    %23 = vector.load %arg7[%c0_14, %c0_15] : memref<96x192xbf16, #tpu.memory_space<vmem>>, vector<96x192xbf16>
    %24 = arith.truncf %22 : vector<16x96xf32> to vector<16x96xbf16>
    %cst_16 = arith.constant dense<0.000000e+00> : vector<16x192xf32>
    %25 = tpu.matmul %24, %23, %cst_16 {dimension_numbers = #tpu.dot_dimension_numbers<[1], [0], [0], [1], [0, 0, 1, 1], [], []>} : vector<16x96xbf16>, vector<96x192xbf16>, vector<16x192xf32> -> vector<16x192xf32>
    %c0_17 = arith.constant 0 : index
    %c0_18 = arith.constant 0 : index
    %26 = vector.load %arg8[%c0_17, %c0_18] : memref<1x192xf32, #tpu.memory_space<vmem>>, vector<1x192xf32>
    %27 = vector.broadcast %26 : vector<1x192xf32> to vector<16x192xf32>
    %28 = arith.addf %25, %27 : vector<16x192xf32>
    %cst_19 = arith.constant 0.000000e+00 : f32
    %29 = vector.broadcast %cst_19 : f32 to vector<16x192xf32>
    %30 = arith.cmpf ogt, %28, %29 : vector<16x192xf32>
    %cst_20 = arith.constant 0.00999999977 : f32
    %31 = vector.broadcast %cst_20 : f32 to vector<16x192xf32>
    %32 = arith.mulf %31, %28 : vector<16x192xf32>
    %33 = arith.select %30, %28, %32 : vector<16x192xi1>, vector<16x192xf32>
    %c0_21 = arith.constant 0 : index
    %c0_22 = arith.constant 0 : index
    %34 = vector.load %arg9[%c0_21, %c0_22] : memref<192x24xbf16, #tpu.memory_space<vmem>>, vector<192x24xbf16>
    %35 = arith.truncf %33 : vector<16x192xf32> to vector<16x192xbf16>
    %cst_23 = arith.constant dense<0.000000e+00> : vector<16x24xf32>
    %36 = tpu.matmul %35, %34, %cst_23 {dimension_numbers = #tpu.dot_dimension_numbers<[1], [0], [0], [1], [0, 0, 1, 1], [], []>} : vector<16x192xbf16>, vector<192x24xbf16>, vector<16x24xf32> -> vector<16x24xf32>
    %c0_24 = arith.constant 0 : index
    %c0_25 = arith.constant 0 : index
    %37 = vector.load %arg10[%c0_24, %c0_25] : memref<1x24xf32, #tpu.memory_space<vmem>>, vector<1x24xf32>
    %38 = vector.broadcast %37 : vector<1x24xf32> to vector<16x24xf32>
    %39 = arith.addf %36, %38 : vector<16x24xf32>
    %c0_26 = arith.constant 0 : index
    %c0_27 = arith.constant 0 : index
    %40 = vector.load %arg26[%c0_26, %c0_27] : memref<16x24xf32, #tpu.memory_space<vmem>>, vector<16x24xf32>
    tpu.vector_store %arg26[%c0_26, %c0_27], %39 {strides = array<i32>} : memref<16x24xf32, #tpu.memory_space<vmem>>, vector<16x24xf32>,
    %41 = vector.extract_strided_slice %39 {offsets = [0, 0], sizes = [16, 12], strides = [1, 1]} : vector<16x24xf32> to vector<16x12xf32>
    %42 = vector.extract_strided_slice %39 {offsets = [0, 12], sizes = [16, 12], strides = [1, 1]} : vector<16x24xf32> to vector<16x12xf32>
    %c0_28 = arith.constant 0 : index
    %c0_29 = arith.constant 0 : index
    %43 = vector.load %arg2[%c0_28, %c0_29] : memref<16x12xf32, #tpu.memory_space<vmem>>, vector<16x12xf32>
    %cst_30 = arith.constant 5.000000e-01 : f32
    %44 = vector.broadcast %cst_30 : f32 to vector<16x12xf32>
    %45 = arith.mulf %44, %42 : vector<16x12xf32>
    %46 = math.exp %45 : vector<16x12xf32>
    %47 = arith.mulf %43, %46 : vector<16x12xf32>
    %48 = arith.addf %47, %41 : vector<16x12xf32>
    %c0_31 = arith.constant 0 : index
    %c0_32 = arith.constant 0 : index
    %49 = vector.load %arg11[%c0_31, %c0_32] : memref<12x80xbf16, #tpu.memory_space<vmem>>, vector<12x80xbf16>
    %50 = arith.truncf %48 : vector<16x12xf32> to vector<16x12xbf16>
    %cst_33 = arith.constant dense<0.000000e+00> : vector<16x80xf32>
    %51 = tpu.matmul %50, %49, %cst_33 {dimension_numbers = #tpu.dot_dimension_numbers<[1], [0], [0], [1], [0, 0, 1, 1], [], []>} : vector<16x12xbf16>, vector<12x80xbf16>, vector<16x80xf32> -> vector<16x80xf32>
    %c0_34 = arith.constant 0 : index
    %c0_35 = arith.constant 0 : index
    %52 = vector.load %arg12[%c0_34, %c0_35] : memref<1x80xf32, #tpu.memory_space<vmem>>, vector<1x80xf32>
    %53 = vector.broadcast %52 : vector<1x80xf32> to vector<16x80xf32>
    %54 = arith.addf %51, %53 : vector<16x80xf32>
    %c0_36 = arith.constant 0 : index
    %c0_37 = arith.constant 0 : index
    %55 = vector.load %arg13[%c0_36, %c0_37] : memref<20x80xbf16, #tpu.memory_space<vmem>>, vector<20x80xbf16>
    %c0_38 = arith.constant 0 : index
    %c0_39 = arith.constant 0 : index
    %56 = vector.load %arg14[%c0_38, %c0_39] : memref<40x80xbf16, #tpu.memory_space<vmem>>, vector<40x80xbf16>
    %c0_40 = arith.constant 0 : index
    %c0_41 = arith.constant 0 : index
    %57 = vector.load %arg15[%c0_40, %c0_41] : memref<1x80xf32, #tpu.memory_space<vmem>>, vector<1x80xf32>
    %58 = vector.shape_cast %57 : vector<1x80xf32> to vector<1x80xf32>
    %59 = vector.broadcast %58 : vector<1x80xf32> to vector<2x80xf32>
    %cst_42 = arith.constant 0.000000e+00 : f32
    %60 = vector.broadcast %cst_42 : f32 to vector<2x20xf32>
    %61 = vector.extract_strided_slice %54 {offsets = [0, 0], sizes = [2, 80], strides = [1, 1]} : vector<16x80xf32> to vector<2x80xf32>
    %62 = arith.truncf %60 : vector<2x20xf32> to vector<2x20xbf16>
    %cst_43 = arith.constant dense<0.000000e+00> : vector<2x80xf32>
    %63 = tpu.matmul %62, %55, %cst_43 {dimension_numbers = #tpu.dot_dimension_numbers<[1], [0], [0], [1], [0, 0, 1, 1], [], []>} : vector<2x20xbf16>, vector<20x80xbf16>, vector<2x80xf32> -> vector<2x80xf32>
    %64 = arith.addf %61, %63 : vector<2x80xf32>
    %65 = vector.extract_strided_slice %64 {offsets = [0, 0], sizes = [2, 20], strides = [1, 1]} : vector<2x80xf32> to vector<2x20xf32>
    %66 = arith.negf %65 : vector<2x20xf32>
    %67 = math.exp %66 : vector<2x20xf32>
    %cst_44 = arith.constant 1.000000e+00 : f32
    %68 = vector.broadcast %cst_44 : f32 to vector<2x20xf32>
    %69 = arith.addf %68, %67 : vector<2x20xf32>
    %70 = arith.divf %68, %69 : vector<2x20xf32>
    %71 = vector.extract_strided_slice %64 {offsets = [0, 20], sizes = [2, 20], strides = [1, 1]} : vector<2x80xf32> to vector<2x20xf32>
    %72 = arith.negf %71 : vector<2x20xf32>
    %73 = math.exp %72 : vector<2x20xf32>
    %cst_45 = arith.constant 1.000000e+00 : f32
    %74 = vector.broadcast %cst_45 : f32 to vector<2x20xf32>
    %75 = arith.addf %74, %73 : vector<2x20xf32>
    %76 = arith.divf %74, %75 : vector<2x20xf32>
    %77 = vector.extract_strided_slice %64 {offsets = [0, 40], sizes = [2, 20], strides = [1, 1]} : vector<2x80xf32> to vector<2x20xf32>
    %78 = math.tanh %77 : vector<2x20xf32>
    %79 = vector.extract_strided_slice %64 {offsets = [0, 60], sizes = [2, 20], strides = [1, 1]} : vector<2x80xf32> to vector<2x20xf32>
    %80 = arith.negf %79 : vector<2x20xf32>
    %81 = math.exp %80 : vector<2x20xf32>
    %cst_46 = arith.constant 1.000000e+00 : f32
    %82 = vector.broadcast %cst_46 : f32 to vector<2x20xf32>
    %83 = arith.addf %82, %81 : vector<2x20xf32>
    %84 = arith.divf %82, %83 : vector<2x20xf32>
    %85 = arith.mulf %76, %60 : vector<2x20xf32>
    %86 = arith.mulf %70, %78 : vector<2x20xf32>
    %87 = arith.addf %85, %86 : vector<2x20xf32>
    %88 = math.tanh %87 : vector<2x20xf32>
    %89 = arith.mulf %84, %88 : vector<2x20xf32>
    %90 = tpu.concatenate %89, %60 in 1 : vector<2x20xf32>, vector<2x20xf32> -> vector<2x40xf32>
    %91 = arith.truncf %90 : vector<2x40xf32> to vector<2x40xbf16>
    %cst_47 = arith.constant dense<0.000000e+00> : vector<2x80xf32>
    %92 = tpu.matmul %91, %56, %cst_47 {dimension_numbers = #tpu.dot_dimension_numbers<[1], [0], [0], [1], [0, 0, 1, 1], [], []>} : vector<2x40xbf16>, vector<40x80xbf16>, vector<2x80xf32> -> vector<2x80xf32>
    %93 = arith.addf %92, %59 : vector<2x80xf32>
    %94 = vector.extract_strided_slice %93 {offsets = [0, 0], sizes = [2, 20], strides = [1, 1]} : vector<2x80xf32> to vector<2x20xf32>
    %95 = arith.negf %94 : vector<2x20xf32>
    %96 = math.exp %95 : vector<2x20xf32>
    %cst_48 = arith.constant 1.000000e+00 : f32
    %97 = vector.broadcast %cst_48 : f32 to vector<2x20xf32>
    %98 = arith.addf %97, %96 : vector<2x20xf32>
    %99 = arith.divf %97, %98 : vector<2x20xf32>
    %100 = vector.extract_strided_slice %93 {offsets = [0, 20], sizes = [2, 20], strides = [1, 1]} : vector<2x80xf32> to vector<2x20xf32>
    %101 = arith.negf %100 : vector<2x20xf32>
    %102 = math.exp %101 : vector<2x20xf32>
    %cst_49 = arith.constant 1.000000e+00 : f32
    %103 = vector.broadcast %cst_49 : f32 to vector<2x20xf32>
    %104 = arith.addf %103, %102 : vector<2x20xf32>
    %105 = arith.divf %103, %104 : vector<2x20xf32>
    %106 = vector.extract_strided_slice %93 {offsets = [0, 40], sizes = [2, 20], strides = [1, 1]} : vector<2x80xf32> to vector<2x20xf32>
    %107 = math.tanh %106 : vector<2x20xf32>
    %108 = vector.extract_strided_slice %93 {offsets = [0, 60], sizes = [2, 20], strides = [1, 1]} : vector<2x80xf32> to vector<2x20xf32>
    %109 = arith.negf %108 : vector<2x20xf32>
    %110 = math.exp %109 : vector<2x20xf32>
    %cst_50 = arith.constant 1.000000e+00 : f32
    %111 = vector.broadcast %cst_50 : f32 to vector<2x20xf32>
    %112 = arith.addf %111, %110 : vector<2x20xf32>
    %113 = arith.divf %111, %112 : vector<2x20xf32>
    %114 = arith.mulf %105, %60 : vector<2x20xf32>
    %115 = arith.mulf %99, %107 : vector<2x20xf32>
    %116 = arith.addf %114, %115 : vector<2x20xf32>
    %117 = math.tanh %116 : vector<2x20xf32>
    %118 = arith.mulf %113, %117 : vector<2x20xf32>
    %c0_51 = arith.constant 0 : index
    %c0_52 = arith.constant 0 : index
    %119 = vector.load %arg28[%c0_51, %c0_52] : memref<16x20xf32, #tpu.memory_space<vmem>>, vector<2x20xf32>
    tpu.vector_store %arg28[%c0_51, %c0_52], %118 {strides = array<i32>} : memref<16x20xf32, #tpu.memory_space<vmem>>, vector<2x20xf32>,
    %120 = vector.extract_strided_slice %54 {offsets = [2, 0], sizes = [2, 80], strides = [1, 1]} : vector<16x80xf32> to vector<2x80xf32>
    %121 = arith.truncf %89 : vector<2x20xf32> to vector<2x20xbf16>
    %cst_53 = arith.constant dense<0.000000e+00> : vector<2x80xf32>
    %122 = tpu.matmul %121, %55, %cst_53 {dimension_numbers = #tpu.dot_dimension_numbers<[1], [0], [0], [1], [0, 0, 1, 1], [], []>} : vector<2x20xbf16>, vector<20x80xbf16>, vector<2x80xf32> -> vector<2x80xf32>
    %123 = arith.addf %120, %122 : vector<2x80xf32>
    %124 = vector.extract_strided_slice %123 {offsets = [0, 0], sizes = [2, 20], strides = [1, 1]} : vector<2x80xf32> to vector<2x20xf32>
    %125 = arith.negf %124 : vector<2x20xf32>
    %126 = math.exp %125 : vector<2x20xf32>
    %cst_54 = arith.constant 1.000000e+00 : f32
    %127 = vector.broadcast %cst_54 : f32 to vector<2x20xf32>
    %128 = arith.addf %127, %126 : vector<2x20xf32>
    %129 = arith.divf %127, %128 : vector<2x20xf32>
    %130 = vector.extract_strided_slice %123 {offsets = [0, 20], sizes = [2, 20], strides = [1, 1]} : vector<2x80xf32> to vector<2x20xf32>
    %131 = arith.negf %130 : vector<2x20xf32>
    %132 = math.exp %131 : vector<2x20xf32>
    %cst_55 = arith.constant 1.000000e+00 : f32
    %133 = vector.broadcast %cst_55 : f32 to vector<2x20xf32>
    %134 = arith.addf %133, %132 : vector<2x20xf32>
    %135 = arith.divf %133, %134 : vector<2x20xf32>
    %136 = vector.extract_strided_slice %123 {offsets = [0, 40], sizes = [2, 20], strides = [1, 1]} : vector<2x80xf32> to vector<2x20xf32>
    %137 = math.tanh %136 : vector<2x20xf32>
    %138 = vector.extract_strided_slice %123 {offsets = [0, 60], sizes = [2, 20], strides = [1, 1]} : vector<2x80xf32> to vector<2x20xf32>
    %139 = arith.negf %138 : vector<2x20xf32>
    %140 = math.exp %139 : vector<2x20xf32>
    %cst_56 = arith.constant 1.000000e+00 : f32
    %141 = vector.broadcast %cst_56 : f32 to vector<2x20xf32>
    %142 = arith.addf %141, %140 : vector<2x20xf32>
    %143 = arith.divf %141, %142 : vector<2x20xf32>
    %144 = arith.mulf %135, %87 : vector<2x20xf32>
    %145 = arith.mulf %129, %137 : vector<2x20xf32>
    %146 = arith.addf %144, %145 : vector<2x20xf32>
    %147 = math.tanh %146 : vector<2x20xf32>
    %148 = arith.mulf %143, %147 : vector<2x20xf32>
    %149 = tpu.concatenate %148, %118 in 1 : vector<2x20xf32>, vector<2x20xf32> -> vector<2x40xf32>
    %150 = arith.truncf %149 : vector<2x40xf32> to vector<2x40xbf16>
    %cst_57 = arith.constant dense<0.000000e+00> : vector<2x80xf32>
    %151 = tpu.matmul %150, %56, %cst_57 {dimension_numbers = #tpu.dot_dimension_numbers<[1], [0], [0], [1], [0, 0, 1, 1], [], []>} : vector<2x40xbf16>, vector<40x80xbf16>, vector<2x80xf32> -> vector<2x80xf32>
    %152 = arith.addf %151, %59 : vector<2x80xf32>
    %153 = vector.extract_strided_slice %152 {offsets = [0, 0], sizes = [2, 20], strides = [1, 1]} : vector<2x80xf32> to vector<2x20xf32>
    %154 = arith.negf %153 : vector<2x20xf32>
    %155 = math.exp %154 : vector<2x20xf32>
    %cst_58 = arith.constant 1.000000e+00 : f32
    %156 = vector.broadcast %cst_58 : f32 to vector<2x20xf32>
    %157 = arith.addf %156, %155 : vector<2x20xf32>
    %158 = arith.divf %156, %157 : vector<2x20xf32>
    %159 = vector.extract_strided_slice %152 {offsets = [0, 20], sizes = [2, 20], strides = [1, 1]} : vector<2x80xf32> to vector<2x20xf32>
    %160 = arith.negf %159 : vector<2x20xf32>
    %161 = math.exp %160 : vector<2x20xf32>
    %cst_59 = arith.constant 1.000000e+00 : f32
    %162 = vector.broadcast %cst_59 : f32 to vector<2x20xf32>
    %163 = arith.addf %162, %161 : vector<2x20xf32>
    %164 = arith.divf %162, %163 : vector<2x20xf32>
    %165 = vector.extract_strided_slice %152 {offsets = [0, 40], sizes = [2, 20], strides = [1, 1]} : vector<2x80xf32> to vector<2x20xf32>
    %166 = math.tanh %165 : vector<2x20xf32>
    %167 = vector.extract_strided_slice %152 {offsets = [0, 60], sizes = [2, 20], strides = [1, 1]} : vector<2x80xf32> to vector<2x20xf32>
    %168 = arith.negf %167 : vector<2x20xf32>
    %169 = math.exp %168 : vector<2x20xf32>
    %cst_60 = arith.constant 1.000000e+00 : f32
    %170 = vector.broadcast %cst_60 : f32 to vector<2x20xf32>
    %171 = arith.addf %170, %169 : vector<2x20xf32>
    %172 = arith.divf %170, %171 : vector<2x20xf32>
    %173 = arith.mulf %164, %116 : vector<2x20xf32>
    %174 = arith.mulf %158, %166 : vector<2x20xf32>
    %175 = arith.addf %173, %174 : vector<2x20xf32>
    %176 = math.tanh %175 : vector<2x20xf32>
    %177 = arith.mulf %172, %176 : vector<2x20xf32>
    %c2 = arith.constant 2 : index
    %c0_61 = arith.constant 0 : index
    %178 = vector.load %arg28[%c2, %c0_61] : memref<16x20xf32, #tpu.memory_space<vmem>>, vector<2x20xf32>
    tpu.vector_store %arg28[%c2, %c0_61], %177 {strides = array<i32>} : memref<16x20xf32, #tpu.memory_space<vmem>>, vector<2x20xf32>,
    %179 = vector.extract_strided_slice %54 {offsets = [4, 0], sizes = [2, 80], strides = [1, 1]} : vector<16x80xf32> to vector<2x80xf32>
    %180 = arith.truncf %148 : vector<2x20xf32> to vector<2x20xbf16>
    %cst_62 = arith.constant dense<0.000000e+00> : vector<2x80xf32>
    %181 = tpu.matmul %180, %55, %cst_62 {dimension_numbers = #tpu.dot_dimension_numbers<[1], [0], [0], [1], [0, 0, 1, 1], [], []>} : vector<2x20xbf16>, vector<20x80xbf16>, vector<2x80xf32> -> vector<2x80xf32>
    %182 = arith.addf %179, %181 : vector<2x80xf32>
    %183 = vector.extract_strided_slice %182 {offsets = [0, 0], sizes = [2, 20], strides = [1, 1]} : vector<2x80xf32> to vector<2x20xf32>
    %184 = arith.negf %183 : vector<2x20xf32>
    %185 = math.exp %184 : vector<2x20xf32>
    %cst_63 = arith.constant 1.000000e+00 : f32
    %186 = vector.broadcast %cst_63 : f32 to vector<2x20xf32>
    %187 = arith.addf %186, %185 : vector<2x20xf32>
    %188 = arith.divf %186, %187 : vector<2x20xf32>
    %189 = vector.extract_strided_slice %182 {offsets = [0, 20], sizes = [2, 20], strides = [1, 1]} : vector<2x80xf32> to vector<2x20xf32>
    %190 = arith.negf %189 : vector<2x20xf32>
    %191 = math.exp %190 : vector<2x20xf32>
    %cst_64 = arith.constant 1.000000e+00 : f32
    %192 = vector.broadcast %cst_64 : f32 to vector<2x20xf32>
    %193 = arith.addf %192, %191 : vector<2x20xf32>
    %194 = arith.divf %192, %193 : vector<2x20xf32>
    %195 = vector.extract_strided_slice %182 {offsets = [0, 40], sizes = [2, 20], strides = [1, 1]} : vector<2x80xf32> to vector<2x20xf32>
    %196 = math.tanh %195 : vector<2x20xf32>
    %197 = vector.extract_strided_slice %182 {offsets = [0, 60], sizes = [2, 20], strides = [1, 1]} : vector<2x80xf32> to vector<2x20xf32>
    %198 = arith.negf %197 : vector<2x20xf32>
    %199 = math.exp %198 : vector<2x20xf32>
    %cst_65 = arith.constant 1.000000e+00 : f32
    %200 = vector.broadcast %cst_65 : f32 to vector<2x20xf32>
    %201 = arith.addf %200, %199 : vector<2x20xf32>
    %202 = arith.divf %200, %201 : vector<2x20xf32>
    %203 = arith.mulf %194, %146 : vector<2x20xf32>
    %204 = arith.mulf %188, %196 : vector<2x20xf32>
    %205 = arith.addf %203, %204 : vector<2x20xf32>
    %206 = math.tanh %205 : vector<2x20xf32>
    %207 = arith.mulf %202, %206 : vector<2x20xf32>
    %208 = tpu.concatenate %207, %177 in 1 : vector<2x20xf32>, vector<2x20xf32> -> vector<2x40xf32>
    %209 = arith.truncf %208 : vector<2x40xf32> to vector<2x40xbf16>
    %cst_66 = arith.constant dense<0.000000e+00> : vector<2x80xf32>
    %210 = tpu.matmul %209, %56, %cst_66 {dimension_numbers = #tpu.dot_dimension_numbers<[1], [0], [0], [1], [0, 0, 1, 1], [], []>} : vector<2x40xbf16>, vector<40x80xbf16>, vector<2x80xf32> -> vector<2x80xf32>
    %211 = arith.addf %210, %59 : vector<2x80xf32>
    %212 = vector.extract_strided_slice %211 {offsets = [0, 0], sizes = [2, 20], strides = [1, 1]} : vector<2x80xf32> to vector<2x20xf32>
    %213 = arith.negf %212 : vector<2x20xf32>
    %214 = math.exp %213 : vector<2x20xf32>
    %cst_67 = arith.constant 1.000000e+00 : f32
    %215 = vector.broadcast %cst_67 : f32 to vector<2x20xf32>
    %216 = arith.addf %215, %214 : vector<2x20xf32>
    %217 = arith.divf %215, %216 : vector<2x20xf32>
    %218 = vector.extract_strided_slice %211 {offsets = [0, 20], sizes = [2, 20], strides = [1, 1]} : vector<2x80xf32> to vector<2x20xf32>
    %219 = arith.negf %218 : vector<2x20xf32>
    %220 = math.exp %219 : vector<2x20xf32>
    %cst_68 = arith.constant 1.000000e+00 : f32
    %221 = vector.broadcast %cst_68 : f32 to vector<2x20xf32>
    %222 = arith.addf %221, %220 : vector<2x20xf32>
    %223 = arith.divf %221, %222 : vector<2x20xf32>
    %224 = vector.extract_strided_slice %211 {offsets = [0, 40], sizes = [2, 20], strides = [1, 1]} : vector<2x80xf32> to vector<2x20xf32>
    %225 = math.tanh %224 : vector<2x20xf32>
    %226 = vector.extract_strided_slice %211 {offsets = [0, 60], sizes = [2, 20], strides = [1, 1]} : vector<2x80xf32> to vector<2x20xf32>
    %227 = arith.negf %226 : vector<2x20xf32>
    %228 = math.exp %227 : vector<2x20xf32>
    %cst_69 = arith.constant 1.000000e+00 : f32
    %229 = vector.broadcast %cst_69 : f32 to vector<2x20xf32>
    %230 = arith.addf %229, %228 : vector<2x20xf32>
    %231 = arith.divf %229, %230 : vector<2x20xf32>
    %232 = arith.mulf %223, %175 : vector<2x20xf32>
    %233 = arith.mulf %217, %225 : vector<2x20xf32>
    %234 = arith.addf %232, %233 : vector<2x20xf32>
    %235 = math.tanh %234 : vector<2x20xf32>
    %236 = arith.mulf %231, %235 : vector<2x20xf32>
    %c4 = arith.constant 4 : index
    %c0_70 = arith.constant 0 : index
    %237 = vector.load %arg28[%c4, %c0_70] : memref<16x20xf32, #tpu.memory_space<vmem>>, vector<2x20xf32>
    tpu.vector_store %arg28[%c4, %c0_70], %236 {strides = array<i32>} : memref<16x20xf32, #tpu.memory_space<vmem>>, vector<2x20xf32>,
    %238 = vector.extract_strided_slice %54 {offsets = [6, 0], sizes = [2, 80], strides = [1, 1]} : vector<16x80xf32> to vector<2x80xf32>
    %239 = arith.truncf %207 : vector<2x20xf32> to vector<2x20xbf16>
    %cst_71 = arith.constant dense<0.000000e+00> : vector<2x80xf32>
    %240 = tpu.matmul %239, %55, %cst_71 {dimension_numbers = #tpu.dot_dimension_numbers<[1], [0], [0], [1], [0, 0, 1, 1], [], []>} : vector<2x20xbf16>, vector<20x80xbf16>, vector<2x80xf32> -> vector<2x80xf32>
    %241 = arith.addf %238, %240 : vector<2x80xf32>
    %242 = vector.extract_strided_slice %241 {offsets = [0, 0], sizes = [2, 20], strides = [1, 1]} : vector<2x80xf32> to vector<2x20xf32>
    %243 = arith.negf %242 : vector<2x20xf32>
    %244 = math.exp %243 : vector<2x20xf32>
    %cst_72 = arith.constant 1.000000e+00 : f32
    %245 = vector.broadcast %cst_72 : f32 to vector<2x20xf32>
    %246 = arith.addf %245, %244 : vector<2x20xf32>
    %247 = arith.divf %245, %246 : vector<2x20xf32>
    %248 = vector.extract_strided_slice %241 {offsets = [0, 20], sizes = [2, 20], strides = [1, 1]} : vector<2x80xf32> to vector<2x20xf32>
    %249 = arith.negf %248 : vector<2x20xf32>
    %250 = math.exp %249 : vector<2x20xf32>
    %cst_73 = arith.constant 1.000000e+00 : f32
    %251 = vector.broadcast %cst_73 : f32 to vector<2x20xf32>
    %252 = arith.addf %251, %250 : vector<2x20xf32>
    %253 = arith.divf %251, %252 : vector<2x20xf32>
    %254 = vector.extract_strided_slice %241 {offsets = [0, 40], sizes = [2, 20], strides = [1, 1]} : vector<2x80xf32> to vector<2x20xf32>
    %255 = math.tanh %254 : vector<2x20xf32>
    %256 = vector.extract_strided_slice %241 {offsets = [0, 60], sizes = [2, 20], strides = [1, 1]} : vector<2x80xf32> to vector<2x20xf32>
    %257 = arith.negf %256 : vector<2x20xf32>
    %258 = math.exp %257 : vector<2x20xf32>
    %cst_74 = arith.constant 1.000000e+00 : f32
    %259 = vector.broadcast %cst_74 : f32 to vector<2x20xf32>
    %260 = arith.addf %259, %258 : vector<2x20xf32>
    %261 = arith.divf %259, %260 : vector<2x20xf32>
    %262 = arith.mulf %253, %205 : vector<2x20xf32>
    %263 = arith.mulf %247, %255 : vector<2x20xf32>
    %264 = arith.addf %262, %263 : vector<2x20xf32>
    %265 = math.tanh %264 : vector<2x20xf32>
    %266 = arith.mulf %261, %265 : vector<2x20xf32>
    %267 = tpu.concatenate %266, %236 in 1 : vector<2x20xf32>, vector<2x20xf32> -> vector<2x40xf32>
    %268 = arith.truncf %267 : vector<2x40xf32> to vector<2x40xbf16>
    %cst_75 = arith.constant dense<0.000000e+00> : vector<2x80xf32>
    %269 = tpu.matmul %268, %56, %cst_75 {dimension_numbers = #tpu.dot_dimension_numbers<[1], [0], [0], [1], [0, 0, 1, 1], [], []>} : vector<2x40xbf16>, vector<40x80xbf16>, vector<2x80xf32> -> vector<2x80xf32>
    %270 = arith.addf %269, %59 : vector<2x80xf32>
    %271 = vector.extract_strided_slice %270 {offsets = [0, 0], sizes = [2, 20], strides = [1, 1]} : vector<2x80xf32> to vector<2x20xf32>
    %272 = arith.negf %271 : vector<2x20xf32>
    %273 = math.exp %272 : vector<2x20xf32>
    %cst_76 = arith.constant 1.000000e+00 : f32
    %274 = vector.broadcast %cst_76 : f32 to vector<2x20xf32>
    %275 = arith.addf %274, %273 : vector<2x20xf32>
    %276 = arith.divf %274, %275 : vector<2x20xf32>
    %277 = vector.extract_strided_slice %270 {offsets = [0, 20], sizes = [2, 20], strides = [1, 1]} : vector<2x80xf32> to vector<2x20xf32>
    %278 = arith.negf %277 : vector<2x20xf32>
    %279 = math.exp %278 : vector<2x20xf32>
    %cst_77 = arith.constant 1.000000e+00 : f32
    %280 = vector.broadcast %cst_77 : f32 to vector<2x20xf32>
    %281 = arith.addf %280, %279 : vector<2x20xf32>
    %282 = arith.divf %280, %281 : vector<2x20xf32>
    %283 = vector.extract_strided_slice %270 {offsets = [0, 40], sizes = [2, 20], strides = [1, 1]} : vector<2x80xf32> to vector<2x20xf32>
    %284 = math.tanh %283 : vector<2x20xf32>
    %285 = vector.extract_strided_slice %270 {offsets = [0, 60], sizes = [2, 20], strides = [1, 1]} : vector<2x80xf32> to vector<2x20xf32>
    %286 = arith.negf %285 : vector<2x20xf32>
    %287 = math.exp %286 : vector<2x20xf32>
    %cst_78 = arith.constant 1.000000e+00 : f32
    %288 = vector.broadcast %cst_78 : f32 to vector<2x20xf32>
    %289 = arith.addf %288, %287 : vector<2x20xf32>
    %290 = arith.divf %288, %289 : vector<2x20xf32>
    %291 = arith.mulf %282, %234 : vector<2x20xf32>
    %292 = arith.mulf %276, %284 : vector<2x20xf32>
    %293 = arith.addf %291, %292 : vector<2x20xf32>
    %294 = math.tanh %293 : vector<2x20xf32>
    %295 = arith.mulf %290, %294 : vector<2x20xf32>
    %c6 = arith.constant 6 : index
    %c0_79 = arith.constant 0 : index
    %296 = vector.load %arg28[%c6, %c0_79] : memref<16x20xf32, #tpu.memory_space<vmem>>, vector<2x20xf32>
    tpu.vector_store %arg28[%c6, %c0_79], %295 {strides = array<i32>} : memref<16x20xf32, #tpu.memory_space<vmem>>, vector<2x20xf32>,
    %297 = vector.extract_strided_slice %54 {offsets = [8, 0], sizes = [2, 80], strides = [1, 1]} : vector<16x80xf32> to vector<2x80xf32>
    %298 = arith.truncf %266 : vector<2x20xf32> to vector<2x20xbf16>
    %cst_80 = arith.constant dense<0.000000e+00> : vector<2x80xf32>
    %299 = tpu.matmul %298, %55, %cst_80 {dimension_numbers = #tpu.dot_dimension_numbers<[1], [0], [0], [1], [0, 0, 1, 1], [], []>} : vector<2x20xbf16>, vector<20x80xbf16>, vector<2x80xf32> -> vector<2x80xf32>
    %300 = arith.addf %297, %299 : vector<2x80xf32>
    %301 = vector.extract_strided_slice %300 {offsets = [0, 0], sizes = [2, 20], strides = [1, 1]} : vector<2x80xf32> to vector<2x20xf32>
    %302 = arith.negf %301 : vector<2x20xf32>
    %303 = math.exp %302 : vector<2x20xf32>
    %cst_81 = arith.constant 1.000000e+00 : f32
    %304 = vector.broadcast %cst_81 : f32 to vector<2x20xf32>
    %305 = arith.addf %304, %303 : vector<2x20xf32>
    %306 = arith.divf %304, %305 : vector<2x20xf32>
    %307 = vector.extract_strided_slice %300 {offsets = [0, 20], sizes = [2, 20], strides = [1, 1]} : vector<2x80xf32> to vector<2x20xf32>
    %308 = arith.negf %307 : vector<2x20xf32>
    %309 = math.exp %308 : vector<2x20xf32>
    %cst_82 = arith.constant 1.000000e+00 : f32
    %310 = vector.broadcast %cst_82 : f32 to vector<2x20xf32>
    %311 = arith.addf %310, %309 : vector<2x20xf32>
    %312 = arith.divf %310, %311 : vector<2x20xf32>
    %313 = vector.extract_strided_slice %300 {offsets = [0, 40], sizes = [2, 20], strides = [1, 1]} : vector<2x80xf32> to vector<2x20xf32>
    %314 = math.tanh %313 : vector<2x20xf32>
    %315 = vector.extract_strided_slice %300 {offsets = [0, 60], sizes = [2, 20], strides = [1, 1]} : vector<2x80xf32> to vector<2x20xf32>
    %316 = arith.negf %315 : vector<2x20xf32>
    %317 = math.exp %316 : vector<2x20xf32>
    %cst_83 = arith.constant 1.000000e+00 : f32
    %318 = vector.broadcast %cst_83 : f32 to vector<2x20xf32>
    %319 = arith.addf %318, %317 : vector<2x20xf32>
    %320 = arith.divf %318, %319 : vector<2x20xf32>
    %321 = arith.mulf %312, %264 : vector<2x20xf32>
    %322 = arith.mulf %306, %314 : vector<2x20xf32>
    %323 = arith.addf %321, %322 : vector<2x20xf32>
    %324 = math.tanh %323 : vector<2x20xf32>
    %325 = arith.mulf %320, %324 : vector<2x20xf32>
    %326 = tpu.concatenate %325, %295 in 1 : vector<2x20xf32>, vector<2x20xf32> -> vector<2x40xf32>
    %327 = arith.truncf %326 : vector<2x40xf32> to vector<2x40xbf16>
    %cst_84 = arith.constant dense<0.000000e+00> : vector<2x80xf32>
    %328 = tpu.matmul %327, %56, %cst_84 {dimension_numbers = #tpu.dot_dimension_numbers<[1], [0], [0], [1], [0, 0, 1, 1], [], []>} : vector<2x40xbf16>, vector<40x80xbf16>, vector<2x80xf32> -> vector<2x80xf32>
    %329 = arith.addf %328, %59 : vector<2x80xf32>
    %330 = vector.extract_strided_slice %329 {offsets = [0, 0], sizes = [2, 20], strides = [1, 1]} : vector<2x80xf32> to vector<2x20xf32>
    %331 = arith.negf %330 : vector<2x20xf32>
    %332 = math.exp %331 : vector<2x20xf32>
    %cst_85 = arith.constant 1.000000e+00 : f32
    %333 = vector.broadcast %cst_85 : f32 to vector<2x20xf32>
    %334 = arith.addf %333, %332 : vector<2x20xf32>
    %335 = arith.divf %333, %334 : vector<2x20xf32>
    %336 = vector.extract_strided_slice %329 {offsets = [0, 20], sizes = [2, 20], strides = [1, 1]} : vector<2x80xf32> to vector<2x20xf32>
    %337 = arith.negf %336 : vector<2x20xf32>
    %338 = math.exp %337 : vector<2x20xf32>
    %cst_86 = arith.constant 1.000000e+00 : f32
    %339 = vector.broadcast %cst_86 : f32 to vector<2x20xf32>
    %340 = arith.addf %339, %338 : vector<2x20xf32>
    %341 = arith.divf %339, %340 : vector<2x20xf32>
    %342 = vector.extract_strided_slice %329 {offsets = [0, 40], sizes = [2, 20], strides = [1, 1]} : vector<2x80xf32> to vector<2x20xf32>
    %343 = math.tanh %342 : vector<2x20xf32>
    %344 = vector.extract_strided_slice %329 {offsets = [0, 60], sizes = [2, 20], strides = [1, 1]} : vector<2x80xf32> to vector<2x20xf32>
    %345 = arith.negf %344 : vector<2x20xf32>
    %346 = math.exp %345 : vector<2x20xf32>
    %cst_87 = arith.constant 1.000000e+00 : f32
    %347 = vector.broadcast %cst_87 : f32 to vector<2x20xf32>
    %348 = arith.addf %347, %346 : vector<2x20xf32>
    %349 = arith.divf %347, %348 : vector<2x20xf32>
    %350 = arith.mulf %341, %293 : vector<2x20xf32>
    %351 = arith.mulf %335, %343 : vector<2x20xf32>
    %352 = arith.addf %350, %351 : vector<2x20xf32>
    %353 = math.tanh %352 : vector<2x20xf32>
    %354 = arith.mulf %349, %353 : vector<2x20xf32>
    %c8 = arith.constant 8 : index
    %c0_88 = arith.constant 0 : index
    %355 = vector.load %arg28[%c8, %c0_88] : memref<16x20xf32, #tpu.memory_space<vmem>>, vector<2x20xf32>
    tpu.vector_store %arg28[%c8, %c0_88], %354 {strides = array<i32>} : memref<16x20xf32, #tpu.memory_space<vmem>>, vector<2x20xf32>,
    %356 = vector.extract_strided_slice %54 {offsets = [10, 0], sizes = [2, 80], strides = [1, 1]} : vector<16x80xf32> to vector<2x80xf32>
    %357 = arith.truncf %325 : vector<2x20xf32> to vector<2x20xbf16>
    %cst_89 = arith.constant dense<0.000000e+00> : vector<2x80xf32>
    %358 = tpu.matmul %357, %55, %cst_89 {dimension_numbers = #tpu.dot_dimension_numbers<[1], [0], [0], [1], [0, 0, 1, 1], [], []>} : vector<2x20xbf16>, vector<20x80xbf16>, vector<2x80xf32> -> vector<2x80xf32>
    %359 = arith.addf %356, %358 : vector<2x80xf32>
    %360 = vector.extract_strided_slice %359 {offsets = [0, 0], sizes = [2, 20], strides = [1, 1]} : vector<2x80xf32> to vector<2x20xf32>
    %361 = arith.negf %360 : vector<2x20xf32>
    %362 = math.exp %361 : vector<2x20xf32>
    %cst_90 = arith.constant 1.000000e+00 : f32
    %363 = vector.broadcast %cst_90 : f32 to vector<2x20xf32>
    %364 = arith.addf %363, %362 : vector<2x20xf32>
    %365 = arith.divf %363, %364 : vector<2x20xf32>
    %366 = vector.extract_strided_slice %359 {offsets = [0, 20], sizes = [2, 20], strides = [1, 1]} : vector<2x80xf32> to vector<2x20xf32>
    %367 = arith.negf %366 : vector<2x20xf32>
    %368 = math.exp %367 : vector<2x20xf32>
    %cst_91 = arith.constant 1.000000e+00 : f32
    %369 = vector.broadcast %cst_91 : f32 to vector<2x20xf32>
    %370 = arith.addf %369, %368 : vector<2x20xf32>
    %371 = arith.divf %369, %370 : vector<2x20xf32>
    %372 = vector.extract_strided_slice %359 {offsets = [0, 40], sizes = [2, 20], strides = [1, 1]} : vector<2x80xf32> to vector<2x20xf32>
    %373 = math.tanh %372 : vector<2x20xf32>
    %374 = vector.extract_strided_slice %359 {offsets = [0, 60], sizes = [2, 20], strides = [1, 1]} : vector<2x80xf32> to vector<2x20xf32>
    %375 = arith.negf %374 : vector<2x20xf32>
    %376 = math.exp %375 : vector<2x20xf32>
    %cst_92 = arith.constant 1.000000e+00 : f32
    %377 = vector.broadcast %cst_92 : f32 to vector<2x20xf32>
    %378 = arith.addf %377, %376 : vector<2x20xf32>
    %379 = arith.divf %377, %378 : vector<2x20xf32>
    %380 = arith.mulf %371, %323 : vector<2x20xf32>
    %381 = arith.mulf %365, %373 : vector<2x20xf32>
    %382 = arith.addf %380, %381 : vector<2x20xf32>
    %383 = math.tanh %382 : vector<2x20xf32>
    %384 = arith.mulf %379, %383 : vector<2x20xf32>
    %385 = tpu.concatenate %384, %354 in 1 : vector<2x20xf32>, vector<2x20xf32> -> vector<2x40xf32>
    %386 = arith.truncf %385 : vector<2x40xf32> to vector<2x40xbf16>
    %cst_93 = arith.constant dense<0.000000e+00> : vector<2x80xf32>
    %387 = tpu.matmul %386, %56, %cst_93 {dimension_numbers = #tpu.dot_dimension_numbers<[1], [0], [0], [1], [0, 0, 1, 1], [], []>} : vector<2x40xbf16>, vector<40x80xbf16>, vector<2x80xf32> -> vector<2x80xf32>
    %388 = arith.addf %387, %59 : vector<2x80xf32>
    %389 = vector.extract_strided_slice %388 {offsets = [0, 0], sizes = [2, 20], strides = [1, 1]} : vector<2x80xf32> to vector<2x20xf32>
    %390 = arith.negf %389 : vector<2x20xf32>
    %391 = math.exp %390 : vector<2x20xf32>
    %cst_94 = arith.constant 1.000000e+00 : f32
    %392 = vector.broadcast %cst_94 : f32 to vector<2x20xf32>
    %393 = arith.addf %392, %391 : vector<2x20xf32>
    %394 = arith.divf %392, %393 : vector<2x20xf32>
    %395 = vector.extract_strided_slice %388 {offsets = [0, 20], sizes = [2, 20], strides = [1, 1]} : vector<2x80xf32> to vector<2x20xf32>
    %396 = arith.negf %395 : vector<2x20xf32>
    %397 = math.exp %396 : vector<2x20xf32>
    %cst_95 = arith.constant 1.000000e+00 : f32
    %398 = vector.broadcast %cst_95 : f32 to vector<2x20xf32>
    %399 = arith.addf %398, %397 : vector<2x20xf32>
    %400 = arith.divf %398, %399 : vector<2x20xf32>
    %401 = vector.extract_strided_slice %388 {offsets = [0, 40], sizes = [2, 20], strides = [1, 1]} : vector<2x80xf32> to vector<2x20xf32>
    %402 = math.tanh %401 : vector<2x20xf32>
    %403 = vector.extract_strided_slice %388 {offsets = [0, 60], sizes = [2, 20], strides = [1, 1]} : vector<2x80xf32> to vector<2x20xf32>
    %404 = arith.negf %403 : vector<2x20xf32>
    %405 = math.exp %404 : vector<2x20xf32>
    %cst_96 = arith.constant 1.000000e+00 : f32
    %406 = vector.broadcast %cst_96 : f32 to vector<2x20xf32>
    %407 = arith.addf %406, %405 : vector<2x20xf32>
    %408 = arith.divf %406, %407 : vector<2x20xf32>
    %409 = arith.mulf %400, %352 : vector<2x20xf32>
    %410 = arith.mulf %394, %402 : vector<2x20xf32>
    %411 = arith.addf %409, %410 : vector<2x20xf32>
    %412 = math.tanh %411 : vector<2x20xf32>
    %413 = arith.mulf %408, %412 : vector<2x20xf32>
    %c10 = arith.constant 10 : index
    %c0_97 = arith.constant 0 : index
    %414 = vector.load %arg28[%c10, %c0_97] : memref<16x20xf32, #tpu.memory_space<vmem>>, vector<2x20xf32>
    tpu.vector_store %arg28[%c10, %c0_97], %413 {strides = array<i32>} : memref<16x20xf32, #tpu.memory_space<vmem>>, vector<2x20xf32>,
    %415 = vector.extract_strided_slice %54 {offsets = [12, 0], sizes = [2, 80], strides = [1, 1]} : vector<16x80xf32> to vector<2x80xf32>
    %416 = arith.truncf %384 : vector<2x20xf32> to vector<2x20xbf16>
    %cst_98 = arith.constant dense<0.000000e+00> : vector<2x80xf32>
    %417 = tpu.matmul %416, %55, %cst_98 {dimension_numbers = #tpu.dot_dimension_numbers<[1], [0], [0], [1], [0, 0, 1, 1], [], []>} : vector<2x20xbf16>, vector<20x80xbf16>, vector<2x80xf32> -> vector<2x80xf32>
    %418 = arith.addf %415, %417 : vector<2x80xf32>
    %419 = vector.extract_strided_slice %418 {offsets = [0, 0], sizes = [2, 20], strides = [1, 1]} : vector<2x80xf32> to vector<2x20xf32>
    %420 = arith.negf %419 : vector<2x20xf32>
    %421 = math.exp %420 : vector<2x20xf32>
    %cst_99 = arith.constant 1.000000e+00 : f32
    %422 = vector.broadcast %cst_99 : f32 to vector<2x20xf32>
    %423 = arith.addf %422, %421 : vector<2x20xf32>
    %424 = arith.divf %422, %423 : vector<2x20xf32>
    %425 = vector.extract_strided_slice %418 {offsets = [0, 20], sizes = [2, 20], strides = [1, 1]} : vector<2x80xf32> to vector<2x20xf32>
    %426 = arith.negf %425 : vector<2x20xf32>
    %427 = math.exp %426 : vector<2x20xf32>
    %cst_100 = arith.constant 1.000000e+00 : f32
    %428 = vector.broadcast %cst_100 : f32 to vector<2x20xf32>
    %429 = arith.addf %428, %427 : vector<2x20xf32>
    %430 = arith.divf %428, %429 : vector<2x20xf32>
    %431 = vector.extract_strided_slice %418 {offsets = [0, 40], sizes = [2, 20], strides = [1, 1]} : vector<2x80xf32> to vector<2x20xf32>
    %432 = math.tanh %431 : vector<2x20xf32>
    %433 = vector.extract_strided_slice %418 {offsets = [0, 60], sizes = [2, 20], strides = [1, 1]} : vector<2x80xf32> to vector<2x20xf32>
    %434 = arith.negf %433 : vector<2x20xf32>
    %435 = math.exp %434 : vector<2x20xf32>
    %cst_101 = arith.constant 1.000000e+00 : f32
    %436 = vector.broadcast %cst_101 : f32 to vector<2x20xf32>
    %437 = arith.addf %436, %435 : vector<2x20xf32>
    %438 = arith.divf %436, %437 : vector<2x20xf32>
    %439 = arith.mulf %430, %382 : vector<2x20xf32>
    %440 = arith.mulf %424, %432 : vector<2x20xf32>
    %441 = arith.addf %439, %440 : vector<2x20xf32>
    %442 = math.tanh %441 : vector<2x20xf32>
    %443 = arith.mulf %438, %442 : vector<2x20xf32>
    %444 = tpu.concatenate %443, %413 in 1 : vector<2x20xf32>, vector<2x20xf32> -> vector<2x40xf32>
    %445 = arith.truncf %444 : vector<2x40xf32> to vector<2x40xbf16>
    %cst_102 = arith.constant dense<0.000000e+00> : vector<2x80xf32>
    %446 = tpu.matmul %445, %56, %cst_102 {dimension_numbers = #tpu.dot_dimension_numbers<[1], [0], [0], [1], [0, 0, 1, 1], [], []>} : vector<2x40xbf16>, vector<40x80xbf16>, vector<2x80xf32> -> vector<2x80xf32>
    %447 = arith.addf %446, %59 : vector<2x80xf32>
    %448 = vector.extract_strided_slice %447 {offsets = [0, 0], sizes = [2, 20], strides = [1, 1]} : vector<2x80xf32> to vector<2x20xf32>
    %449 = arith.negf %448 : vector<2x20xf32>
    %450 = math.exp %449 : vector<2x20xf32>
    %cst_103 = arith.constant 1.000000e+00 : f32
    %451 = vector.broadcast %cst_103 : f32 to vector<2x20xf32>
    %452 = arith.addf %451, %450 : vector<2x20xf32>
    %453 = arith.divf %451, %452 : vector<2x20xf32>
    %454 = vector.extract_strided_slice %447 {offsets = [0, 20], sizes = [2, 20], strides = [1, 1]} : vector<2x80xf32> to vector<2x20xf32>
    %455 = arith.negf %454 : vector<2x20xf32>
    %456 = math.exp %455 : vector<2x20xf32>
    %cst_104 = arith.constant 1.000000e+00 : f32
    %457 = vector.broadcast %cst_104 : f32 to vector<2x20xf32>
    %458 = arith.addf %457, %456 : vector<2x20xf32>
    %459 = arith.divf %457, %458 : vector<2x20xf32>
    %460 = vector.extract_strided_slice %447 {offsets = [0, 40], sizes = [2, 20], strides = [1, 1]} : vector<2x80xf32> to vector<2x20xf32>
    %461 = math.tanh %460 : vector<2x20xf32>
    %462 = vector.extract_strided_slice %447 {offsets = [0, 60], sizes = [2, 20], strides = [1, 1]} : vector<2x80xf32> to vector<2x20xf32>
    %463 = arith.negf %462 : vector<2x20xf32>
    %464 = math.exp %463 : vector<2x20xf32>
    %cst_105 = arith.constant 1.000000e+00 : f32
    %465 = vector.broadcast %cst_105 : f32 to vector<2x20xf32>
    %466 = arith.addf %465, %464 : vector<2x20xf32>
    %467 = arith.divf %465, %466 : vector<2x20xf32>
    %468 = arith.mulf %459, %411 : vector<2x20xf32>
    %469 = arith.mulf %453, %461 : vector<2x20xf32>
    %470 = arith.addf %468, %469 : vector<2x20xf32>
    %471 = math.tanh %470 : vector<2x20xf32>
    %472 = arith.mulf %467, %471 : vector<2x20xf32>
    %c12 = arith.constant 12 : index
    %c0_106 = arith.constant 0 : index
    %473 = vector.load %arg28[%c12, %c0_106] : memref<16x20xf32, #tpu.memory_space<vmem>>, vector<2x20xf32>
    tpu.vector_store %arg28[%c12, %c0_106], %472 {strides = array<i32>} : memref<16x20xf32, #tpu.memory_space<vmem>>, vector<2x20xf32>,
    %474 = vector.extract_strided_slice %54 {offsets = [14, 0], sizes = [2, 80], strides = [1, 1]} : vector<16x80xf32> to vector<2x80xf32>
    %475 = arith.truncf %443 : vector<2x20xf32> to vector<2x20xbf16>
    %cst_107 = arith.constant dense<0.000000e+00> : vector<2x80xf32>
    %476 = tpu.matmul %475, %55, %cst_107 {dimension_numbers = #tpu.dot_dimension_numbers<[1], [0], [0], [1], [0, 0, 1, 1], [], []>} : vector<2x20xbf16>, vector<20x80xbf16>, vector<2x80xf32> -> vector<2x80xf32>
    %477 = arith.addf %474, %476 : vector<2x80xf32>
    %478 = vector.extract_strided_slice %477 {offsets = [0, 0], sizes = [2, 20], strides = [1, 1]} : vector<2x80xf32> to vector<2x20xf32>
    %479 = arith.negf %478 : vector<2x20xf32>
    %480 = math.exp %479 : vector<2x20xf32>
    %cst_108 = arith.constant 1.000000e+00 : f32
    %481 = vector.broadcast %cst_108 : f32 to vector<2x20xf32>
    %482 = arith.addf %481, %480 : vector<2x20xf32>
    %483 = arith.divf %481, %482 : vector<2x20xf32>
    %484 = vector.extract_strided_slice %477 {offsets = [0, 20], sizes = [2, 20], strides = [1, 1]} : vector<2x80xf32> to vector<2x20xf32>
    %485 = arith.negf %484 : vector<2x20xf32>
    %486 = math.exp %485 : vector<2x20xf32>
    %cst_109 = arith.constant 1.000000e+00 : f32
    %487 = vector.broadcast %cst_109 : f32 to vector<2x20xf32>
    %488 = arith.addf %487, %486 : vector<2x20xf32>
    %489 = arith.divf %487, %488 : vector<2x20xf32>
    %490 = vector.extract_strided_slice %477 {offsets = [0, 40], sizes = [2, 20], strides = [1, 1]} : vector<2x80xf32> to vector<2x20xf32>
    %491 = math.tanh %490 : vector<2x20xf32>
    %492 = vector.extract_strided_slice %477 {offsets = [0, 60], sizes = [2, 20], strides = [1, 1]} : vector<2x80xf32> to vector<2x20xf32>
    %493 = arith.negf %492 : vector<2x20xf32>
    %494 = math.exp %493 : vector<2x20xf32>
    %cst_110 = arith.constant 1.000000e+00 : f32
    %495 = vector.broadcast %cst_110 : f32 to vector<2x20xf32>
    %496 = arith.addf %495, %494 : vector<2x20xf32>
    %497 = arith.divf %495, %496 : vector<2x20xf32>
    %498 = arith.mulf %489, %441 : vector<2x20xf32>
    %499 = arith.mulf %483, %491 : vector<2x20xf32>
    %500 = arith.addf %498, %499 : vector<2x20xf32>
    %501 = math.tanh %500 : vector<2x20xf32>
    %502 = arith.mulf %497, %501 : vector<2x20xf32>
    %503 = tpu.concatenate %502, %472 in 1 : vector<2x20xf32>, vector<2x20xf32> -> vector<2x40xf32>
    %504 = arith.truncf %503 : vector<2x40xf32> to vector<2x40xbf16>
    %cst_111 = arith.constant dense<0.000000e+00> : vector<2x80xf32>
    %505 = tpu.matmul %504, %56, %cst_111 {dimension_numbers = #tpu.dot_dimension_numbers<[1], [0], [0], [1], [0, 0, 1, 1], [], []>} : vector<2x40xbf16>, vector<40x80xbf16>, vector<2x80xf32> -> vector<2x80xf32>
    %506 = arith.addf %505, %59 : vector<2x80xf32>
    %507 = vector.extract_strided_slice %506 {offsets = [0, 0], sizes = [2, 20], strides = [1, 1]} : vector<2x80xf32> to vector<2x20xf32>
    %508 = arith.negf %507 : vector<2x20xf32>
    %509 = math.exp %508 : vector<2x20xf32>
    %cst_112 = arith.constant 1.000000e+00 : f32
    %510 = vector.broadcast %cst_112 : f32 to vector<2x20xf32>
    %511 = arith.addf %510, %509 : vector<2x20xf32>
    %512 = arith.divf %510, %511 : vector<2x20xf32>
    %513 = vector.extract_strided_slice %506 {offsets = [0, 20], sizes = [2, 20], strides = [1, 1]} : vector<2x80xf32> to vector<2x20xf32>
    %514 = arith.negf %513 : vector<2x20xf32>
    %515 = math.exp %514 : vector<2x20xf32>
    %cst_113 = arith.constant 1.000000e+00 : f32
    %516 = vector.broadcast %cst_113 : f32 to vector<2x20xf32>
    %517 = arith.addf %516, %515 : vector<2x20xf32>
    %518 = arith.divf %516, %517 : vector<2x20xf32>
    %519 = vector.extract_strided_slice %506 {offsets = [0, 40], sizes = [2, 20], strides = [1, 1]} : vector<2x80xf32> to vector<2x20xf32>
    %520 = math.tanh %519 : vector<2x20xf32>
    %521 = vector.extract_strided_slice %506 {offsets = [0, 60], sizes = [2, 20], strides = [1, 1]} : vector<2x80xf32> to vector<2x20xf32>
    %522 = arith.negf %521 : vector<2x20xf32>
    %523 = math.exp %522 : vector<2x20xf32>
    %cst_114 = arith.constant 1.000000e+00 : f32
    %524 = vector.broadcast %cst_114 : f32 to vector<2x20xf32>
    %525 = arith.addf %524, %523 : vector<2x20xf32>
    %526 = arith.divf %524, %525 : vector<2x20xf32>
    %527 = arith.mulf %518, %470 : vector<2x20xf32>
    %528 = arith.mulf %512, %520 : vector<2x20xf32>
    %529 = arith.addf %527, %528 : vector<2x20xf32>
    %530 = math.tanh %529 : vector<2x20xf32>
    %531 = arith.mulf %526, %530 : vector<2x20xf32>
    %c14 = arith.constant 14 : index
    %c0_115 = arith.constant 0 : index
    %532 = vector.load %arg28[%c14, %c0_115] : memref<16x20xf32, #tpu.memory_space<vmem>>, vector<2x20xf32>
    tpu.vector_store %arg28[%c14, %c0_115], %531 {strides = array<i32>} : memref<16x20xf32, #tpu.memory_space<vmem>>, vector<2x20xf32>,
    %c0_116 = arith.constant 0 : index
    %c0_117 = arith.constant 0 : index
    %533 = vector.load %arg28[%c0_116, %c0_117] : memref<16x20xf32, #tpu.memory_space<vmem>>, vector<16x20xf32>
    %c0_118 = arith.constant 0 : index
    %c0_119 = arith.constant 0 : index
    %534 = vector.load %arg16[%c0_118, %c0_119] : memref<20x12xbf16, #tpu.memory_space<vmem>>, vector<20x12xbf16>
    %535 = arith.truncf %533 : vector<16x20xf32> to vector<16x20xbf16>
    %cst_120 = arith.constant dense<0.000000e+00> : vector<16x12xf32>
    %536 = tpu.matmul %535, %534, %cst_120 {dimension_numbers = #tpu.dot_dimension_numbers<[1], [0], [0], [1], [0, 0, 1, 1], [], []>} : vector<16x20xbf16>, vector<20x12xbf16>, vector<16x12xf32> -> vector<16x12xf32>
    %c0_121 = arith.constant 0 : index
    %c0_122 = arith.constant 0 : index
    %537 = vector.load %arg17[%c0_121, %c0_122] : memref<1x12xf32, #tpu.memory_space<vmem>>, vector<1x12xf32>
    %538 = vector.broadcast %537 : vector<1x12xf32> to vector<16x12xf32>
    %539 = arith.addf %536, %538 : vector<16x12xf32>
    %c0_123 = arith.constant 0 : index
    %c0_124 = arith.constant 0 : index
    %540 = vector.load %arg18[%c0_123, %c0_124] : memref<12x192xbf16, #tpu.memory_space<vmem>>, vector<12x192xbf16>
    %541 = arith.truncf %539 : vector<16x12xf32> to vector<16x12xbf16>
    %cst_125 = arith.constant dense<0.000000e+00> : vector<16x192xf32>
    %542 = tpu.matmul %541, %540, %cst_125 {dimension_numbers = #tpu.dot_dimension_numbers<[1], [0], [0], [1], [0, 0, 1, 1], [], []>} : vector<16x12xbf16>, vector<12x192xbf16>, vector<16x192xf32> -> vector<16x192xf32>
    %c0_126 = arith.constant 0 : index
    %c0_127 = arith.constant 0 : index
    %543 = vector.load %arg19[%c0_126, %c0_127] : memref<1x192xf32, #tpu.memory_space<vmem>>, vector<1x192xf32>
    %544 = vector.broadcast %543 : vector<1x192xf32> to vector<16x192xf32>
    %545 = arith.addf %542, %544 : vector<16x192xf32>
    %cst_128 = arith.constant 0.000000e+00 : f32
    %546 = vector.broadcast %cst_128 : f32 to vector<16x192xf32>
    %547 = arith.cmpf ogt, %545, %546 : vector<16x192xf32>
    %cst_129 = arith.constant 0.00999999977 : f32
    %548 = vector.broadcast %cst_129 : f32 to vector<16x192xf32>
    %549 = arith.mulf %548, %545 : vector<16x192xf32>
    %550 = arith.select %547, %545, %549 : vector<16x192xi1>, vector<16x192xf32>
    %c0_130 = arith.constant 0 : index
    %c0_131 = arith.constant 0 : index
    %551 = vector.load %arg20[%c0_130, %c0_131] : memref<192x96xbf16, #tpu.memory_space<vmem>>, vector<192x96xbf16>
    %552 = arith.truncf %550 : vector<16x192xf32> to vector<16x192xbf16>
    %cst_132 = arith.constant dense<0.000000e+00> : vector<16x96xf32>
    %553 = tpu.matmul %552, %551, %cst_132 {dimension_numbers = #tpu.dot_dimension_numbers<[1], [0], [0], [1], [0, 0, 1, 1], [], []>} : vector<16x192xbf16>, vector<192x96xbf16>, vector<16x96xf32> -> vector<16x96xf32>
    %c0_133 = arith.constant 0 : index
    %c0_134 = arith.constant 0 : index
    %554 = vector.load %arg21[%c0_133, %c0_134] : memref<1x96xf32, #tpu.memory_space<vmem>>, vector<1x96xf32>
    %555 = vector.broadcast %554 : vector<1x96xf32> to vector<16x96xf32>
    %556 = arith.addf %553, %555 : vector<16x96xf32>
    %cst_135 = arith.constant 0.000000e+00 : f32
    %557 = vector.broadcast %cst_135 : f32 to vector<16x96xf32>
    %558 = arith.cmpf ogt, %556, %557 : vector<16x96xf32>
    %cst_136 = arith.constant 0.00999999977 : f32
    %559 = vector.broadcast %cst_136 : f32 to vector<16x96xf32>
    %560 = arith.mulf %559, %556 : vector<16x96xf32>
    %561 = arith.select %558, %556, %560 : vector<16x96xi1>, vector<16x96xf32>
    %c0_137 = arith.constant 0 : index
    %c0_138 = arith.constant 0 : index
    %562 = vector.load %arg22[%c0_137, %c0_138] : memref<96x48xbf16, #tpu.memory_space<vmem>>, vector<96x48xbf16>
    %563 = arith.truncf %561 : vector<16x96xf32> to vector<16x96xbf16>
    %cst_139 = arith.constant dense<0.000000e+00> : vector<16x48xf32>
    %564 = tpu.matmul %563, %562, %cst_139 {dimension_numbers = #tpu.dot_dimension_numbers<[1], [0], [0], [1], [0, 0, 1, 1], [], []>} : vector<16x96xbf16>, vector<96x48xbf16>, vector<16x48xf32> -> vector<16x48xf32>
    %c0_140 = arith.constant 0 : index
    %c0_141 = arith.constant 0 : index
    %565 = vector.load %arg23[%c0_140, %c0_141] : memref<1x48xf32, #tpu.memory_space<vmem>>, vector<1x48xf32>
    %566 = vector.broadcast %565 : vector<1x48xf32> to vector<16x48xf32>
    %567 = arith.addf %564, %566 : vector<16x48xf32>
    %cst_142 = arith.constant 0.000000e+00 : f32
    %568 = vector.broadcast %cst_142 : f32 to vector<16x48xf32>
    %569 = arith.cmpf ogt, %567, %568 : vector<16x48xf32>
    %cst_143 = arith.constant 0.00999999977 : f32
    %570 = vector.broadcast %cst_143 : f32 to vector<16x48xf32>
    %571 = arith.mulf %570, %567 : vector<16x48xf32>
    %572 = arith.select %569, %567, %571 : vector<16x48xi1>, vector<16x48xf32>
    %c0_144 = arith.constant 0 : index
    %c0_145 = arith.constant 0 : index
    %573 = vector.load %arg24[%c0_144, %c0_145] : memref<48x18xbf16, #tpu.memory_space<vmem>>, vector<48x18xbf16>
    %574 = arith.truncf %572 : vector<16x48xf32> to vector<16x48xbf16>
    %cst_146 = arith.constant dense<0.000000e+00> : vector<16x18xf32>
    %575 = tpu.matmul %574, %573, %cst_146 {dimension_numbers = #tpu.dot_dimension_numbers<[1], [0], [0], [1], [0, 0, 1, 1], [], []>} : vector<16x48xbf16>, vector<48x18xbf16>, vector<16x18xf32> -> vector<16x18xf32>
    %c0_147 = arith.constant 0 : index
    %c0_148 = arith.constant 0 : index
    %576 = vector.load %arg25[%c0_147, %c0_148] : memref<1x18xf32, #tpu.memory_space<vmem>>, vector<1x18xf32>
    %577 = vector.broadcast %576 : vector<1x18xf32> to vector<16x18xf32>
    %578 = arith.addf %575, %577 : vector<16x18xf32>
    %c0_149 = arith.constant 0 : index
    %c0_150 = arith.constant 0 : index
    %579 = vector.load %arg27[%c0_149, %c0_150] : memref<16x18xf32, #tpu.memory_space<vmem>>, vector<16x18xf32>
    tpu.vector_store %arg27[%c0_149, %c0_150], %578 {strides = array<i32>} : memref<16x18xf32, #tpu.memory_space<vmem>>, vector<16x18xf32>,
    return
  }
  func.func @transform_0(%arg0: i32) -> (i32, i32) {
    %c0_i32 = arith.constant 0 : i32
    %c0_i32_0 = arith.constant 0 : i32
    %c0_i32_1 = arith.constant 0 : i32
    return %c0_i32, %c0_i32_0 : i32, i32
  }
  func.func @transform_1(%arg0: i32) -> (i32, i32) {
    %c0_i32 = arith.constant 0 : i32
    %c0_i32_0 = arith.constant 0 : i32
    %c0_i32_1 = arith.constant 0 : i32
    return %c0_i32, %c0_i32_0 : i32, i32
  }
  func.func @transform_2(%arg0: i32) -> (i32, i32) {
    %c0_i32 = arith.constant 0 : i32
    %c0_i32_0 = arith.constant 0 : i32
    %c0_i32_1 = arith.constant 0 : i32
    return %c0_i32, %c0_i32_0 : i32, i32
  }
  func.func @transform_3(%arg0: i32) -> (i32, i32) {
    %c0_i32 = arith.constant 0 : i32
    %c0_i32_0 = arith.constant 0 : i32
    %c0_i32_1 = arith.constant 0 : i32
    return %c0_i32, %c0_i32_0 : i32, i32
  }
  func.func @transform_4(%arg0: i32) -> (i32, i32) {
    %c0_i32 = arith.constant 0 : i32
    %c0_i32_0 = arith.constant 0 : i32
    %c0_i32_1 = arith.constant 0 : i32
    return %c0_i32, %c0_i32_0 : i32, i32
  }
  func.func @transform_5(%arg0: i32) -> (i32, i32) {
    %c0_i32 = arith.constant 0 : i32
    %c0_i32_0 = arith.constant 0 : i32
    %c0_i32_1 = arith.constant 0 : i32
    return %c0_i32, %c0_i32_0 : i32, i32
  }
  func.func @transform_6(%arg0: i32) -> (i32, i32) {
    %c0_i32 = arith.constant 0 : i32
    %c0_i32_0 = arith.constant 0 : i32
    %c0_i32_1 = arith.constant 0 : i32
    return %c0_i32, %c0_i32_0 : i32, i32
  }
  func.func @transform_7(%arg0: i32) -> (i32, i32) {
    %c0_i32 = arith.constant 0 : i32
    %c0_i32_0 = arith.constant 0 : i32
    %c0_i32_1 = arith.constant 0 : i32
    return %c0_i32, %c0_i32_0 : i32, i32
  }
  func.func @transform_8(%arg0: i32) -> (i32, i32) {
    %c0_i32 = arith.constant 0 : i32
    %c0_i32_0 = arith.constant 0 : i32
    %c0_i32_1 = arith.constant 0 : i32
    return %c0_i32, %c0_i32_0 : i32, i32
  }
  func.func @transform_9(%arg0: i32) -> (i32, i32) {
    %c0_i32 = arith.constant 0 : i32
    %c0_i32_0 = arith.constant 0 : i32
    %c0_i32_1 = arith.constant 0 : i32
    return %c0_i32, %c0_i32_0 : i32, i32
  }
  func.func @transform_10(%arg0: i32) -> (i32, i32) {
    %c0_i32 = arith.constant 0 : i32
    %c0_i32_0 = arith.constant 0 : i32
    %c0_i32_1 = arith.constant 0 : i32
    return %c0_i32, %c0_i32_0 : i32, i32
  }
  func.func @transform_11(%arg0: i32) -> (i32, i32) {
    %c0_i32 = arith.constant 0 : i32
    %c0_i32_0 = arith.constant 0 : i32
    %c0_i32_1 = arith.constant 0 : i32
    return %c0_i32, %c0_i32_0 : i32, i32
  }
  func.func @transform_12(%arg0: i32) -> (i32, i32) {
    %c0_i32 = arith.constant 0 : i32
    %c0_i32_0 = arith.constant 0 : i32
    %c0_i32_1 = arith.constant 0 : i32
    return %c0_i32, %c0_i32_0 : i32, i32
  }
  func.func @transform_13(%arg0: i32) -> (i32, i32) {
    %c0_i32 = arith.constant 0 : i32
    %c0_i32_0 = arith.constant 0 : i32
    %c0_i32_1 = arith.constant 0 : i32
    return %c0_i32, %c0_i32_0 : i32, i32
  }
  func.func @transform_14(%arg0: i32) -> (i32, i32) {
    %c0_i32 = arith.constant 0 : i32
    %c0_i32_0 = arith.constant 0 : i32
    %c0_i32_1 = arith.constant 0 : i32
    return %c0_i32, %c0_i32_0 : i32, i32
  }
  func.func @transform_15(%arg0: i32) -> (i32, i32) {
    %c0_i32 = arith.constant 0 : i32
    %c0_i32_0 = arith.constant 0 : i32
    %c0_i32_1 = arith.constant 0 : i32
    return %c0_i32, %c0_i32_0 : i32, i32
  }
  func.func @transform_16(%arg0: i32) -> (i32, i32) {
    %c0_i32 = arith.constant 0 : i32
    %c0_i32_0 = arith.constant 0 : i32
    %c0_i32_1 = arith.constant 0 : i32
    return %c0_i32, %c0_i32_0 : i32, i32
  }
  func.func @transform_17(%arg0: i32) -> (i32, i32) {
    %c0_i32 = arith.constant 0 : i32
    %c0_i32_0 = arith.constant 0 : i32
    %c0_i32_1 = arith.constant 0 : i32
    return %c0_i32, %c0_i32_0 : i32, i32
  }
  func.func @transform_18(%arg0: i32) -> (i32, i32) {
    %c0_i32 = arith.constant 0 : i32
    %c0_i32_0 = arith.constant 0 : i32
    %c0_i32_1 = arith.constant 0 : i32
    return %c0_i32, %c0_i32_0 : i32, i32
  }
  func.func @transform_19(%arg0: i32) -> (i32, i32) {
    %c0_i32 = arith.constant 0 : i32
    %c0_i32_0 = arith.constant 0 : i32
    %c0_i32_1 = arith.constant 0 : i32
    return %c0_i32, %c0_i32_0 : i32, i32
  }
  func.func @transform_20(%arg0: i32) -> (i32, i32) {
    %c0_i32 = arith.constant 0 : i32
    %c0_i32_0 = arith.constant 0 : i32
    %c0_i32_1 = arith.constant 0 : i32
    return %c0_i32, %c0_i32_0 : i32, i32
  }
  func.func @transform_21(%arg0: i32) -> (i32, i32) {
    %c0_i32 = arith.constant 0 : i32
    %c0_i32_0 = arith.constant 0 : i32
    %c0_i32_1 = arith.constant 0 : i32
    return %c0_i32, %c0_i32_0 : i32, i32
  }
  func.func @transform_22(%arg0: i32) -> (i32, i32) {
    %c0_i32 = arith.constant 0 : i32
    %c0_i32_0 = arith.constant 0 : i32
    %c0_i32_1 = arith.constant 0 : i32
    return %c0_i32, %c0_i32_0 : i32, i32
  }
  func.func @transform_23(%arg0: i32) -> (i32, i32) {
    %c0_i32 = arith.constant 0 : i32
    %c0_i32_0 = arith.constant 0 : i32
    %c0_i32_1 = arith.constant 0 : i32
    return %c0_i32, %c0_i32_0 : i32, i32
  }
  func.func @transform_24(%arg0: i32) -> (i32, i32) {
    %c0_i32 = arith.constant 0 : i32
    %c0_i32_0 = arith.constant 0 : i32
    %c0_i32_1 = arith.constant 0 : i32
    return %c0_i32, %c0_i32_0 : i32, i32
  }
  func.func @transform_25(%arg0: i32) -> (i32, i32) {
    %c0_i32 = arith.constant 0 : i32
    %c0_i32_0 = arith.constant 0 : i32
    %c0_i32_1 = arith.constant 0 : i32
    return %c0_i32, %c0_i32_0 : i32, i32
  }
  func.func @transform_26(%arg0: i32) -> (i32, i32) {
    %c0_i32 = arith.constant 0 : i32
    %c0_i32_0 = arith.constant 0 : i32
    %c0_i32_1 = arith.constant 0 : i32
    return %c0_i32, %c0_i32_0 : i32, i32
  }
}

</mosaic_0001>

<bundles_post_ra>
// kernel: rvae_forward.1
= control target key start
LH: loop header
LB: loop body
LE: loop exit
PB: predicated region body
PF: predicated region fallthrough
CT: control target
= control target key end

     0   :  { %vm106_vm0 = vcmask 1040384   ;;  %vm3191_vm1 = vcmask 146432   ;;  %vm159_vm4 = vcmask 392192   ;;  %vm262_vm7 = vcmask 785408   ;;  %s3157_s2 = inlined_call_operand.vmem [shape: bf16[18,48], index: 2, kind: input, shape index: {}]   ;;  %s3158_s3 = inlined_call_operand.vmem [shape: f32[1,48], index: 3, kind: input, shape index: {}]   ;;  %s3159_s0 = inlined_call_operand.vmem [shape: f32[16,18], index: 0, kind: input, shape index: {}]   ;;  %s3160_s5 = inlined_call_operand.vmem [shape: f32[1,96], index: 5, kind: input, shape index: {}]   ;;  %s3161_s4 = inlined_call_operand.vmem [shape: bf16[48,96], index: 4, kind: input, shape index: {}]   ;;  %s3162_s6 = inlined_call_operand.vmem [shape: bf16[96,192], index: 6, kind: input, shape index: {}]   ;;  %s3163_s8 = inlined_call_operand.vmem [shape: bf16[192,24], index: 8, kind: input, shape index: {}]   ;;  %s3164_s9 = inlined_call_operand.vmem [shape: f32[1,24], index: 9, kind: input, shape index: {}]   ;;  %s3165_s7 = inlined_call_operand.vmem [shape: f32[1,192], index: 7, kind: input, shape index: {}]   ;;  %s3166_s10 = inlined_call_operand.vmem [shape: bf16[12,80], index: 10, kind: input, shape index: {}]   ;;  %s3167_s25 = inlined_call_operand.vmem [shape: f32[16,24], index: 25, kind: output, shape index: {0}]   ;;  %s3168_s12 = inlined_call_operand.vmem [shape: bf16[20,80], index: 12, kind: input, shape index: {}]   ;;  %s3169_s11 = inlined_call_operand.vmem [shape: f32[1,80], index: 11, kind: input, shape index: {}]   ;;  %s3170_s1 = inlined_call_operand.vmem [shape: f32[16,12], index: 1, kind: input, shape index: {}]   ;;  %s3171_s13 = inlined_call_operand.vmem [shape: bf16[40,80], index: 13, kind: input, shape index: {}]   ;;  %s3172_s14 = inlined_call_operand.vmem [shape: f32[1,80], index: 14, kind: input, shape index: {}]   ;;  %s3173_s15 = inlined_call_operand.vmem [shape: bf16[20,12], index: 15, kind: input, shape index: {}]   ;;  %s3174_s16 = inlined_call_operand.vmem [shape: f32[1,12], index: 16, kind: input, shape index: {}]   ;;  %s3175_s17 = inlined_call_operand.vmem [shape: bf16[12,192], index: 17, kind: input, shape index: {}]   ;;  %s3176_s19 = inlined_call_operand.vmem [shape: bf16[192,96], index: 19, kind: input, shape index: {}]   ;;  %s3177_s20 = inlined_call_operand.vmem [shape: f32[1,96], index: 20, kind: input, shape index: {}]   ;;  %s3178_s21 = inlined_call_operand.vmem [shape: bf16[96,48], index: 21, kind: input, shape index: {}]   ;;  %s3179_s18 = inlined_call_operand.vmem [shape: f32[1,192], index: 18, kind: input, shape index: {}]   ;;  %s3180_s22 = inlined_call_operand.vmem [shape: f32[1,48], index: 22, kind: input, shape index: {}]   ;;  %s3181_s24 = inlined_call_operand.vmem [shape: f32[1,18], index: 24, kind: input, shape index: {}]   ;;  %s3182_s23 = inlined_call_operand.vmem [shape: bf16[48,18], index: 23, kind: input, shape index: {}]   ;;  %s3183_s26 = inlined_call_operand.vmem [shape: f32[16,18], index: 26, kind: output, shape index: {1}]  }
   0x1   :  { %3192 = sst [smem:[#allocation3_spill]] %s3157_s2  ;;  %vm408_vm12 = vcmask 523264   ;;  %vm479_vm13 = vcmask 1045504   ;;  %vm440_vm14 = vcmask 195584   ;;  %vm522_vm15 = vcmask 1041408  }
   0x2   :  { %3193 = sst [smem:[#allocation4_spill]] %s3158_s3 }
   0x3   :  { %3194 = sst [smem:[#allocation5_spill]] %s3159_s0 }
   0x4   :  { %3195 = sst [smem:[#allocation6_spill]] %s3160_s5 }
   0x5   :  { %3196 = sst [smem:[#allocation7_spill]] %s3161_s4 }
   0x6   :  { %3197 = sst [smem:[#allocation8_spill]] %s3162_s6 }
   0x7   :  { %3198 = sst [smem:[#allocation9_spill]] %s3163_s8 }
   0x8   :  { %3199 = sst [smem:[#allocation10_spill]] %s3164_s9 }
   0x9   :  { %3200 = sst [smem:[#allocation11_spill]] %s3165_s7 }
   0xa   :  { %3201 = sst [smem:[#allocation12_spill]] %s3166_s10 }
   0xb   :  { %3202 = sst [smem:[#allocation13_spill]] %s3167_s25 }
   0xc   :  { %s3203_s9 = sld [smem:[#allocation3_spill]] }
   0xd   :  { %s3204_s0 = sld [smem:[#allocation5_spill]] }
   0xe   :  { %s3205_s25 = sld [smem:[#allocation7_spill]] }
   0xf   :  { %s3206_s7 = sld [smem:[#allocation8_spill]] }
  0x10   :  { %s3208_s3 = sld [smem:[#allocation9_spill]] }
  0x11   :  { %s3209_s10 = sld [smem:[#allocation6_spill]] }
  0x12   :  { %v87_v0 = vld [vmem:[%s3203_s9 + $0x8] sm:$0x1]  ;;  %v2242_v4 = vld [vmem:[%s3203_s9] sm:$0xff]  ;;  %s3210_s8 = sld [smem:[#allocation11_spill]] }
  0x13   :  { %v98_v1 = vunpack.c.l.b16 %v87_v0  ;;  %v83_v5 = vld [vmem:[%s3204_s0] sm:$0xff]  ;;  %v84_v6 = vld [vmem:[%s3204_s0 + $0x8] sm:$0xff]  ;;  %s3207_s0 = sld [smem:[#allocation4_spill]] }
  0x14   :  { %v88_v7 = vpack.c.bf16 %v84_v6, %v83_v5  ;;  %v2245_v8 = vld [vmem:[%s3205_s25 + $0x10] sm:$0xff]  ;;  %v2244_v9 = vld [vmem:[%s3205_s25 + $0x8] sm:$0xff]  ;;  %v2243_v10 = vld [vmem:[%s3205_s25] sm:$0xff]  ;;  %s3211_s5 = sld [smem:[#allocation12_spill]]  ;;  %s2446_s25 = smov 116  }
  0x15   :  { %v100_v2 = vpack.c.b16 %v98_v1, %v98_v1  ;;  %168 = vmatpush.bf16.msra.mxu1 %v2245_v8  ;;  %v2035_v11 = vld [vmem:[%s3206_s7 + $0x50] sm:$0xf]  ;;  %v2257_v12 = vld [vmem:[%s3206_s7 + $0x54] sm:$0xf0]  ;;  %v2256_v13 = vld [vmem:[%s3206_s7 + $0x54] sm:$0xf] }
  0x16   :  { %v2036_v14 = vor.u32 %v2257_v12, %v2035_v11  ;;  %v2037_v15 = vld [vmem:[%s3206_s7 + $0x58] sm:$0xf0]  ;;  %v2027_v16 = vld [vmem:[%s3206_s7 + $0x40] sm:$0xf]  ;;  %v2255_v17 = vld [vmem:[%s3206_s7 + $0x44] sm:$0xf0] }
  0x17   :  { %v108_v3 = vsel %vm106_vm0, %v100_v2, 0  ;;  %v2040_v18 = vor.u32 %v2256_v13, %v2037_v15  ;;  %v2254_v19 = vld [vmem:[%s3206_s7 + $0x44] sm:$0xf]  ;;  %v2029_v20 = vld [vmem:[%s3206_s7 + $0x48] sm:$0xf0]  ;;  %v2028_v21 = vor.u32 %v2255_v17, %v2027_v16  ;;  %v2265_v57 = vld [vmem:[%s3208_s3 + $0x38] sm:$0xff] }
  0x18   :  { %116 = vmatpush.bf16.msra.mxu3 %v108_v3  ;;  %268 = vmatpush.bf16.msra.mxu2 %v2036_v14  ;;  %v2032_v22 = vor.u32 %v2254_v19, %v2029_v20  ;;  %v2019_v33 = vld [vmem:[%s3206_s7 + $0x30] sm:$0xf]  ;;  %v2253_v34 = vld [vmem:[%s3206_s7 + $0x34] sm:$0xf0]  ;;  %v2252_v35 = vld [vmem:[%s3206_s7 + $0x34] sm:$0xf] }
  0x19   :  { %169 = vmatpush.bf16.msra.mxu1 %v2244_v9  ;;  %v2304_v24 = vld [vmem:[%s3207_s0] ss:$0 sm:$0xff]  ;;  %v2020_v36 = vor.u32 %v2253_v34, %v2019_v33  ;;  %v2021_v37 = vld [vmem:[%s3206_s7 + $0x38] sm:$0xf0]  ;;  %v2251_v40 = vld [vmem:[%s3206_s7 + $0x24] sm:$0xf0]  ;;  %412 = vmatpush.bf16.msra.mxu0 %v2265_v57 }
  0x1a   :  { %v2024_v38 = vor.u32 %v2252_v35, %v2021_v37  ;;  %v2011_v39 = vld [vmem:[%s3206_s7 + $0x20] sm:$0xf]  ;;  %v2250_v41 = vld [vmem:[%s3206_s7 + $0x24] sm:$0xf]  ;;  %v2013_v43 = vld [vmem:[%s3206_s7 + $0x28] sm:$0xf0] }
  0x1b   :  { %v2012_v42 = vor.u32 %v2251_v40, %v2011_v39  ;;  %v2016_v44 = vor.u32 %v2250_v41, %v2013_v43  ;;  %v2003_v45 = vld [vmem:[%s3206_s7 + $0x10] sm:$0xf]  ;;  %v2249_v46 = vld [vmem:[%s3206_s7 + $0x14] sm:$0xf0]  ;;  %v2248_v47 = vld [vmem:[%s3206_s7 + $0x14] sm:$0xf] }
  0x1c   :  { %117 = vmatpush.bf16.msra.mxu3 %v2242_v4  ;;  %269 = vmatpush.bf16.msra.mxu2 %v2028_v21  ;;  %v2004_v48 = vor.u32 %v2249_v46, %v2003_v45  ;;  %v2005_v49 = vld [vmem:[%s3206_s7 + $0x18] sm:$0xf0]  ;;  %v1995_v51 = vld [vmem:[%s3206_s7] sm:$0xf]  ;;  %v2247_v52 = vld [vmem:[%s3206_s7 + $0x4] sm:$0xf0] }
  0x1d   :  { %170 = vmatpush.bf16.msra.mxu1 %v2243_v10  ;;  %v2008_v50 = vor.u32 %v2248_v47, %v2005_v49  ;;  %v2246_v53 = vld [vmem:[%s3206_s7 + $0x4] sm:$0xf]  ;;  %v1996_v54 = vor.u32 %v2247_v52, %v1995_v51  ;;  %v1997_v55 = vld [vmem:[%s3206_s7 + $0x8] sm:$0xf0]  ;;  %v2264_v58 = vld [vmem:[%s3208_s3 + $0x30] sm:$0xff]  ;;  %s3212_s29 = sld [smem:[#allocation10_spill]] }
  0x1e   :  { %v2000_v56 = vor.u32 %v2246_v53, %v1997_v55  ;;  %413 = vmatpush.bf16.msra.mxu0 %v2264_v58  ;;  %v2263_v59 = vld [vmem:[%s3208_s3 + $0x28] sm:$0xff]  ;;  %v2262_v60 = vld [vmem:[%s3208_s3 + $0x20] sm:$0xff]  ;;  %v2269_v8 = vld [vmem:[%s3208_s3 + $0x58] sm:$0xff]  ;;  %s3213_s30 = sld [smem:[#allocation13_spill]]  ;;  %vm475_vm0 = vcmask 97280   ;;  %s2450_s0 = smov 40  }
  0x1f   :  { %1979 = vmatmul.msk.bf16.vlgmr.msra.gmra.mxu3 %vm3191_vm1, %v88_v7  ;;  %v2305_v62 = vld [vmem:[%s3209_s10] ss:$0 sm:$0xff]  ;;  %v2261_v7 = vld [vmem:[%s3208_s3 + $0x18] sm:$0xff]  ;;  %v2260_v9 = vld [vmem:[%s3208_s3 + $0x10] sm:$0xff] }
  0x20   :  { %282 = vmatpush.bf16.msrb.mxu3 %v2040_v18  ;;  %270 = vmatpush.bf16.msra.mxu2 %v2020_v36  ;;  %v2268_v10 = vld [vmem:[%s3208_s3 + $0x50] sm:$0xff]  ;;  %v2259_v11 = vld [vmem:[%s3208_s3 + $0x8] sm:$0xff]  ;;  %v2258_v13 = vld [vmem:[%s3208_s3] sm:$0xff] }
  0x21   :  { %430 = vmatpush.bf16.msrb.mxu1 %v2269_v8  ;;  %v2267_v12 = vld [vmem:[%s3208_s3 + $0x48] sm:$0xff]  ;;  %v2266_v14 = vld [vmem:[%s3208_s3 + $0x40] sm:$0xff] }
  0x22   :  { %414 = vmatpush.bf16.msra.mxu0 %v2263_v59  ;;  %v196_v15 = vld [vmem:[%s3210_s8] sm:$0x3]  ;;  %v2270_v37 = vld [vmem:[%s3211_s5] sm:$0x30]  ;;  %v499_v55 = vld [vmem:[%s3168_s12 + $0x8] sm:$0x3] }
  0x23   :  { %v198_v18 = vperm.slane %v196_v15, 0  ;;  %v199_v19 = vperm.slane %v196_v15, 1  ;;  %v2094_v36 = vld [vmem:[%s3211_s5] sm:$0xf] }
  0x24   :  { %283 = vmatpush.bf16.msrb.mxu3 %v2032_v22  ;;  %271 = vmatpush.bf16.msra.mxu2 %v2012_v42  ;;  %v2306_v40 = vld [vmem:[%s3212_s29] ss:$0 sm:$0xff] }
  0x25   :  { %431 = vmatpush.bf16.msrb.mxu1 %v2268_v10  ;;  %v2757_v59 = vld [vmem:[%s3168_s12] sm:$0xff] }
  0x26   :  { %415 = vmatpush.bf16.msra.mxu0 %v2262_v60  ;;  %v2447_v60 = vmov 0   ;;  %v2777_v8 = vld [vmem:[%s3169_s11] ss:$0 sm:$0xff]  ;;  %s2449_s11 = smov 20  }
  0x28   :  { %284 = vmatpush.bf16.msrb.mxu3 %v2024_v38  ;;  %272 = vmatpush.bf16.msra.mxu2 %v2004_v48  ;;  %v2095_v38 = vor.u32 %v2270_v37, %v2094_v36  ;;  %v2797_v36 = vld [vmem:[%s3171_s13 + $0x8] sm:$0xff]  ;;  %v2804_v37 = vld [vmem:[%s3171_s13] sm:$0xff] }
  0x29   :  { %432 = vmatpush.bf16.msrb.mxu1 %v2267_v12 }
  0x2a   :  { %416 = vmatpush.bf16.msra.mxu0 %v2261_v7  ;;  %v481_v39 = vsel %vm479_vm13, %v2095_v38, 0 }
  0x2c   :  { %285 = vmatpush.bf16.msrb.mxu3 %v2016_v44  ;;  %273 = vmatpush.bf16.msra.mxu2 %v1996_v54 }
  0x2d   :  { %433 = vmatpush.bf16.msrb.mxu1 %v2266_v14 }
  0x2e   :  { %417 = vmatpush.bf16.msra.mxu0 %v2260_v9 }
  0x30   :  { %286 = vmatpush.bf16.msrb.mxu3 %v2008_v50  ;;  %490 = vmatpush.bf16.msrb.mxu2 %v481_v39 }
  0x32   :  { %418 = vmatpush.bf16.msra.mxu0 %v2259_v11 }
  0x34   :  { %287 = vmatpush.bf16.msrb.mxu3 %v2000_v56  ;;  %v514_v56 = vunpack.c.l.b16 %v499_v55 }
  0x36   :  { %419 = vmatpush.bf16.msra.mxu0 %v2258_v13  ;;  %v516_v57 = vpack.c.b16 %v514_v56, %v514_v56 }
  0x38   :  { %v2750_v58 = vsel %vm522_vm15, %v516_v57, 0 }
  0x39   :  { %532 = vmatpush.bf16.msra.mxu3 %v2750_v58 }
  0x3a   :  { %675 = vmatpush.bf16.msrb.mxu0 %v2750_v58 }
  0x3d   :  { %533 = vmatpush.bf16.msra.mxu3 %v2757_v59 }
  0x3e   :  { %676 = vmatpush.bf16.msrb.mxu0 %v2757_v59 }
  0xa2   :  { %v119_v23 = vpop.f32.mrf.mxu3 }
  0xa3   :  { %v120_v25 = vadd.f32 %v2304_v24, %v119_v23 }
  0xa5   :  { %v126_v27 = vmul.f32 0.01, %v120_v25  ;;  %vm124_vm2 = vcmp.gt.f32.partialorder %v120_v25, 0.0 }
  0xa7   :  { %v128_v30 = vsel %vm124_vm2, %v120_v25, %v126_v27 }
  0xaa   :  { %v121_v26 = vpop.f32.mrf.mxu3 }
  0xab   :  { %v122_v28 = vadd.f32 %v2304_v24, %v121_v26 }
  0xad   :  { %vm125_vm3 = vcmp.gt.f32.partialorder %v122_v28, 0.0  ;;  %v127_v29 = vmul.f32 0.01, %v122_v28 }
  0xaf   :  { %v129_v31 = vsel %vm125_vm3, %v122_v28, %v127_v29 }
  0xb0   :  { %v136_v32 = vpack.c.bf16 %v129_v31, %v128_v30 }
  0xb2   :  { %1992 = vmatmul.msk.bf16.vlgmr.msra.gmra.mxu1 %vm159_vm4, %v136_v32 }
 0x12f   :  { %v172_v61 = vpop.f32.mrf.mxu1 }
 0x130   :  { %v173_v63 = vadd.f32 %v2305_v62, %v172_v61 }
 0x132   :  { %v179_v1 = vmul.f32 0.01, %v173_v63  ;;  %vm177_vm5 = vcmp.gt.f32.partialorder %v173_v63, 0.0 }
 0x134   :  { %v181_v4 = vsel %vm177_vm5, %v173_v63, %v179_v1  ;;  %v444_v63 = vld [vmem:[%s3170_s1 + $0x8] sm:$0xff] }
 0x137   :  { %v174_v0 = vpop.f32.mrf.mxu1 }
 0x138   :  { %v175_v2 = vadd.f32 %v2305_v62, %v174_v0  ;;  %v443_v62 = vld [vmem:[%s3170_s1] sm:$0xff]  ;;  %s2448_s1 = smov 88  }
 0x13a   :  { %vm178_vm6 = vcmp.gt.f32.partialorder %v175_v2, 0.0  ;;  %v180_v3 = vmul.f32 0.01, %v175_v2 }
 0x13c   :  { %v182_v5 = vsel %vm178_vm6, %v175_v2, %v180_v3 }
 0x13d   :  { %v195_v6 = vpack.c.bf16 %v182_v5, %v181_v4 }
 0x13f   :  { %2041 = vmatmul.msk.bf16.vlgmr.msra.gmra.mxu2 %vm262_vm7, %v195_v6  ;;  %2042 = vmatmul.msk.bf16.vlgmr.msrb.gmra.mxu3 %vm262_vm7, %v195_v6 }
 0x140   :  { %810 = vmatpush.bf16.msrb.mxu3 %v2750_v58 }
 0x144   :  { %811 = vmatpush.bf16.msrb.mxu3 %v2757_v59 }
 0x14f   :  { %534 = vmatmul.bf16.vlgmr.msra.gmra.mxu3 %v2447_v60 }
 0x150   :  { %1080 = vmatpush.bf16.msra.mxu3 %v2750_v58 }
 0x154   :  { %1081 = vmatpush.bf16.msra.mxu3 %v2757_v59 }
 0x1c2   :  { %v275_v16 = vpop.f32.mrf.mxu2  ;;  %v289_v17 = vpop.f32.mrf.mxu3 }
 0x1c3   :  { %v276_v20 = vadd.f32 %v275_v16, %v198_v18  ;;  %v290_v21 = vadd.f32 %v289_v17, %v199_v19 }
 0x1c5   :  { %v298_v24 = vmul.f32 0.01, %v276_v20  ;;  %v299_v25 = vmul.f32 0.01, %v290_v21  ;;  %vm295_vm8 = vcmp.gt.f32.partialorder %v290_v21, 0.0  ;;  %vm294_vm9 = vcmp.gt.f32.partialorder %v276_v20, 0.0 }
 0x1c7   :  { %v303_v30 = vsel %vm295_vm8, %v290_v21, %v299_v25  ;;  %v302_v32 = vsel %vm294_vm9, %v276_v20, %v298_v24  ;;  %vm602_vm8 = vcmask 1043456   ;;  %vm518_vm9 = vcmask 162816  }
 0x1ca   :  { %v277_v22 = vpop.f32.mrf.mxu2  ;;  %v291_v23 = vpop.f32.mrf.mxu3 }
 0x1cb   :  { %v278_v26 = vadd.f32 %v277_v22, %v198_v18  ;;  %v292_v27 = vadd.f32 %v291_v23, %v199_v19 }
 0x1cd   :  { %v300_v28 = vmul.f32 0.01, %v278_v26  ;;  %vm297_vm10 = vcmp.gt.f32.partialorder %v292_v27, 0.0  ;;  %v301_v29 = vmul.f32 0.01, %v292_v27  ;;  %vm296_vm11 = vcmp.gt.f32.partialorder %v278_v26, 0.0 }
 0x1cf   :  { %v305_v31 = vsel %vm297_vm10, %v292_v27, %v301_v29  ;;  %v304_v33 = vsel %vm296_vm11, %v278_v26, %v300_v28  ;;  %vm598_vm10 = vcmask 326656  }
 0x1d0   :  { %v331_v34 = vpack.c.bf16 %v305_v31, %v303_v30  ;;  %v330_v35 = vpack.c.bf16 %v304_v33, %v302_v32  ;;  %v504_v32 = vld [vmem:[%s3171_s13 + $0x10] sm:$0xf]  ;;  %s2451_s13 = smov 68  }
 0x1d1   :  { %v592_v33 = vunpack.c.l.b16 %v504_v32 }
 0x1d2   :  { %420 = vmatmul.bf16.vlgmr.msra.gmra.mxu0 %v330_v35  ;;  %2091 = vmatmul.msk.bf16.vlgmr.msrb.gmra.mxu1 %vm408_vm12, %v331_v34  ;;  %v535_v6 = vpop.f32.mrf.mxu3 }
 0x1d3   :  { %945 = vmatpush.bf16.msra.mxu0 %v2750_v58  ;;  %v595_v34 = vpack.c.b16 %v592_v33, %v592_v33 }
 0x1d5   :  { %v2792_v35 = vsel %vm602_vm8, %v595_v34, 0 }
 0x1d6   :  { %611 = vmatpush.bf16.msra.mxu1 %v2792_v35  ;;  %746 = vmatpush.bf16.msra.mxu2 %v2792_v35 }
 0x1d7   :  { %946 = vmatpush.bf16.msra.mxu0 %v2757_v59 }
 0x1da   :  { %v537_v7 = vpop.f32.mrf.mxu3  ;;  %612 = vmatpush.bf16.msra.mxu1 %v2797_v36  ;;  %747 = vmatpush.bf16.msra.mxu2 %v2797_v36 }
 0x1de   :  { %613 = vmatpush.bf16.msra.mxu1 %v2804_v37  ;;  %748 = vmatpush.bf16.msra.mxu2 %v2804_v37 }
 0x1e2   :  { %881 = vmatpush.bf16.msrb.mxu1 %v2792_v35 }
 0x1e6   :  { %882 = vmatpush.bf16.msrb.mxu1 %v2797_v36 }
 0x1ea   :  { %883 = vmatpush.bf16.msrb.mxu1 %v2804_v37 }
 0x24f   :  { %v421_v41 = vpop.f32.mrf.mxu0  ;;  %v435_v42 = vpop.f32.mrf.mxu1 }
 0x250   :  { %v422_v43 = vadd.f32 %v2306_v40, %v421_v41 }
 0x252   :  { %v436_v44 = vadd.f32 %v435_v42, %v422_v43 }
 0x254   :  { %441 = vst.msk [vmem:[%s3213_s30] sm:$0xff] %vm440_vm14, %v436_v44  ;;  %v445_v45 = vmul.f32 0.5, %v436_v44 }
 0x256   :  { %v447_v46 = vmul.f32 1.442695, %v445_v45  ;;  %v2829_v45 = vld [vmem:[%s3172_s14] ss:$0 sm:$0xff] }
 0x257   :  { %v423_v47 = vpop.f32.mrf.mxu0  ;;  %v437_v49 = vpop.f32.mrf.mxu1 }
 0x258   :  { %2313 = vpow2.f32 %v447_v46  ;;  %v424_v48 = vadd.f32 %v2306_v40, %v423_v47 }
 0x25a   :  { %v438_v50 = vadd.f32 %v437_v49, %v424_v48 }
 0x25c   :  { %442 = vst.msk [vmem:[%s3213_s30 + $0x8] sm:$0xff] %vm440_vm14, %v438_v50  ;;  %v446_v51 = vmul.f32 0.5, %v438_v50 }
 0x25e   :  { %v2314_v52 = vpop.eup %2313  ;;  %v449_v53 = vmul.f32 1.442695, %v446_v51 }
 0x25f   :  { %453 = vrot.lane.b32.xlu0 %v2314_v52, %s2446_s25 }
 0x260   :  { %2315 = vpow2.f32 %v449_v53 }
 0x266   :  { %v2316_v54 = vpop.eup %2315 }
 0x267   :  { %455 = vrot.lane.b32.xlu0 %v2316_v54, %s2446_s25 }
 0x2d1   :  { %v454_v61 = vpop.permute.xlu0 %453 }
 0x2d2   :  { %v459_v0 = vmul.f32 %v454_v61, %v443_v62 }
 0x2d4   :  { %v461_v3 = vadd.f32 %v459_v0, %v436_v44 }
 0x2d9   :  { %v456_v1 = vpop.permute.xlu0 %455 }
 0x2da   :  { %v460_v2 = vmul.f32 %v456_v1, %v444_v63 }
 0x2dc   :  { %v462_v4 = vadd.f32 %v460_v2, %v438_v50 }
 0x2de   :  { %v465_v5 = vpack.c.bf16 %v462_v4, %v461_v3 }
 0x2e0   :  { %2096 = vmatmul.msk.bf16.vlgmr.msrb.gmra.mxu2 %vm475_vm0, %v465_v5 }
 0x2e1   :  { %1016 = vmatpush.bf16.msrb.mxu2 %v2792_v35 }
 0x2e5   :  { %1017 = vmatpush.bf16.msrb.mxu2 %v2797_v36 }
 0x2e9   :  { %1018 = vmatpush.bf16.msrb.mxu2 %v2804_v37 }
 0x363   :  { %v492_v9 = vpop.f32.mrf.mxu2 }
 0x364   :  { %v2780_v10 = vadd.f32 %v2777_v8, %v492_v9 }
 0x366   :  { %v539_v11 = vadd.f32 %v535_v6, %v2780_v10 }
 0x368   :  { %2317 = vtanh.f32 %v539_v11  ;;  %v2101_v13 = vmul.f32 -1.442695, %v539_v11 }
 0x36a   :  { %2319 = vpow2.f32 %v2101_v13 }
 0x36e   :  { %v2318_v12 = vpop.eup %2317 }
 0x36f   :  { %562 = vrot.lane.b32.xlu1 %v2318_v12, %s2448_s1 }
 0x370   :  { %v2320_v14 = vpop.eup %2319 }
 0x371   :  { %v543_v15 = vadd.f32 1.0, %v2320_v14 }
 0x373   :  { %2321 = vrcp.f32 %v543_v15  ;;  %v555_v21 = vand.u32 2147483648, %v543_v15  ;;  %vm549_vm3 = vweird.f32 %v543_v15  ;;  %v553_v22 = vand.u32 2147483647, %v543_v15 }
 0x375   :  { %v556_v24 = vor.u32 1.1754944e-38, %v555_v21  ;;  %vm554_vm6 = vcmp.eq.f32.partialorder %v553_v22, 8.507059e+37 }
 0x379   :  { %v2322_v16 = vpop.eup %2321 }
 0x37a   :  { %v545_v17 = vmul.f32 %v2322_v16, %v543_v15  ;;  %vm550_vm2 = vweird.f32 %v2322_v16 }
 0x37b   :  { %vm551_vm5 = vmor %vm549_vm3, %vm550_vm2 }
 0x37c   :  { %v546_v18 = vsub.f32 1.0, %v545_v17 }
 0x37e   :  { %v547_v19 = vmul.f32 %v2322_v16, %v546_v18 }
 0x380   :  { %v548_v20 = vadd.f32 %v2322_v16, %v547_v19 }
 0x382   :  { %v552_v23 = vsel %vm551_vm5, %v2322_v16, %v548_v20 }
 0x383   :  { %v557_v26 = vsel %vm554_vm6, %v556_v24, %v552_v23 }
 0x384   :  { %v560_v28 = vmul.f32 0.0, %v557_v26 }
 0x3e1   :  { %v563_v25 = vpop.permute.xlu1 %562 }
 0x3e2   :  { %v565_v27 = vmul.f32 %v563_v25, %v557_v26 }
 0x3e4   :  { %567 = vrot.lane.b32.xlu1 %v565_v27, %s2449_s11 }
 0x456   :  { %v568_v29 = vpop.permute.xlu1 %567 }
 0x457   :  { %v2785_v30 = vadd.f32 %v568_v29, %v560_v28 }
 0x459   :  { %2323 = vtanh.f32 %v2785_v30  ;;  %v707_v25 = vrot.slane %v2785_v30, 6 }
 0x45f   :  { %v2324_v31 = vpop.eup %2323 }
 0x460   :  { %573 = vrot.lane.b32.xlu2 %v2324_v31, %s2450_s0 }
 0x4ba   :  { %v574_v38 = vpop.permute.xlu2 %573 }
 0x4bb   :  { %v576_v39 = vmul.f32 %v574_v38, %v557_v26 }
 0x4bd   :  { %v662_v40 = vpack.c.bf16 %v576_v39, %v576_v39  ;;  %578 = vrot.lane.b32.xlu2 %v576_v39, %s2451_s13 }
 0x4bf   :  { %664 = vrot.lane.b32.xlu0 %v662_v40, %s2451_s13 }
 0x517   :  { %v579_v41 = vpop.permute.xlu2 %578 }
 0x518   :  { %v581_v42 = vsel %vm518_vm9, %v579_v41, 0.0 }
 0x519   :  { %v582_v43 = vpack.c.bf16 %v581_v42, %v581_v42 }
 0x51b   :  { %2110 = vmatmul.msk.bf16.vlgmr.msra.gmra.mxu1 %vm598_vm10, %v582_v43 }
 0x51c   :  { %1145 = vmatpush.bf16.msra.mxu1 %v2792_v35 }
 0x520   :  { %1146 = vmatpush.bf16.msra.mxu1 %v2797_v36 }
 0x524   :  { %1147 = vmatpush.bf16.msra.mxu1 %v2804_v37 }
 0x531   :  { %v665_v44 = vpop.permute.xlu0 %664 }
 0x532   :  { %2112 = vmatmul.msk.bf16.vlgmr.msrb.gmra.mxu0 %vm518_vm9, %v665_v44 }
 0x533   :  { %1208 = vmatpush.bf16.msrb.mxu0 %v2750_v58 }
 0x537   :  { %1209 = vmatpush.bf16.msrb.mxu0 %v2757_v59 }
 0x598   :  { %v615_v46 = vpop.f32.mrf.mxu1 }
 0x599   :  { %v616_v47 = vadd.f32 %v2829_v45, %v615_v46 }
 0x59b   :  { %2325 = vtanh.f32 %v616_v47  ;;  %v2111_v55 = vmul.f32 -1.442695, %v616_v47 }
 0x5a0   :  { %v617_v48 = vpop.f32.mrf.mxu1 }
 0x5a1   :  { %v2326_v49 = vpop.eup %2325 }
 0x5a2   :  { %641 = vrot.lane.b32.xlu1 %v2326_v49, %s2448_s1 }
 0x5af   :  { %v678_v50 = vpop.f32.mrf.mxu0 }
 0x5b0   :  { %v683_v51 = vrot.slane %v678_v50, 6 }
 0x5b2   :  { %v685_v52 = vadd.f32 %v683_v51, %v2780_v10  ;;  %v2860_v51 = vpop.f32.mrf.mxu2 }
 0x5b4   :  { %2327 = vtanh.f32 %v685_v52  ;;  %v2113_v56 = vmul.f32 -1.442695, %v685_v52 }
 0x5b5   :  { %2329 = vpow2.f32 %v2111_v55 }
 0x5b6   :  { %2331 = vpow2.f32 %v2113_v56 }
 0x5b7   :  { %v680_v53 = vpop.f32.mrf.mxu0 }
 0x5ba   :  { %v2328_v54 = vpop.eup %2327 }
 0x5bb   :  { %711 = vrot.lane.b32.xlu2 %v2328_v54, %s2448_s1  ;;  %v2330_v57 = vpop.eup %2329 }
 0x5bc   :  { %v2332_v60 = vpop.eup %2331  ;;  %v622_v61 = vadd.f32 1.0, %v2330_v57 }
 0x5bd   :  { %v689_v62 = vadd.f32 1.0, %v2332_v60 }
 0x5be   :  { %2333 = vrcp.f32 %v622_v61  ;;  %v634_v9 = vand.u32 2147483648, %v622_v61  ;;  %vm628_vm2 = vweird.f32 %v622_v61  ;;  %v632_v12 = vand.u32 2147483647, %v622_v61 }
 0x5bf   :  { %2335 = vrcp.f32 %v689_v62  ;;  %v701_v13 = vand.u32 2147483648, %v689_v62  ;;  %vm695_vm5 = vweird.f32 %v689_v62  ;;  %v699_v14 = vand.u32 2147483647, %v689_v62 }
 0x5c0   :  { %v635_v16 = vor.u32 1.1754944e-38, %v634_v9  ;;  %vm633_vm8 = vcmp.eq.f32.partialorder %v632_v12, 8.507059e+37 }
 0x5c1   :  { %v702_v18 = vor.u32 1.1754944e-38, %v701_v13  ;;  %vm700_vm1 = vcmp.eq.f32.partialorder %v699_v14, 8.507059e+37 }
 0x5c4   :  { %v2334_v63 = vpop.eup %2333 }
 0x5c5   :  { %v2336_v0 = vpop.eup %2335  ;;  %v624_v1 = vmul.f32 %v2334_v63, %v622_v61  ;;  %vm629_vm11 = vweird.f32 %v2334_v63 }
 0x5c6   :  { %v691_v2 = vmul.f32 %v2336_v0, %v689_v62  ;;  %vm696_vm14 = vweird.f32 %v2336_v0  ;;  %vm630_vm3 = vmor %vm628_vm2, %vm629_vm11 }
 0x5c7   :  { %v625_v3 = vsub.f32 1.0, %v624_v1  ;;  %vm697_vm6 = vmor %vm695_vm5, %vm696_vm14 }
 0x5c8   :  { %v692_v4 = vsub.f32 1.0, %v691_v2 }
 0x5c9   :  { %v626_v5 = vmul.f32 %v2334_v63, %v625_v3 }
 0x5ca   :  { %v693_v6 = vmul.f32 %v2336_v0, %v692_v4 }
 0x5cb   :  { %v627_v7 = vadd.f32 %v2334_v63, %v626_v5 }
 0x5cc   :  { %v694_v11 = vadd.f32 %v2336_v0, %v693_v6 }
 0x5cd   :  { %v631_v15 = vsel %vm630_vm3, %v2334_v63, %v627_v7 }
 0x5ce   :  { %v698_v17 = vsel %vm697_vm6, %v2336_v0, %v694_v11  ;;  %v636_v20 = vsel %vm633_vm8, %v635_v16, %v631_v15 }
 0x5cf   :  { %v703_v23 = vsel %vm700_vm1, %v702_v18, %v698_v17  ;;  %v639_v26 = vmul.f32 0.0, %v636_v20 }
 0x5d0   :  { %v709_v28 = vmul.f32 %v707_v25, %v703_v23 }
 0x614   :  { %v642_v19 = vpop.permute.xlu1 %641 }
 0x615   :  { %v644_v21 = vmul.f32 %v642_v19, %v636_v20  ;;  %v712_v22 = vpop.permute.xlu2 %711 }
 0x616   :  { %v714_v24 = vmul.f32 %v712_v22, %v703_v23 }
 0x617   :  { %646 = vrot.lane.b32.xlu0 %v644_v21, %s2449_s11 }
 0x618   :  { %716 = vrot.lane.b32.xlu1 %v714_v24, %s2449_s11 }
 0x689   :  { %v647_v27 = vpop.permute.xlu0 %646 }
 0x68a   :  { %v2838_v29 = vadd.f32 %v647_v27, %v639_v26  ;;  %v717_v31 = vpop.permute.xlu1 %716 }
 0x68b   :  { %v2840_v32 = vadd.f32 %v717_v31, %v709_v28 }
 0x68c   :  { %2337 = vtanh.f32 %v2838_v29 }
 0x68d   :  { %2339 = vtanh.f32 %v2840_v32 }
 0x692   :  { %v2338_v33 = vpop.eup %2337 }
 0x693   :  { %v2340_v34 = vpop.eup %2339  ;;  %652 = vrot.lane.b32.xlu2 %v2338_v33, %s2450_s0 }
 0x694   :  { %722 = vrot.lane.b32.xlu0 %v2340_v34, %s2450_s0  ;;  %v842_v34 = vrot.slane %v2840_v32, 6 }
 0x6ed   :  { %v653_v38 = vpop.permute.xlu2 %652 }
 0x6ee   :  { %v2846_v30 = vmul.f32 %v653_v38, %v636_v20 }
 0x6f0   :  { %v730_v39 = vrot.slane %v2846_v30, 6 }
 0x6f2   :  { %731 = vrot.lane.b32.xlu2 %v730_v39, %s2448_s1 }
 0x706   :  { %v723_v40 = vpop.permute.xlu0 %722 }
 0x707   :  { %v725_v41 = vmul.f32 %v723_v40, %v703_v23 }
 0x709   :  { %v796_v42 = vpack.c.bf16 %v725_v41, %v725_v41  ;;  %727 = vrot.lane.b32.xlu1 %v725_v41, %s2451_s13 }
 0x70b   :  { %v798_v43 = vrot.slane %v796_v42, 1 }
 0x70d   :  { %799 = vrot.lane.b32.xlu0 %v798_v43, %s2451_s13 }
 0x74c   :  { %v732_v44 = vpop.permute.xlu2 %731 }
 0x77b   :  { %v728_v46 = vpop.permute.xlu1 %727 }
 0x77c   :  { %v734_v47 = vsel %vm518_vm9, %v728_v46, %v732_v44 }
 0x77d   :  { %v735_v48 = vpack.c.bf16 %v734_v47, %v734_v47 }
 0x77f   :  { %v737_v49 = vrot.slane %v735_v48, 1  ;;  %v800_v50 = vpop.permute.xlu0 %799 }
 0x780   :  { %2116 = vmatmul.msk.bf16.vlgmr.msrb.gmra.mxu3 %vm518_vm9, %v800_v50 }
 0x781   :  { %2114 = vmatmul.msk.bf16.vlgmr.msra.gmra.mxu2 %vm598_vm10, %v737_v49  ;;  %1343 = vmatpush.bf16.msrb.mxu3 %v2750_v58 }
 0x782   :  { %1279 = vmatpush.bf16.msra.mxu2 %v2792_v35 }
 0x785   :  { %1344 = vmatpush.bf16.msrb.mxu3 %v2757_v59 }
 0x786   :  { %1280 = vmatpush.bf16.msra.mxu2 %v2797_v36 }
 0x78a   :  { %1281 = vmatpush.bf16.msra.mxu2 %v2804_v37 }
 0x803   :  { %v813_v52 = vpop.f32.mrf.mxu3 }
 0x804   :  { %v818_v53 = vrot.slane %v813_v52, 4  ;;  %v750_v54 = vpop.f32.mrf.mxu2 }
 0x805   :  { %v751_v55 = vadd.f32 %v2829_v45, %v750_v54 }
 0x806   :  { %v820_v56 = vadd.f32 %v818_v53, %v2780_v10 }
 0x807   :  { %2341 = vtanh.f32 %v751_v55  ;;  %v2115_v3 = vmul.f32 -1.442695, %v751_v55 }
 0x808   :  { %2343 = vtanh.f32 %v820_v56  ;;  %v2117_v63 = vmul.f32 -1.442695, %v820_v56 }
 0x80a   :  { %2345 = vpow2.f32 %v2117_v63 }
 0x80b   :  { %v815_v57 = vpop.f32.mrf.mxu3 }
 0x80c   :  { %v752_v60 = vpop.f32.mrf.mxu2 }
 0x80d   :  { %v2342_v61 = vpop.eup %2341 }
 0x80e   :  { %v2344_v62 = vpop.eup %2343  ;;  %776 = vrot.lane.b32.xlu1 %v2342_v61, %s2448_s1 }
 0x80f   :  { %846 = vrot.lane.b32.xlu2 %v2344_v62, %s2448_s1 }
 0x810   :  { %v2346_v0 = vpop.eup %2345 }
 0x811   :  { %v824_v1 = vadd.f32 1.0, %v2346_v0 }
 0x813   :  { %2347 = vrcp.f32 %v824_v1  ;;  %v836_v12 = vand.u32 2147483648, %v824_v1  ;;  %vm830_vm11 = vweird.f32 %v824_v1  ;;  %v834_v13 = vand.u32 2147483647, %v824_v1 }
 0x814   :  { %2349 = vpow2.f32 %v2115_v3 }
 0x815   :  { %v837_v15 = vor.u32 1.1754944e-38, %v836_v12  ;;  %vm835_vm2 = vcmp.eq.f32.partialorder %v834_v13, 8.507059e+37 }
 0x819   :  { %v2348_v2 = vpop.eup %2347 }
 0x81a   :  { %v826_v4 = vmul.f32 %v2348_v2, %v824_v1  ;;  %v2350_v6 = vpop.eup %2349  ;;  %vm831_vm1 = vweird.f32 %v2348_v2 }
 0x81b   :  { %v757_v9 = vadd.f32 1.0, %v2350_v6  ;;  %vm832_vm14 = vmor %vm830_vm11, %vm831_vm1 }
 0x81c   :  { %v827_v5 = vsub.f32 1.0, %v826_v4 }
 0x81d   :  { %2351 = vrcp.f32 %v757_v9  ;;  %v769_v24 = vand.u32 2147483648, %v757_v9  ;;  %vm763_vm5 = vweird.f32 %v757_v9  ;;  %v767_v25 = vand.u32 2147483647, %v757_v9 }
 0x81e   :  { %v828_v7 = vmul.f32 %v2348_v2, %v827_v5 }
 0x81f   :  { %v770_v27 = vor.u32 1.1754944e-38, %v769_v24  ;;  %vm768_vm8 = vcmp.eq.f32.partialorder %v767_v25, 8.507059e+37 }
 0x820   :  { %v829_v11 = vadd.f32 %v2348_v2, %v828_v7 }
 0x822   :  { %v833_v14 = vsel %vm832_vm14, %v2348_v2, %v829_v11 }
 0x823   :  { %v838_v17 = vsel %vm835_vm2, %v837_v15, %v833_v14  ;;  %v2352_v18 = vpop.eup %2351 }
 0x824   :  { %v759_v20 = vmul.f32 %v2352_v18, %v757_v9  ;;  %vm764_vm3 = vweird.f32 %v2352_v18  ;;  %v844_v38 = vmul.f32 %v842_v34, %v838_v17 }
 0x825   :  { %vm765_vm6 = vmor %vm763_vm5, %vm764_vm3 }
 0x826   :  { %v760_v21 = vsub.f32 1.0, %v759_v20 }
 0x828   :  { %v761_v22 = vmul.f32 %v2352_v18, %v760_v21 }
 0x82a   :  { %v762_v23 = vadd.f32 %v2352_v18, %v761_v22 }
 0x82c   :  { %v766_v26 = vsel %vm765_vm6, %v2352_v18, %v762_v23 }
 0x82d   :  { %v771_v31 = vsel %vm768_vm8, %v770_v27, %v766_v26 }
 0x82e   :  { %v774_v42 = vmul.f32 %v771_v31, %v2838_v29 }
 0x869   :  { %v847_v16 = vpop.permute.xlu2 %846 }
 0x86a   :  { %v849_v19 = vmul.f32 %v847_v16, %v838_v17 }
 0x86c   :  { %851 = vrot.lane.b32.xlu1 %v849_v19, %s2449_s11 }
 0x880   :  { %v777_v28 = vpop.permute.xlu1 %776 }
 0x881   :  { %v779_v33 = vmul.f32 %v777_v28, %v771_v31 }
 0x883   :  { %781 = vrot.lane.b32.xlu0 %v779_v33, %s2449_s11 }
 0x8de   :  { %v852_v39 = vpop.permute.xlu1 %851 }
 0x8df   :  { %v2869_v40 = vadd.f32 %v852_v39, %v844_v38 }
 0x8e1   :  { %2353 = vtanh.f32 %v2869_v40 }
 0x8e7   :  { %v2354_v41 = vpop.eup %2353 }
 0x8e8   :  { %857 = vrot.lane.b32.xlu0 %v2354_v41, %s2450_s0 }
 0x8f5   :  { %v782_v43 = vpop.permute.xlu0 %781 }
 0x8f6   :  { %v2874_v44 = vadd.f32 %v782_v43, %v774_v42  ;;  %v977_v42 = vrot.slane %v2869_v40, 6 }
 0x8f8   :  { %2355 = vtanh.f32 %v2874_v44 }
 0x8fe   :  { %v2356_v46 = vpop.eup %2355 }
 0x8ff   :  { %787 = vrot.lane.b32.xlu2 %v2356_v46, %s2450_s0 }
 0x959   :  { %v788_v32 = vpop.permute.xlu2 %787 }
 0x95a   :  { %v2878_v47 = vmul.f32 %v788_v32, %v771_v31  ;;  %v858_v48 = vpop.permute.xlu0 %857 }
 0x95b   :  { %v860_v49 = vmul.f32 %v858_v48, %v838_v17 }
 0x95c   :  { %v865_v50 = vrot.slane %v2878_v47, 4 }
 0x95d   :  { %v931_v52 = vpack.c.bf16 %v860_v49, %v860_v49  ;;  %862 = vrot.lane.b32.xlu1 %v860_v49, %s2451_s13 }
 0x95e   :  { %866 = vrot.lane.b32.xlu2 %v865_v50, %s2448_s1 }
 0x95f   :  { %v933_v29 = vrot.slane %v931_v52, 2 }
 0x961   :  { %934 = vrot.lane.b32.xlu0 %v933_v29, %s2451_s13 }
 0x9b8   :  { %v867_v53 = vpop.permute.xlu2 %866 }
 0x9cf   :  { %v863_v54 = vpop.permute.xlu1 %862 }
 0x9d0   :  { %v869_v55 = vsel %vm518_vm9, %v863_v54, %v867_v53 }
 0x9d1   :  { %v870_v56 = vpack.c.bf16 %v869_v55, %v869_v55 }
 0x9d3   :  { %v872_v57 = vrot.slane %v870_v56, 2  ;;  %v935_v60 = vpop.permute.xlu0 %934 }
 0x9d4   :  { %2120 = vmatmul.msk.bf16.vlgmr.msra.gmra.mxu0 %vm518_vm9, %v935_v60 }
 0x9d5   :  { %2118 = vmatmul.msk.bf16.vlgmr.msrb.gmra.mxu1 %vm598_vm10, %v872_v57  ;;  %1478 = vmatpush.bf16.msra.mxu0 %v2750_v58 }
 0x9d6   :  { %1414 = vmatpush.bf16.msrb.mxu1 %v2792_v35 }
 0x9d9   :  { %1479 = vmatpush.bf16.msra.mxu0 %v2757_v59 }
 0x9da   :  { %1415 = vmatpush.bf16.msrb.mxu1 %v2797_v36 }
 0x9de   :  { %1416 = vmatpush.bf16.msrb.mxu1 %v2804_v37 }
 0xa51   :  { %v948_v61 = vpop.f32.mrf.mxu0 }
 0xa52   :  { %v953_v62 = vrot.slane %v948_v61, 2  ;;  %v885_v63 = vpop.f32.mrf.mxu1 }
 0xa53   :  { %v886_v0 = vadd.f32 %v2829_v45, %v885_v63 }
 0xa54   :  { %v955_v1 = vadd.f32 %v953_v62, %v2780_v10 }
 0xa55   :  { %2357 = vtanh.f32 %v886_v0  ;;  %v2119_v9 = vmul.f32 -1.442695, %v886_v0 }
 0xa56   :  { %2359 = vtanh.f32 %v955_v1  ;;  %v2121_v59 = vmul.f32 -1.442695, %v955_v1 }
 0xa58   :  { %2361 = vpow2.f32 %v2121_v59 }
 0xa59   :  { %v950_v2 = vpop.f32.mrf.mxu0 }
 0xa5a   :  { %v887_v3 = vpop.f32.mrf.mxu1  ;;  %v2922_v2 = vadd.f32 %v2777_v8, %v2860_v51 }
 0xa5b   :  { %v2358_v58 = vpop.eup %2357 }
 0xa5c   :  { %v2360_v4 = vpop.eup %2359  ;;  %911 = vrot.lane.b32.xlu1 %v2358_v58, %s2448_s1 }
 0xa5d   :  { %981 = vrot.lane.b32.xlu2 %v2360_v4, %s2448_s1 }
 0xa5e   :  { %v2362_v5 = vpop.eup %2361 }
 0xa5f   :  { %v959_v6 = vadd.f32 1.0, %v2362_v5 }
 0xa61   :  { %2363 = vrcp.f32 %v959_v6  ;;  %v971_v16 = vand.u32 2147483648, %v959_v6  ;;  %vm965_vm11 = vweird.f32 %v959_v6  ;;  %v969_v17 = vand.u32 2147483647, %v959_v6 }
 0xa62   :  { %2365 = vpow2.f32 %v2119_v9 }
 0xa63   :  { %v972_v19 = vor.u32 1.1754944e-38, %v971_v16  ;;  %vm970_vm2 = vcmp.eq.f32.partialorder %v969_v17, 8.507059e+37 }
 0xa67   :  { %v2364_v7 = vpop.eup %2363 }
 0xa68   :  { %v961_v11 = vmul.f32 %v2364_v7, %v959_v6  ;;  %v2366_v12 = vpop.eup %2365  ;;  %vm966_vm1 = vweird.f32 %v2364_v7 }
 0xa69   :  { %v892_v14 = vadd.f32 1.0, %v2366_v12  ;;  %vm967_vm14 = vmor %vm965_vm11, %vm966_vm1 }
 0xa6a   :  { %v962_v10 = vsub.f32 1.0, %v961_v11 }
 0xa6b   :  { %2367 = vrcp.f32 %v892_v14  ;;  %v904_v28 = vand.u32 2147483648, %v892_v14  ;;  %vm898_vm5 = vweird.f32 %v892_v14  ;;  %v902_v31 = vand.u32 2147483647, %v892_v14 }
 0xa6c   :  { %v963_v13 = vmul.f32 %v2364_v7, %v962_v10 }
 0xa6d   :  { %v905_v34 = vor.u32 1.1754944e-38, %v904_v28  ;;  %vm903_vm8 = vcmp.eq.f32.partialorder %v902_v31, 8.507059e+37 }
 0xa6e   :  { %v964_v15 = vadd.f32 %v2364_v7, %v963_v13 }
 0xa70   :  { %v968_v18 = vsel %vm967_vm14, %v2364_v7, %v964_v15 }
 0xa71   :  { %v973_v21 = vsel %vm970_vm2, %v972_v19, %v968_v18  ;;  %v2368_v22 = vpop.eup %2367 }
 0xa72   :  { %v894_v24 = vmul.f32 %v2368_v22, %v892_v14  ;;  %vm899_vm3 = vweird.f32 %v2368_v22  ;;  %v979_v43 = vmul.f32 %v977_v42, %v973_v21 }
 0xa73   :  { %vm900_vm6 = vmor %vm898_vm5, %vm899_vm3 }
 0xa74   :  { %v895_v25 = vsub.f32 1.0, %v894_v24 }
 0xa76   :  { %v896_v26 = vmul.f32 %v2368_v22, %v895_v25 }
 0xa78   :  { %v897_v27 = vadd.f32 %v2368_v22, %v896_v26 }
 0xa7a   :  { %v901_v33 = vsel %vm900_vm6, %v2368_v22, %v897_v27 }
 0xa7b   :  { %v906_v39 = vsel %vm903_vm8, %v905_v34, %v901_v33 }
 0xa7c   :  { %v909_v49 = vmul.f32 %v906_v39, %v2874_v44 }
 0xab7   :  { %v982_v20 = vpop.permute.xlu2 %981 }
 0xab8   :  { %v984_v23 = vmul.f32 %v982_v20, %v973_v21 }
 0xaba   :  { %986 = vrot.lane.b32.xlu1 %v984_v23, %s2449_s11 }
 0xace   :  { %v912_v38 = vpop.permute.xlu1 %911 }
 0xacf   :  { %v914_v41 = vmul.f32 %v912_v38, %v906_v39 }
 0xad1   :  { %916 = vrot.lane.b32.xlu0 %v914_v41, %s2449_s11 }
 0xb2c   :  { %v987_v46 = vpop.permute.xlu1 %986 }
 0xb2d   :  { %v2899_v32 = vadd.f32 %v987_v46, %v979_v43 }
 0xb2f   :  { %2369 = vtanh.f32 %v2899_v32  ;;  %v1109_v42 = vrot.slane %v2899_v32, 6 }
 0xb35   :  { %v2370_v48 = vpop.eup %2369 }
 0xb36   :  { %992 = vrot.lane.b32.xlu0 %v2370_v48, %s2450_s0 }
 0xb43   :  { %v917_v50 = vpop.permute.xlu0 %916 }
 0xb44   :  { %v2904_v52 = vadd.f32 %v917_v50, %v909_v49 }
 0xb46   :  { %2371 = vtanh.f32 %v2904_v52 }
 0xb4c   :  { %v2372_v29 = vpop.eup %2371 }
 0xb4d   :  { %922 = vrot.lane.b32.xlu2 %v2372_v29, %s2450_s0 }
 0xba7   :  { %v923_v40 = vpop.permute.xlu2 %922 }
 0xba8   :  { %v2908_v53 = vmul.f32 %v923_v40, %v906_v39  ;;  %v993_v54 = vpop.permute.xlu0 %992 }
 0xba9   :  { %v995_v55 = vmul.f32 %v993_v54, %v973_v21 }
 0xbaa   :  { %v1000_v56 = vrot.slane %v2908_v53, 2 }
 0xbab   :  { %v1066_v57 = vpack.c.bf16 %v995_v55, %v995_v55  ;;  %997 = vrot.lane.b32.xlu1 %v995_v55, %s2451_s13 }
 0xbac   :  { %1001 = vrot.lane.b32.xlu2 %v1000_v56, %s2448_s1 }
 0xbad   :  { %v1068_v44 = vrot.slane %v1066_v57, 3 }
 0xbaf   :  { %1069 = vrot.lane.b32.xlu0 %v1068_v44, %s2451_s13 }
 0xc06   :  { %v1002_v60 = vpop.permute.xlu2 %1001 }
 0xc1d   :  { %v998_v61 = vpop.permute.xlu1 %997 }
 0xc1e   :  { %v1004_v62 = vsel %vm518_vm9, %v998_v61, %v1002_v60 }
 0xc1f   :  { %v1005_v63 = vpack.c.bf16 %v1004_v62, %v1004_v62 }
 0xc21   :  { %v1007_v0 = vrot.slane %v1005_v63, 3  ;;  %v1070_v1 = vpop.permute.xlu0 %1069 }
 0xc22   :  { %2124 = vmatmul.msk.bf16.vlgmr.msra.gmra.mxu3 %vm518_vm9, %v1070_v1 }
 0xc23   :  { %2122 = vmatmul.msk.bf16.vlgmr.msrb.gmra.mxu2 %vm598_vm10, %v1007_v0 }
 0xc24   :  { %1549 = vmatpush.bf16.msrb.mxu2 %v2792_v35 }
 0xc28   :  { %1550 = vmatpush.bf16.msrb.mxu2 %v2797_v36 }
 0xc2c   :  { %1551 = vmatpush.bf16.msrb.mxu2 %v2804_v37 }
 0xca5   :  { %v1083_v3 = vpop.f32.mrf.mxu3 }
 0xca6   :  { %v1087_v58 = vadd.f32 %v1083_v3, %v2922_v2  ;;  %v1020_v4 = vpop.f32.mrf.mxu2 }
 0xca7   :  { %v1021_v59 = vadd.f32 %v2829_v45, %v1020_v4 }
 0xca8   :  { %2373 = vtanh.f32 %v1087_v58  ;;  %v2125_v36 = vmul.f32 -1.442695, %v1087_v58 }
 0xca9   :  { %2375 = vtanh.f32 %v1021_v59  ;;  %v2123_v9 = vmul.f32 -1.442695, %v1021_v59 }
 0xcaa   :  { %2377 = vpow2.f32 %v2125_v36 }
 0xcad   :  { %v1085_v5 = vpop.f32.mrf.mxu3 }
 0xcae   :  { %v2374_v6 = vpop.eup %2373  ;;  %v1022_v7 = vpop.f32.mrf.mxu2 }
 0xcaf   :  { %v2376_v35 = vpop.eup %2375  ;;  %1113 = vrot.lane.b32.xlu2 %v2374_v6, %s2448_s1 }
 0xcb0   :  { %1046 = vrot.lane.b32.xlu1 %v2376_v35, %s2448_s1  ;;  %v2378_v8 = vpop.eup %2377 }
 0xcb1   :  { %v1091_v37 = vadd.f32 1.0, %v2378_v8 }
 0xcb3   :  { %2379 = vrcp.f32 %v1091_v37  ;;  %v1103_v16 = vand.u32 2147483648, %v1091_v37  ;;  %vm1097_vm11 = vweird.f32 %v1091_v37  ;;  %v1101_v17 = vand.u32 2147483647, %v1091_v37 }
 0xcb4   :  { %2381 = vpow2.f32 %v2123_v9 }
 0xcb5   :  { %v1104_v19 = vor.u32 1.1754944e-38, %v1103_v16  ;;  %vm1102_vm2 = vcmp.eq.f32.partialorder %v1101_v17, 8.507059e+37 }
 0xcb9   :  { %v2380_v51 = vpop.eup %2379 }
 0xcba   :  { %v1093_v11 = vmul.f32 %v2380_v51, %v1091_v37  ;;  %v2382_v13 = vpop.eup %2381  ;;  %vm1098_vm1 = vweird.f32 %v2380_v51 }
 0xcbb   :  { %v1027_v14 = vadd.f32 1.0, %v2382_v13  ;;  %vm1099_vm14 = vmor %vm1097_vm11, %vm1098_vm1 }
 0xcbc   :  { %v1094_v10 = vsub.f32 1.0, %v1093_v11 }
 0xcbd   :  { %2383 = vrcp.f32 %v1027_v14  ;;  %v1039_v28 = vand.u32 2147483648, %v1027_v14  ;;  %vm1033_vm5 = vweird.f32 %v1027_v14  ;;  %v1037_v31 = vand.u32 2147483647, %v1027_v14 }
 0xcbe   :  { %v1095_v12 = vmul.f32 %v2380_v51, %v1094_v10 }
 0xcbf   :  { %v1040_v34 = vor.u32 1.1754944e-38, %v1039_v28  ;;  %vm1038_vm8 = vcmp.eq.f32.partialorder %v1037_v31, 8.507059e+37 }
 0xcc0   :  { %v1096_v15 = vadd.f32 %v2380_v51, %v1095_v12 }
 0xcc2   :  { %v1100_v18 = vsel %vm1099_vm14, %v2380_v51, %v1096_v15 }
 0xcc3   :  { %v1105_v21 = vsel %vm1102_vm2, %v1104_v19, %v1100_v18  ;;  %v2384_v23 = vpop.eup %2383 }
 0xcc4   :  { %v1029_v24 = vmul.f32 %v2384_v23, %v1027_v14  ;;  %vm1034_vm3 = vweird.f32 %v2384_v23  ;;  %v1111_v43 = vmul.f32 %v1109_v42, %v1105_v21 }
 0xcc5   :  { %vm1035_vm6 = vmor %vm1033_vm5, %vm1034_vm3 }
 0xcc6   :  { %v1030_v25 = vsub.f32 1.0, %v1029_v24 }
 0xcc8   :  { %v1031_v26 = vmul.f32 %v2384_v23, %v1030_v25 }
 0xcca   :  { %v1032_v27 = vadd.f32 %v2384_v23, %v1031_v26 }
 0xccc   :  { %v1036_v33 = vsel %vm1035_vm6, %v2384_v23, %v1032_v27 }
 0xccd   :  { %v1041_v39 = vsel %vm1038_vm8, %v1040_v34, %v1036_v33 }
 0xcce   :  { %v1044_v50 = vmul.f32 %v1041_v39, %v2904_v52 }
 0xd09   :  { %v1114_v20 = vpop.permute.xlu2 %1113 }
 0xd0a   :  { %v1116_v22 = vmul.f32 %v1114_v20, %v1105_v21 }
 0xd0c   :  { %1118 = vrot.lane.b32.xlu1 %v1116_v22, %s2449_s11 }
 0xd22   :  { %v1047_v38 = vpop.permute.xlu1 %1046 }
 0xd23   :  { %v1049_v41 = vmul.f32 %v1047_v38, %v1041_v39 }
 0xd25   :  { %1051 = vrot.lane.b32.xlu0 %v1049_v41, %s2449_s11 }
 0xd7e   :  { %v1119_v46 = vpop.permute.xlu1 %1118 }
 0xd7f   :  { %v2931_v48 = vadd.f32 %v1119_v46, %v1111_v43 }
 0xd81   :  { %2385 = vtanh.f32 %v2931_v48  ;;  %v1240_v41 = vrot.slane %v2931_v48, 6 }
 0xd87   :  { %v2386_v49 = vpop.eup %2385 }
 0xd88   :  { %1124 = vrot.lane.b32.xlu0 %v2386_v49, %s2450_s0 }
 0xd97   :  { %v1052_v29 = vpop.permute.xlu0 %1051 }
 0xd98   :  { %v2936_v40 = vadd.f32 %v1052_v29, %v1044_v50 }
 0xd9a   :  { %2387 = vtanh.f32 %v2936_v40 }
 0xda0   :  { %v2388_v54 = vpop.eup %2387 }
 0xda1   :  { %1057 = vrot.lane.b32.xlu2 %v2388_v54, %s2450_s0 }
 0xdfa   :  { %v1125_v32 = vpop.permute.xlu0 %1124 }
 0xdfb   :  { %v1127_v55 = vmul.f32 %v1125_v32, %v1105_v21  ;;  %v1058_v56 = vpop.permute.xlu2 %1057 }
 0xdfc   :  { %v2940_v57 = vmul.f32 %v1058_v56, %v1041_v39 }
 0xdfd   :  { %v1195_v44 = vpack.c.bf16 %v1127_v55, %v1127_v55  ;;  %1129 = vrot.lane.b32.xlu1 %v1127_v55, %s2451_s13 }
 0xdfe   :  { %1132 = vrot.lane.b32.xlu2 %v2940_v57, %s2448_s1 }
 0xdff   :  { %1197 = vrot.lane.b32.xlu0 %v1195_v44, %s2451_s13 }
 0xe58   :  { %v1133_v52 = vpop.permute.xlu2 %1132 }
 0xe6f   :  { %v1130_v60 = vpop.permute.xlu1 %1129 }
 0xe70   :  { %v1135_v61 = vsel %vm518_vm9, %v1130_v60, %v1133_v52 }
 0xe71   :  { %v1136_v62 = vpack.c.bf16 %v1135_v61, %v1135_v61  ;;  %v1198_v63 = vpop.permute.xlu0 %1197 }
 0xe72   :  { %2128 = vmatmul.msk.bf16.vlgmr.msrb.gmra.mxu0 %vm518_vm9, %v1198_v63 }
 0xe73   :  { %2126 = vmatmul.msk.bf16.vlgmr.msra.gmra.mxu1 %vm598_vm10, %v1136_v62 }
 0xeef   :  { %v1211_v0 = vpop.f32.mrf.mxu0 }
 0xef0   :  { %v1216_v1 = vrot.slane %v1211_v0, 6  ;;  %v1149_v3 = vpop.f32.mrf.mxu1 }
 0xef1   :  { %v1150_v58 = vadd.f32 %v2829_v45, %v1149_v3 }
 0xef2   :  { %v1218_v4 = vadd.f32 %v1216_v1, %v2922_v2 }
 0xef3   :  { %2389 = vtanh.f32 %v1150_v58  ;;  %v2127_v51 = vmul.f32 -1.442695, %v1150_v58 }
 0xef4   :  { %2391 = vtanh.f32 %v1218_v4  ;;  %v2129_v35 = vmul.f32 -1.442695, %v1218_v4 }
 0xef6   :  { %2393 = vpow2.f32 %v2129_v35 }
 0xef7   :  { %v1213_v59 = vpop.f32.mrf.mxu0 }
 0xef8   :  { %v1151_v5 = vpop.f32.mrf.mxu1 }
 0xef9   :  { %v2390_v6 = vpop.eup %2389 }
 0xefa   :  { %v2392_v7 = vpop.eup %2391  ;;  %1175 = vrot.lane.b32.xlu1 %v2390_v6, %s2448_s1 }
 0xefb   :  { %1244 = vrot.lane.b32.xlu2 %v2392_v7, %s2448_s1 }
 0xefc   :  { %v2394_v36 = vpop.eup %2393 }
 0xefd   :  { %v1222_v8 = vadd.f32 1.0, %v2394_v36 }
 0xeff   :  { %2395 = vrcp.f32 %v1222_v8  ;;  %v1234_v15 = vand.u32 2147483648, %v1222_v8  ;;  %vm1228_vm11 = vweird.f32 %v1222_v8  ;;  %v1232_v16 = vand.u32 2147483647, %v1222_v8 }
 0xf00   :  { %2397 = vpow2.f32 %v2127_v51 }
 0xf01   :  { %v1235_v18 = vor.u32 1.1754944e-38, %v1234_v15  ;;  %vm1233_vm2 = vcmp.eq.f32.partialorder %v1232_v16, 8.507059e+37 }
 0xf05   :  { %v2396_v37 = vpop.eup %2395 }
 0xf06   :  { %v1224_v9 = vmul.f32 %v2396_v37, %v1222_v8  ;;  %v2398_v10 = vpop.eup %2397  ;;  %vm1229_vm1 = vweird.f32 %v2396_v37 }
 0xf07   :  { %v1156_v13 = vadd.f32 1.0, %v2398_v10  ;;  %vm1230_vm14 = vmor %vm1228_vm11, %vm1229_vm1 }
 0xf08   :  { %v1225_v11 = vsub.f32 1.0, %v1224_v9 }
 0xf09   :  { %2399 = vrcp.f32 %v1156_v13  ;;  %v1168_v27 = vand.u32 2147483648, %v1156_v13  ;;  %vm1162_vm5 = vweird.f32 %v1156_v13  ;;  %v1166_v28 = vand.u32 2147483647, %v1156_v13 }
 0xf0a   :  { %v1226_v12 = vmul.f32 %v2396_v37, %v1225_v11 }
 0xf0b   :  { %v1169_v33 = vor.u32 1.1754944e-38, %v1168_v27  ;;  %vm1167_vm8 = vcmp.eq.f32.partialorder %v1166_v28, 8.507059e+37 }
 0xf0c   :  { %v1227_v14 = vadd.f32 %v2396_v37, %v1226_v12 }
 0xf0e   :  { %v1231_v17 = vsel %vm1230_vm14, %v2396_v37, %v1227_v14 }
 0xf0f   :  { %v1236_v20 = vsel %vm1233_vm2, %v1235_v18, %v1231_v17  ;;  %v2400_v21 = vpop.eup %2399 }
 0xf10   :  { %v1158_v23 = vmul.f32 %v2400_v21, %v1156_v13  ;;  %vm1163_vm3 = vweird.f32 %v2400_v21  ;;  %v1242_v42 = vmul.f32 %v1240_v41, %v1236_v20 }
 0xf11   :  { %vm1164_vm6 = vmor %vm1162_vm5, %vm1163_vm3 }
 0xf12   :  { %v1159_v24 = vsub.f32 1.0, %v1158_v23 }
 0xf14   :  { %v1160_v25 = vmul.f32 %v2400_v21, %v1159_v24 }
 0xf16   :  { %v1161_v26 = vadd.f32 %v2400_v21, %v1160_v25 }
 0xf18   :  { %v1165_v31 = vsel %vm1164_vm6, %v2400_v21, %v1161_v26 }
 0xf19   :  { %v1170_v38 = vsel %vm1167_vm8, %v1169_v33, %v1165_v31 }
 0xf1a   :  { %v1173_v50 = vmul.f32 %v1170_v38, %v2936_v40 }
 0xf55   :  { %v1245_v19 = vpop.permute.xlu2 %1244 }
 0xf56   :  { %v1247_v22 = vmul.f32 %v1245_v19, %v1236_v20 }
 0xf58   :  { %1249 = vrot.lane.b32.xlu1 %v1247_v22, %s2449_s11 }
 0xf6c   :  { %v1176_v34 = vpop.permute.xlu1 %1175 }
 0xf6d   :  { %v1178_v39 = vmul.f32 %v1176_v34, %v1170_v38 }
 0xf6f   :  { %1180 = vrot.lane.b32.xlu0 %v1178_v39, %s2449_s11 }
 0xfca   :  { %v1250_v43 = vpop.permute.xlu1 %1249 }
 0xfcb   :  { %v2956_v46 = vadd.f32 %v1250_v43, %v1242_v42 }
 0xfcd   :  { %2401 = vtanh.f32 %v2956_v46  ;;  %v1375_v43 = vrot.slane %v2956_v46, 6 }
 0xfd3   :  { %v2402_v49 = vpop.eup %2401 }
 0xfd4   :  { %1255 = vrot.lane.b32.xlu0 %v2402_v49, %s2450_s0 }
 0xfe1   :  { %v1181_v29 = vpop.permute.xlu0 %1180 }
 0xfe2   :  { %v2961_v54 = vadd.f32 %v1181_v29, %v1173_v50 }
 0xfe4   :  { %2403 = vtanh.f32 %v2961_v54 }
 0xfea   :  { %v2404_v32 = vpop.eup %2403 }
 0xfeb   :  { %1186 = vrot.lane.b32.xlu2 %v2404_v32, %s2450_s0 }
0x1045   :  { %v1187_v48 = vpop.permute.xlu2 %1186 }
0x1046   :  { %v2965_v55 = vmul.f32 %v1187_v48, %v1170_v38  ;;  %v1256_v56 = vpop.permute.xlu0 %1255 }
0x1047   :  { %v1258_v44 = vmul.f32 %v1256_v56, %v1236_v20 }
0x1048   :  { %v1263_v52 = vrot.slane %v2965_v55, 6 }
0x1049   :  { %v1329_v60 = vpack.c.bf16 %v1258_v44, %v1258_v44  ;;  %1260 = vrot.lane.b32.xlu1 %v1258_v44, %s2451_s13 }
0x104a   :  { %1264 = vrot.lane.b32.xlu2 %v1263_v52, %s2448_s1 }
0x104b   :  { %v1331_v40 = vrot.slane %v1329_v60, 1 }
0x104d   :  { %1332 = vrot.lane.b32.xlu0 %v1331_v40, %s2451_s13 }
0x10a4   :  { %v1265_v61 = vpop.permute.xlu2 %1264 }
0x10bb   :  { %v1261_v62 = vpop.permute.xlu1 %1260 }
0x10bc   :  { %v1267_v63 = vsel %vm518_vm9, %v1261_v62, %v1265_v61 }
0x10bd   :  { %v1268_v0 = vpack.c.bf16 %v1267_v63, %v1267_v63 }
0x10bf   :  { %v1270_v1 = vrot.slane %v1268_v0, 1  ;;  %v1333_v3 = vpop.permute.xlu0 %1332 }
0x10c0   :  { %2132 = vmatmul.msk.bf16.vlgmr.msrb.gmra.mxu3 %vm518_vm9, %v1333_v3 }
0x10c1   :  { %2130 = vmatmul.msk.bf16.vlgmr.msra.gmra.mxu2 %vm598_vm10, %v1270_v1 }
0x1143   :  { %v1346_v58 = vpop.f32.mrf.mxu3 }
0x1144   :  { %v1351_v4 = vrot.slane %v1346_v58, 4  ;;  %v1283_v59 = vpop.f32.mrf.mxu2 }
0x1145   :  { %v1284_v5 = vadd.f32 %v2829_v45, %v1283_v59 }
0x1146   :  { %v1353_v6 = vadd.f32 %v1351_v4, %v2922_v2 }
0x1147   :  { %2405 = vtanh.f32 %v1284_v5  ;;  %v2131_v10 = vmul.f32 -1.442695, %v1284_v5 }
0x1148   :  { %2407 = vtanh.f32 %v1353_v6  ;;  %v2133_v37 = vmul.f32 -1.442695, %v1353_v6 }
0x114a   :  { %2409 = vpow2.f32 %v2133_v37 }
0x114b   :  { %v1348_v7 = vpop.f32.mrf.mxu3 }
0x114c   :  { %v1285_v35 = vpop.f32.mrf.mxu2 }
0x114d   :  { %v2406_v36 = vpop.eup %2405  ;;  %v3002_v35 = vld [vmem:[%s3172_s14] ss:$0 sm:$0xff] }
0x114e   :  { %v2408_v8 = vpop.eup %2407  ;;  %1309 = vrot.lane.b32.xlu1 %v2406_v36, %s2448_s1 }
0x114f   :  { %1379 = vrot.lane.b32.xlu2 %v2408_v8, %s2448_s1 }
0x1150   :  { %v2410_v51 = vpop.eup %2409 }
0x1151   :  { %v1357_v9 = vadd.f32 1.0, %v2410_v51 }
0x1153   :  { %2411 = vrcp.f32 %v1357_v9  ;;  %v1369_v17 = vand.u32 2147483648, %v1357_v9  ;;  %vm1363_vm11 = vweird.f32 %v1357_v9  ;;  %v1367_v18 = vand.u32 2147483647, %v1357_v9 }
0x1154   :  { %2413 = vpow2.f32 %v2131_v10 }
0x1155   :  { %v1370_v20 = vor.u32 1.1754944e-38, %v1369_v17  ;;  %vm1368_vm2 = vcmp.eq.f32.partialorder %v1367_v18, 8.507059e+37 }
0x1159   :  { %v2412_v11 = vpop.eup %2411 }
0x115a   :  { %v1359_v45 = vmul.f32 %v2412_v11, %v1357_v9  ;;  %v2414_v13 = vpop.eup %2413  ;;  %vm1364_vm1 = vweird.f32 %v2412_v11 }
0x115b   :  { %v1290_v15 = vadd.f32 1.0, %v2414_v13  ;;  %vm1365_vm14 = vmor %vm1363_vm11, %vm1364_vm1 }
0x115c   :  { %v1360_v12 = vsub.f32 1.0, %v1359_v45 }
0x115d   :  { %2415 = vrcp.f32 %v1290_v15  ;;  %v1302_v31 = vand.u32 2147483648, %v1290_v15  ;;  %vm1296_vm5 = vweird.f32 %v1290_v15  ;;  %v1300_v33 = vand.u32 2147483647, %v1290_v15 }
0x115e   :  { %v1361_v14 = vmul.f32 %v2412_v11, %v1360_v12 }
0x115f   :  { %v1303_v38 = vor.u32 1.1754944e-38, %v1302_v31  ;;  %vm1301_vm8 = vcmp.eq.f32.partialorder %v1300_v33, 8.507059e+37 }
0x1160   :  { %v1362_v16 = vadd.f32 %v2412_v11, %v1361_v14 }
0x1162   :  { %v1366_v19 = vsel %vm1365_vm14, %v2412_v11, %v1362_v16 }
0x1163   :  { %v1371_v22 = vsel %vm1368_vm2, %v1370_v20, %v1366_v19  ;;  %v2416_v23 = vpop.eup %2415 }
0x1164   :  { %v1292_v25 = vmul.f32 %v2416_v23, %v1290_v15  ;;  %vm1297_vm3 = vweird.f32 %v2416_v23  ;;  %v1377_v49 = vmul.f32 %v1375_v43, %v1371_v22 }
0x1165   :  { %vm1298_vm6 = vmor %vm1296_vm5, %vm1297_vm3 }
0x1166   :  { %v1293_v26 = vsub.f32 1.0, %v1292_v25 }
0x1168   :  { %v1294_v27 = vmul.f32 %v2416_v23, %v1293_v26 }
0x116a   :  { %v1295_v28 = vadd.f32 %v2416_v23, %v1294_v27 }
0x116c   :  { %v1299_v34 = vsel %vm1298_vm6, %v2416_v23, %v1295_v28 }
0x116d   :  { %v1304_v41 = vsel %vm1301_vm8, %v1303_v38, %v1299_v34 }
0x116e   :  { %v1307_v48 = vmul.f32 %v1304_v41, %v2961_v54 }
0x11a9   :  { %v1380_v21 = vpop.permute.xlu2 %1379 }
0x11aa   :  { %v1382_v24 = vmul.f32 %v1380_v21, %v1371_v22 }
0x11ac   :  { %1384 = vrot.lane.b32.xlu1 %v1382_v24, %s2449_s11 }
0x11c0   :  { %v1310_v39 = vpop.permute.xlu1 %1309 }
0x11c1   :  { %v1312_v42 = vmul.f32 %v1310_v39, %v1304_v41 }
0x11c3   :  { %1314 = vrot.lane.b32.xlu0 %v1312_v42, %s2449_s11 }
0x121e   :  { %v1385_v50 = vpop.permute.xlu1 %1384 }
0x121f   :  { %v2981_v29 = vadd.f32 %v1385_v50, %v1377_v49 }
0x1221   :  { %2417 = vtanh.f32 %v2981_v29 }
0x1227   :  { %v2418_v32 = vpop.eup %2417 }
0x1228   :  { %1390 = vrot.lane.b32.xlu0 %v2418_v32, %s2450_s0  ;;  %v1510_v32 = vrot.slane %v2981_v29, 6 }
0x1235   :  { %v1315_v56 = vpop.permute.xlu0 %1314 }
0x1236   :  { %v2986_v44 = vadd.f32 %v1315_v56, %v1307_v48 }
0x1238   :  { %2419 = vtanh.f32 %v2986_v44 }
0x123e   :  { %v2420_v52 = vpop.eup %2419 }
0x123f   :  { %1320 = vrot.lane.b32.xlu2 %v2420_v52, %s2450_s0 }
0x1299   :  { %v1321_v46 = vpop.permute.xlu2 %1320 }
0x129a   :  { %v2990_v60 = vmul.f32 %v1321_v46, %v1304_v41  ;;  %v1391_v40 = vpop.permute.xlu0 %1390 }
0x129b   :  { %v1393_v61 = vmul.f32 %v1391_v40, %v1371_v22 }
0x129c   :  { %v1398_v62 = vrot.slane %v2990_v60, 4 }
0x129d   :  { %v1464_v63 = vpack.c.bf16 %v1393_v61, %v1393_v61  ;;  %1395 = vrot.lane.b32.xlu1 %v1393_v61, %s2451_s13 }
0x129e   :  { %1399 = vrot.lane.b32.xlu2 %v1398_v62, %s2448_s1 }
0x129f   :  { %v1466_v54 = vrot.slane %v1464_v63, 2 }
0x12a1   :  { %1467 = vrot.lane.b32.xlu0 %v1466_v54, %s2451_s13 }
0x12f8   :  { %v1400_v0 = vpop.permute.xlu2 %1399 }
0x130f   :  { %v1396_v1 = vpop.permute.xlu1 %1395 }
0x1310   :  { %v1402_v3 = vsel %vm518_vm9, %v1396_v1, %v1400_v0 }
0x1311   :  { %v1403_v58 = vpack.c.bf16 %v1402_v3, %v1402_v3 }
0x1313   :  { %v1405_v4 = vrot.slane %v1403_v58, 2  ;;  %v1468_v59 = vpop.permute.xlu0 %1467 }
0x1314   :  { %2136 = vmatmul.msk.bf16.vlgmr.msra.gmra.mxu0 %vm518_vm9, %v1468_v59 }
0x1315   :  { %2134 = vmatmul.msk.bf16.vlgmr.msrb.gmra.mxu1 %vm598_vm10, %v1405_v4 }
0x1391   :  { %v1481_v5 = vpop.f32.mrf.mxu0 }
0x1392   :  { %v1486_v6 = vrot.slane %v1481_v5, 2  ;;  %v1418_v7 = vpop.f32.mrf.mxu1 }
0x1393   :  { %v1419_v36 = vadd.f32 %v3002_v35, %v1418_v7 }
0x1394   :  { %v1488_v8 = vadd.f32 %v1486_v6, %v2922_v2 }
0x1395   :  { %2421 = vtanh.f32 %v1419_v36  ;;  %v2135_v14 = vmul.f32 -1.442695, %v1419_v36 }
0x1396   :  { %2423 = vtanh.f32 %v1488_v8  ;;  %v2137_v10 = vmul.f32 -1.442695, %v1488_v8 }
0x1398   :  { %2425 = vpow2.f32 %v2137_v10 }
0x1399   :  { %v1483_v37 = vpop.f32.mrf.mxu0 }
0x139a   :  { %v1420_v51 = vpop.f32.mrf.mxu1 }
0x139b   :  { %v2422_v9 = vpop.eup %2421 }
0x139c   :  { %v2424_v11 = vpop.eup %2423  ;;  %1444 = vrot.lane.b32.xlu1 %v2422_v9, %s2448_s1 }
0x139d   :  { %1514 = vrot.lane.b32.xlu2 %v2424_v11, %s2448_s1 }
0x139e   :  { %v2426_v45 = vpop.eup %2425 }
0x139f   :  { %v1492_v12 = vadd.f32 1.0, %v2426_v45 }
0x13a1   :  { %2427 = vrcp.f32 %v1492_v12  ;;  %v1504_v20 = vand.u32 2147483648, %v1492_v12  ;;  %vm1498_vm11 = vweird.f32 %v1492_v12  ;;  %v1502_v21 = vand.u32 2147483647, %v1492_v12 }
0x13a2   :  { %2429 = vpow2.f32 %v2135_v14 }
0x13a3   :  { %v1505_v23 = vor.u32 1.1754944e-38, %v1504_v20  ;;  %vm1503_vm2 = vcmp.eq.f32.partialorder %v1502_v21, 8.507059e+37 }
0x13a7   :  { %v2428_v13 = vpop.eup %2427 }
0x13a8   :  { %v1494_v15 = vmul.f32 %v2428_v13, %v1492_v12  ;;  %v2430_v16 = vpop.eup %2429  ;;  %vm1499_vm1 = vweird.f32 %v2428_v13 }
0x13a9   :  { %v1425_v18 = vadd.f32 1.0, %v2430_v16  ;;  %vm1500_vm14 = vmor %vm1498_vm11, %vm1499_vm1 }
0x13aa   :  { %v1495_v2 = vsub.f32 1.0, %v1494_v15 }
0x13ab   :  { %2431 = vrcp.f32 %v1425_v18  ;;  %v1437_v38 = vand.u32 2147483648, %v1425_v18  ;;  %vm1431_vm5 = vweird.f32 %v1425_v18  ;;  %v1435_v39 = vand.u32 2147483647, %v1425_v18 }
0x13ac   :  { %v1496_v17 = vmul.f32 %v2428_v13, %v1495_v2 }
0x13ad   :  { %v1438_v42 = vor.u32 1.1754944e-38, %v1437_v38  ;;  %vm1436_vm8 = vcmp.eq.f32.partialorder %v1435_v39, 8.507059e+37  ;;  %v2276_v38 = vld [vmem:[%s3175_s17 + $0x4] sm:$0x30]  ;;  %v2275_v39 = vld [vmem:[%s3175_s17 + $0x4] sm:$0xf] }
0x13ae   :  { %v1497_v19 = vadd.f32 %v2428_v13, %v1496_v17 }
0x13b0   :  { %v1501_v22 = vsel %vm1500_vm14, %v2428_v13, %v1497_v19 }
0x13b1   :  { %v1506_v25 = vsel %vm1503_vm2, %v1505_v23, %v1501_v22  ;;  %v2432_v26 = vpop.eup %2431  ;;  %vm660_vm2 = vcmask 156672  }
0x13b2   :  { %v1427_v28 = vmul.f32 %v2432_v26, %v1425_v18  ;;  %vm1432_vm3 = vweird.f32 %v2432_v26  ;;  %v1512_v48 = vmul.f32 %v1510_v32, %v1506_v25 }
0x13b3   :  { %vm1433_vm6 = vmor %vm1431_vm5, %vm1432_vm3 }
0x13b4   :  { %v1428_v31 = vsub.f32 1.0, %v1427_v28 }
0x13b6   :  { %v1429_v33 = vmul.f32 %v2432_v26, %v1428_v31 }
0x13b8   :  { %v1430_v34 = vadd.f32 %v2432_v26, %v1429_v33 }
0x13ba   :  { %v1434_v41 = vsel %vm1433_vm6, %v2432_v26, %v1430_v34  ;;  %v2147_v34 = vld [vmem:[%s3175_s17] sm:$0xf]  ;;  %vm3214_vm6 = vcmask 146432  }
0x13bb   :  { %v1439_v49 = vsel %vm1436_vm8, %v1438_v42, %v1434_v41  ;;  %v2148_v41 = vor.u32 %v2276_v38, %v2147_v34  ;;  %v2149_v42 = vld [vmem:[%s3175_s17 + $0x8] sm:$0x30]  ;;  %vm3215_vm8 = vmmov %vm3214_vm6 }
0x13bc   :  { %v1442_v40 = vmul.f32 %v1439_v49, %v2986_v44 }
0x13f7   :  { %v1515_v24 = vpop.permute.xlu2 %1514 }
0x13f8   :  { %v1517_v27 = vmul.f32 %v1515_v24, %v1506_v25 }
0x13fa   :  { %1519 = vrot.lane.b32.xlu1 %v1517_v27, %s2449_s11 }
0x140e   :  { %v1445_v43 = vpop.permute.xlu1 %1444 }
0x140f   :  { %v1447_v50 = vmul.f32 %v1445_v43, %v1439_v49  ;;  %v2152_v43 = vor.u32 %v2275_v39, %v2149_v42 }
0x1411   :  { %1449 = vrot.lane.b32.xlu0 %v1447_v50, %s2449_s11  ;;  %v1662_v50 = vsel %vm479_vm13, %v2152_v43, 0 }
0x1412   :  { %1685 = vmatpush.bf16.msrb.mxu0 %v1662_v50  ;;  %v2297_v50 = vld [vmem:[%s3182_s23 + $0x10] sm:$0xff] }
0x1416   :  { %1956 = vmatpush.bf16.msra.mxu0 %v2297_v50 }
0x146c   :  { %v1520_v56 = vpop.permute.xlu1 %1519 }
0x146d   :  { %v1522_v52 = vadd.f32 %v1520_v56, %v1512_v48 }
0x146f   :  { %2433 = vtanh.f32 %v1522_v52 }
0x1475   :  { %v2434_v46 = vpop.eup %2433 }
0x1476   :  { %1525 = vrot.lane.b32.xlu0 %v2434_v46, %s2450_s0  ;;  %v2284_v46 = vld [vmem:[%s3176_s19 + $0x38] sm:$0xff] }
0x1477   :  { %1809 = vmatpush.bf16.msra.mxu2 %v2284_v46 }
0x1483   :  { %v1450_v61 = vpop.permute.xlu0 %1449 }
0x1484   :  { %v1452_v62 = vadd.f32 %v1450_v61, %v1442_v40  ;;  %v2283_v40 = vld [vmem:[%s3176_s19 + $0x30] sm:$0xff]  ;;  %v2282_v61 = vld [vmem:[%s3176_s19 + $0x28] sm:$0xff] }
0x1485   :  { %1810 = vmatpush.bf16.msra.mxu2 %v2283_v40 }
0x1486   :  { %2435 = vtanh.f32 %v1452_v62 }
0x1489   :  { %1811 = vmatpush.bf16.msra.mxu2 %v2282_v61 }
0x148c   :  { %v2436_v63 = vpop.eup %2435 }
0x148d   :  { %1455 = vrot.lane.b32.xlu2 %v2436_v63, %s2450_s0 }
0x14e7   :  { %v1456_v54 = vpop.permute.xlu2 %1455 }
0x14e8   :  { %v1458_v0 = vmul.f32 %v1456_v54, %v1439_v49  ;;  %v1526_v1 = vpop.permute.xlu0 %1525  ;;  %v1659_v49 = vsel %vm479_vm13, %v2148_v41, 0  ;;  %v2309_v54 = vld [vmem:[%s3174_s16] ss:$0 sm:$0xff] }
0x14e9   :  { %v1528_v3 = vmul.f32 %v1526_v1, %v1506_v25  ;;  %1671 = vmatpush.bf16.msra.mxu1 %v1659_v49 }
0x14ea   :  { %v1533_v29 = vrot.slane %v1458_v0, 2 }
0x14eb   :  { %1530 = vrot.lane.b32.xlu1 %v1528_v3, %s2451_s13 }
0x14ec   :  { %1534 = vrot.lane.b32.xlu2 %v1533_v29, %s2448_s1 }
0x1546   :  { %v1535_v58 = vpop.permute.xlu2 %1534 }
0x155d   :  { %v1531_v4 = vpop.permute.xlu1 %1530 }
0x155e   :  { %v1537_v59 = vsel %vm518_vm9, %v1531_v4, %v1535_v58  ;;  %v2280_v58 = vld [vmem:[%s3176_s19 + $0x18] sm:$0xff] }
0x155f   :  { %v1538_v44 = vpack.c.bf16 %v1537_v59, %v1537_v59  ;;  %v2288_v4 = vld [vmem:[%s3176_s19 + $0x58] sm:$0xff]  ;;  %v2279_v59 = vld [vmem:[%s3176_s19 + $0x10] sm:$0xff] }
0x1561   :  { %v1540_v5 = vrot.slane %v1538_v44, 3  ;;  %v2287_v44 = vld [vmem:[%s3176_s19 + $0x50] sm:$0xff] }
0x1563   :  { %2138 = vmatmul.msk.bf16.vlgmr.msrb.gmra.mxu2 %vm598_vm10, %v1540_v5  ;;  %v2278_v5 = vld [vmem:[%s3176_s19 + $0x8] sm:$0xff] }
0x15e6   :  { %v1553_v6 = vpop.f32.mrf.mxu2 }
0x15e7   :  { %v1554_v7 = vadd.f32 %v3002_v35, %v1553_v6  ;;  %v2286_v6 = vld [vmem:[%s3176_s19 + $0x48] sm:$0xff] }
0x15e9   :  { %2437 = vtanh.f32 %v1554_v7  ;;  %v2139_v37 = vmul.f32 -1.442695, %v1554_v7  ;;  %v2277_v7 = vld [vmem:[%s3176_s19] sm:$0xff] }
0x15eb   :  { %2439 = vpow2.f32 %v2139_v37  ;;  %v2293_v37 = vld [vmem:[%s3178_s21 + $0x20] sm:$0xff] }
0x15ee   :  { %v1555_v36 = vpop.f32.mrf.mxu2 }
0x15ef   :  { %v2438_v8 = vpop.eup %2437  ;;  %v2285_v36 = vld [vmem:[%s3176_s19 + $0x40] sm:$0xff] }
0x15f0   :  { %1579 = vrot.lane.b32.xlu0 %v2438_v8, %s2448_s1  ;;  %v2294_v8 = vld [vmem:[%s3178_s21 + $0x28] sm:$0xff] }
0x15f1   :  { %v2440_v51 = vpop.eup %2439  ;;  %1901 = vmatpush.bf16.msrb.mxu1 %v2294_v8 }
0x15f2   :  { %v1560_v9 = vadd.f32 1.0, %v2440_v51  ;;  %v1641_v51 = vld [vmem:[%s3179_s18] sm:$0x3] }
0x15f4   :  { %2441 = vrcp.f32 %v1560_v9  ;;  %v1572_v13 = vand.u32 2147483648, %v1560_v9  ;;  %vm1566_vm1 = vweird.f32 %v1560_v9  ;;  %v1570_v14 = vand.u32 2147483647, %v1560_v9 }
0x15f5   :  { %1902 = vmatpush.bf16.msrb.mxu1 %v2293_v37 }
0x15f6   :  { %v1573_v15 = vor.u32 1.1754944e-38, %v1572_v13  ;;  %vm1571_vm14 = vcmp.eq.f32.partialorder %v1570_v14, 8.507059e+37 }
0x15f8   :  { %657 = vrot.lane.b32.xlu0 %v2846_v30, %s2451_s13 }
0x15fa   :  { %v2442_v11 = vpop.eup %2441 }
0x15fb   :  { %v1562_v35 = vmul.f32 %v2442_v11, %v1560_v9  ;;  %vm1567_vm10 = vweird.f32 %v2442_v11 }
0x15fc   :  { %vm1568_vm11 = vmor %vm1566_vm1, %vm1567_vm10 }
0x15fd   :  { %v1563_v10 = vsub.f32 1.0, %v1562_v35  ;;  %v1643_v35 = vperm.slane %v1641_v51, 0 }
0x15ff   :  { %v1564_v45 = vmul.f32 %v2442_v11, %v1563_v10  ;;  %v1644_v10 = vperm.slane %v1641_v51, 1 }
0x1600   :  { %1062 = vrot.lane.b32.xlu0 %v2940_v57, %s2451_s13 }
0x1601   :  { %v1565_v12 = vadd.f32 %v2442_v11, %v1564_v45 }
0x1603   :  { %v1569_v30 = vsel %vm1568_vm11, %v2442_v11, %v1565_v12 }
0x1604   :  { %v1574_v2 = vsel %vm1571_vm14, %v1573_v15, %v1569_v30 }
0x1605   :  { %v1577_v20 = vmul.f32 %v1574_v2, %v1452_v62  ;;  %v2281_v62 = vld [vmem:[%s3176_s19 + $0x20] sm:$0xff] }
0x1606   :  { %1812 = vmatpush.bf16.msra.mxu2 %v2281_v62 }
0x1608   :  { %1460 = vrot.lane.b32.xlu0 %v1458_v0, %s2451_s13 }
0x160a   :  { %1813 = vmatpush.bf16.msra.mxu2 %v2280_v58 }
0x160e   :  { %1814 = vmatpush.bf16.msra.mxu2 %v2279_v59 }
0x1612   :  { %1815 = vmatpush.bf16.msra.mxu2 %v2278_v5 }
0x1616   :  { %1816 = vmatpush.bf16.msra.mxu2 %v2277_v7 }
0x1662   :  { %v1580_v57 = vpop.permute.xlu0 %1579 }
0x1663   :  { %v1582_v16 = vmul.f32 %v1580_v57, %v1574_v2 }
0x1665   :  { %1584 = vrot.lane.b32.xlu1 %v1582_v16, %s2449_s11 }
0x166a   :  { %v658_v17 = vpop.permute.xlu0 %657 }
0x166b   :  { %661 = vst.msk [vmem:[#allocation2] sm:$0x3] %vm660_vm2, %v658_v17 }
0x166d   :  { %792 = vrot.lane.b32.xlu1 %v2878_v47, %s2451_s13 }
0x1672   :  { %v1063_v18 = vpop.permute.xlu0 %1062 }
0x1673   :  { %1065 = vst.msk [vmem:[#allocation2 + $0x6] sm:$0x3] %vm660_vm2, %v1063_v18 }
0x1675   :  { %1191 = vrot.lane.b32.xlu1 %v2965_v55, %s2451_s13  ;;  %v1603_v55 = vld [vmem:[%s3173_s15 + $0x8] sm:$0x3] }
0x1676   :  { %v1614_v25 = vunpack.c.l.b16 %v1603_v55  ;;  %v2290_v55 = vld [vmem:[%s3178_s21 + $0x8] sm:$0xff] }
0x1678   :  { %v1616_v26 = vpack.c.b16 %v1614_v25, %v1614_v25  ;;  %v2289_v25 = vld [vmem:[%s3178_s21] sm:$0xff] }
0x167a   :  { %v1461_v19 = vpop.permute.xlu0 %1460  ;;  %v1622_v27 = vsel %vm522_vm15, %v1616_v26, 0  ;;  %v2310_v26 = vld [vmem:[%s3177_s20] ss:$0 sm:$0xff] }
0x167b   :  { %1463 = vst.msk [vmem:[#allocation2 + $0xc] sm:$0x3] %vm660_vm2, %v1461_v19  ;;  %1630 = vmatpush.bf16.msra.mxu3 %v1622_v27 }
0x16d7   :  { %v1585_v21 = vpop.permute.xlu1 %1584 }
0x16d8   :  { %v1587_v22 = vadd.f32 %v1585_v21, %v1577_v20 }
0x16da   :  { %2443 = vtanh.f32 %v1587_v22 }
0x16df   :  { %v793_v23 = vpop.permute.xlu1 %792 }
0x16e0   :  { %v2444_v24 = vpop.eup %2443  ;;  %795 = vst.msk [vmem:[#allocation2 + $0x2] sm:$0x3] %vm660_vm2, %v793_v23 }
0x16e1   :  { %1590 = vrot.lane.b32.xlu2 %v2444_v24, %s2450_s0  ;;  %v2292_v24 = vld [vmem:[%s3178_s21 + $0x18] sm:$0xff] }
0x16e2   :  { %1903 = vmatpush.bf16.msrb.mxu1 %v2292_v24 }
0x16e7   :  { %v1192_v47 = vpop.permute.xlu1 %1191 }
0x16e8   :  { %1194 = vst.msk [vmem:[#allocation2 + $0x8] sm:$0x3] %vm660_vm2, %v1192_v47  ;;  %v2291_v47 = vld [vmem:[%s3178_s21 + $0x10] sm:$0xff] }
0x16e9   :  { %927 = vrot.lane.b32.xlu2 %v2908_v53, %s2451_s13  ;;  %1904 = vmatpush.bf16.msrb.mxu1 %v2291_v47 }
0x16ed   :  { %1905 = vmatpush.bf16.msrb.mxu1 %v2290_v55 }
0x16f1   :  { %1325 = vrot.lane.b32.xlu2 %v2990_v60, %s2451_s13  ;;  %v2274_v60 = vld [vmem:[%s3173_s15] sm:$0xff]  ;;  %1906 = vmatpush.bf16.msrb.mxu1 %v2289_v25 }
0x16f2   :  { %1631 = vmatpush.bf16.msra.mxu3 %v2274_v60 }
0x16f6   :  { %1827 = vmatpush.bf16.msrb.mxu3 %v2288_v4 }
0x16fa   :  { %1828 = vmatpush.bf16.msrb.mxu3 %v2287_v44 }
0x16fe   :  { %1829 = vmatpush.bf16.msrb.mxu3 %v2286_v6 }
0x1702   :  { %1830 = vmatpush.bf16.msrb.mxu3 %v2285_v36 }
0x173b   :  { %v1591_v28 = vpop.permute.xlu2 %1590 }
0x173c   :  { %v1593_v31 = vmul.f32 %v1591_v28, %v1574_v2 }
0x173e   :  { %1595 = vrot.lane.b32.xlu1 %v1593_v31, %s2451_s13 }
0x1743   :  { %v928_v33 = vpop.permute.xlu2 %927 }
0x1744   :  { %930 = vst.msk [vmem:[#allocation2 + $0x4] sm:$0x3] %vm660_vm2, %v928_v33 }
0x174b   :  { %v1326_v53 = vpop.permute.xlu2 %1325  ;;  %v1599_v48 = vld [vmem:[#allocation2] sm:$0xff] }
0x174c   :  { %1328 = vst.msk [vmem:[#allocation2 + $0xa] sm:$0x3] %vm660_vm2, %v1326_v53 }
0x17b0   :  { %v1596_v32 = vpop.permute.xlu1 %1595 }
0x17b1   :  { %1598 = vst.msk [vmem:[#allocation2 + $0xe] sm:$0x3] %vm660_vm2, %v1596_v32  ;;  %v2296_v32 = vld [vmem:[%s3182_s23 + $0x8] sm:$0xff] }
0x17b2   :  { %1957 = vmatpush.bf16.msra.mxu0 %v2296_v32 }
0x17b8   :  { %v1600_v56 = vld [vmem:[#allocation2 + $0x8] sm:$0xff] }
0x17b9   :  { %v1604_v52 = vpack.c.bf16 %v1600_v56, %v1599_v48  ;;  %v2295_v48 = vld [vmem:[%s3182_s23] sm:$0xff] }
0x17ba   :  { %1958 = vmatpush.bf16.msra.mxu0 %v2295_v48 }
0x17bb   :  { %2144 = vmatmul.msk.bf16.vlgmr.msra.gmra.mxu3 %vm518_vm9, %v1604_v52  ;;  %v2311_v52 = vld [vmem:[%s3180_s22] ss:$0 sm:$0xff] }
0x183e   :  { %v1633_v63 = vpop.f32.mrf.mxu3 }
0x183f   :  { %v1634_v1 = vadd.f32 %v2309_v54, %v1633_v63 }
0x1846   :  { %v1635_v0 = vpop.f32.mrf.mxu3 }
0x1847   :  { %v1636_v3 = vadd.f32 %v2309_v54, %v1635_v0 }
0x1849   :  { %v1640_v29 = vpack.c.bf16 %v1636_v3, %v1634_v1  ;;  %v2312_v3 = vld [vmem:[%s3181_s24] ss:$0 sm:$0xff] }
0x184b   :  { %2153 = vmatmul.msk.bf16.vlgmr.msra.gmra.mxu1 %vm475_vm0, %v1640_v29  ;;  %2154 = vmatmul.msk.bf16.vlgmr.msrb.gmra.mxu0 %vm475_vm0, %v1640_v29 }
0x18c8   :  { %v1673_v9 = vpop.f32.mrf.mxu1  ;;  %v1687_v11 = vpop.f32.mrf.mxu0 }
0x18c9   :  { %v1674_v45 = vadd.f32 %v1673_v9, %v1643_v35  ;;  %v1688_v12 = vadd.f32 %v1687_v11, %v1644_v10 }
0x18cb   :  { %v1696_v30 = vmul.f32 0.01, %v1674_v45  ;;  %v1697_v15 = vmul.f32 0.01, %v1688_v12  ;;  %vm1692_vm13 = vcmp.gt.f32.partialorder %v1674_v45, 0.0  ;;  %vm1693_vm15 = vcmp.gt.f32.partialorder %v1688_v12, 0.0 }
0x18cd   :  { %v1700_v18 = vsel %vm1692_vm13, %v1674_v45, %v1696_v30  ;;  %v1701_v19 = vsel %vm1693_vm15, %v1688_v12, %v1697_v15 }
0x18d0   :  { %v1675_v13 = vpop.f32.mrf.mxu1  ;;  %v1689_v14 = vpop.f32.mrf.mxu0 }
0x18d1   :  { %v1676_v57 = vadd.f32 %v1675_v13, %v1643_v35  ;;  %v1690_v2 = vadd.f32 %v1689_v14, %v1644_v10 }
0x18d3   :  { %vm1694_vm0 = vcmp.gt.f32.partialorder %v1676_v57, 0.0  ;;  %v1698_v16 = vmul.f32 0.01, %v1676_v57  ;;  %vm1695_vm9 = vcmp.gt.f32.partialorder %v1690_v2, 0.0  ;;  %v1699_v17 = vmul.f32 0.01, %v1690_v2 }
0x18d5   :  { %v1702_v20 = vsel %vm1694_vm0, %v1676_v57, %v1698_v16  ;;  %v1703_v21 = vsel %vm1695_vm9, %v1690_v2, %v1699_v17 }
0x18d6   :  { %v1728_v22 = vpack.c.bf16 %v1702_v20, %v1700_v18  ;;  %v1729_v23 = vpack.c.bf16 %v1703_v21, %v1701_v19 }
0x18d8   :  { %1817 = vmatmul.bf16.vlgmr.msra.gmra.mxu2 %v1728_v22  ;;  %2203 = vmatmul.msk.bf16.vlgmr.msrb.gmra.mxu3 %vm408_vm12, %v1729_v23 }
0x195b   :  { %v1818_v27 = vpop.f32.mrf.mxu2  ;;  %v1832_v28 = vpop.f32.mrf.mxu3 }
0x195c   :  { %v1819_v31 = vadd.f32 %v2310_v26, %v1818_v27 }
0x195e   :  { %v1833_v33 = vadd.f32 %v1832_v28, %v1819_v31 }
0x1960   :  { %v1839_v38 = vmul.f32 0.01, %v1833_v33  ;;  %vm1837_vm12 = vcmp.gt.f32.partialorder %v1833_v33, 0.0 }
0x1962   :  { %v1841_v42 = vsel %vm1837_vm12, %v1833_v33, %v1839_v38 }
0x1963   :  { %v1820_v53 = vpop.f32.mrf.mxu2  ;;  %v1834_v34 = vpop.f32.mrf.mxu3 }
0x1964   :  { %v1821_v60 = vadd.f32 %v2310_v26, %v1820_v53 }
0x1966   :  { %v1835_v39 = vadd.f32 %v1834_v34, %v1821_v60 }
0x1968   :  { %vm1838_vm3 = vcmp.gt.f32.partialorder %v1835_v39, 0.0  ;;  %v1840_v41 = vmul.f32 0.01, %v1835_v39 }
0x196a   :  { %v1842_v43 = vsel %vm1838_vm3, %v1835_v39, %v1840_v41 }
0x196b   :  { %v1855_v49 = vpack.c.bf16 %v1842_v43, %v1841_v42 }
0x196d   :  { %2228 = vmatmul.msk.bf16.vlgmr.msrb.gmra.mxu1 %vm262_vm7, %v1855_v49 }
0x19ea   :  { %v1908_v56 = vpop.f32.mrf.mxu1 }
0x19eb   :  { %v1909_v46 = vadd.f32 %v2311_v52, %v1908_v56 }
0x19ed   :  { %v1915_v61 = vmul.f32 0.01, %v1909_v46  ;;  %vm1913_vm7 = vcmp.gt.f32.partialorder %v1909_v46, 0.0 }
0x19ef   :  { %v1917_v54 = vsel %vm1913_vm7, %v1909_v46, %v1915_v61 }
0x19f2   :  { %v1910_v40 = vpop.f32.mrf.mxu1 }
0x19f3   :  { %v1911_v62 = vadd.f32 %v2311_v52, %v1910_v40 }
0x19f5   :  { %vm1914_vm5 = vcmp.gt.f32.partialorder %v1911_v62, 0.0  ;;  %v1916_v63 = vmul.f32 0.01, %v1911_v62 }
0x19f7   :  { %v1918_v0 = vsel %vm1914_vm5, %v1911_v62, %v1916_v63 }
0x19f8   :  { %v1925_v1 = vpack.c.bf16 %v1918_v0, %v1917_v54 }
0x19fa   :  { %2241 = vmatmul.msk.bf16.vlgmr.msra.gmra.mxu0 %vm159_vm4, %v1925_v1 }
0x1a77   :  { %v1960_v29 = vpop.f32.mrf.mxu0 }
0x1a78   :  { %v1961_v58 = vadd.f32 %v2312_v3, %v1960_v29 }
0x1a7a   :  { %1965 = vst.msk [vmem:[%s3183_s26] sm:$0xff] %vm3214_vm6, %v1961_v58 }
0x1a7f   :  { %v1962_v4 = vpop.f32.mrf.mxu0 }
0x1a80   :  { %v1963_v59 = vadd.f32 %v2312_v3, %v1962_v4 }
0x1a82   :  { %1966 = vst.msk [vmem:[%s3183_s26 + $0x8] sm:$0xff] %vm3215_vm8, %v1963_v59 }

</bundles_post_ra>
